<compile_context>
chip_gen: v7x
topology: tpu7x:2x2x1
jax: 0.10.0
libtpu: 0.0.40
codegen_flags: <defaults>
</compile_context>

<pallas_src>
import math
from functools import partial

import numpy as np
import jax
import jax.numpy as jnp
from jax.experimental import pallas as pl
from jax.experimental.pallas import tpu as pltpu

EPS = 1e-6
BF16 = jnp.bfloat16


# ----------------------------- kernel helpers ------------------------------

def _layernorm(x, gamma, beta):
    mu = jnp.mean(x, axis=-1, keepdims=True)
    var = jnp.mean((x - mu) ** 2, axis=-1, keepdims=True)
    return (x - mu) * jax.lax.rsqrt(var + EPS) * gamma + beta


def _mm(a, b):
    """MXU matmul: bf16 inputs, f32 accumulation."""
    return jnp.dot(a.astype(BF16), b.astype(BF16),
                   preferred_element_type=jnp.float32)


# ------------------------------- fused kernel --------------------------------

def fused_encoder_kernel(*refs, num_conv_block, ksize, num_head,
                         batch_block, seq_len):
    it = iter(refs)
    x_ref = next(it)                     # (Bt*S, D) activation slab
    pe_ref = next(it)                    # (Bt*S, D) tiled positional encoding
    conv_refs = [[next(it) for _ in range(5)] for _ in range(num_conv_block)]
    (wqkv_ref, bqkv_ref, wo_ref, bo_ref, ag_ref, ab_ref) = [next(it) for _ in range(6)]
    (w1_ref, b1_ref, w2_ref, b2_ref, fg_ref, fb_ref) = [next(it) for _ in range(6)]
    o_ref = next(it)
    attn_scr = next(it)                  # VMEM scratch (Bt*S, D) f32

    S = seq_len
    Bt = batch_block

    # ---- positional encoding (fused) ----------------------------------------
    x = x_ref[...] + pe_ref[...]                              # (M, D) f32
    M, D = x.shape
    pad = ksize // 2

    # ---- hoisted conv boundary masks (periodic in S: no cross-batch leak) ----
    row = jax.lax.broadcasted_iota(jnp.int32, (M, 1), 0) % S
    masks = {}
    for k in range(ksize):
        off = k - pad
        if off != 0:
            masks[off] = jnp.logical_and(row + off >= 0,
                                         row + off < S).astype(jnp.float32)

    # ---- depthwise-separable conv residual blocks ----------------------------
    for dw_ref, pw_w_ref, pw_b_ref, g_ref, b_ref in conv_refs:
        ln = _layernorm(x, g_ref[...], b_ref[...])
        # depthwise conv via XLU rolls + precomputed boundary masks
        y = ln * dw_ref[pad]                                  # center tap init
        for k in range(ksize):
            off = k - pad
            if off == 0:
                continue
            rolled = pltpu.roll(ln, shift=(-off) % M, axis=0)  # rolled[s] = ln[s+off]
            y = y + (rolled * masks[off]) * dw_ref[k]
        # pointwise (1x1) conv + bias, ReLU, residual
        z = _mm(y, pw_w_ref[...]) + pw_b_ref[...]
        x = jnp.maximum(z, 0.0) + x

    # ---- multi-head self-attention residual block ----------------------------
    dh = D // num_head
    scale = 1.0 / math.sqrt(dh)
    ln = _layernorm(x, ag_ref[...], ab_ref[...]).astype(BF16)  # cast once
    qkv = jnp.dot(ln, wqkv_ref[...],
                  preferred_element_type=jnp.float32) + bqkv_ref[...]   # (M, 3D)
    q = qkv[:, :D]
    k_ = qkv[:, D:2 * D]
    v = qkv[:, 2 * D:]
    wo = wo_ref[...]

    for b in range(Bt):                                        # per-sequence softmax
        lo_r, hi_r = b * S, (b + 1) * S
        acc = jnp.zeros((S, D), jnp.float32)
        for h in range(num_head):
            lo, hi = h * dh, (h + 1) * dh
            qh = q[lo_r:hi_r, lo:hi]
            kh = k_[lo_r:hi_r, lo:hi]
            vh = v[lo_r:hi_r, lo:hi]
            scores = jax.lax.dot_general(
                qh.astype(BF16), kh.astype(BF16), (((1,), (1,)), ((), ())),
                preferred_element_type=jnp.float32) * scale
            scores = scores - jnp.max(scores, axis=-1, keepdims=True)
            p = jnp.exp(scores)
            p = p * pl.reciprocal(jnp.sum(p, axis=-1, keepdims=True), approx=True)
            pv = _mm(p, vh)                                    # (S, dh)
            acc = acc + _mm(pv, wo[lo:hi, :])                  # fold W_O per head
        attn_scr[pl.ds(b * S, S), :] = acc
    x = attn_scr[...] + bo_ref[...] + x

    # ---- position-wise feed-forward residual block ----------------------------
    ln = _layernorm(x, fg_ref[...], fb_ref[...])
    hid = jnp.maximum(_mm(ln, w1_ref[...]) + b1_ref[...], 0.0)
    y = _mm(hid, w2_ref[...]) + b2_ref[...]
    o_ref[...] = (y + x).astype(o_ref.dtype)


# ------------------------------ pallas wrapper --------------------------------

def encoder_block_forward(x, p, *, num_conv_block, ksize, num_head, batch_block=2):
    B, S, D = x.shape
    assert B % batch_block == 0, "batch must be divisible by batch_block"
    Bt = batch_block
    M = Bt * S

    params = [jnp.tile(p["pe"], (Bt, 1))]                      # (Bt*S, D)
    for cp in p["conv"]:
        params += [cp["dw"], cp["pw_w"], cp["pw_b"], cp["gamma"], cp["beta"]]
    ap = p["attn"]
    params += [ap["wqkv"], ap["bqkv"], ap["wo"], ap["bo"], ap["gamma"], ap["beta"]]
    fp = p["ffn"]
    params += [fp["w1"], fp["b1"], fp["w2"], fp["b2"], fp["gamma"], fp["beta"]]

    # lane-dense 2-D activation slab: (B*S, D) with D a multiple of 128
    x2d = x.reshape(B * S, D)
    x_spec = pl.BlockSpec((M, D), lambda b: (b, 0))
    in_specs = [x_spec]
    for prm in params:
        in_specs.append(pl.BlockSpec(prm.shape, lambda b, _nd=prm.ndim: (0,) * _nd))

    # advisory cost estimate for XLA's scheduler
    param_bytes = sum(int(np.prod(prm.shape)) * prm.dtype.itemsize for prm in params)
    matmul_flops = 2 * B * S * D * D * (num_conv_block + 3 + 1 + 8) + 4 * B * S * S * D
    cost = pl.CostEstimate(
        flops=int(matmul_flops),
        transcendentals=int(B * num_head * S * S + B * S * (num_conv_block + 2)),
        bytes_accessed=int(2 * B * S * D * 4 + param_bytes),
    )

    # explicit VMEM budget with headroom (v7x has only 64 MiB physical VMEM)
    vmem_limit = int(min(96 * 2**20,
                         max(16 * 2**20, 4 * param_bytes + 32 * M * D * 4)))

    kernel = partial(fused_encoder_kernel, num_conv_block=num_conv_block,
                     ksize=ksize, num_head=num_head,
                     batch_block=Bt, seq_len=S)
    out2d = pl.pallas_call(
        kernel,
        grid=(B // Bt,),
        in_specs=in_specs,
        out_specs=x_spec,
        out_shape=jax.ShapeDtypeStruct((B * S, D), x.dtype),
        scratch_shapes=[pltpu.VMEM((M, D), jnp.float32)],
        compiler_params=pltpu.CompilerParams(
            dimension_semantics=("parallel",),
            vmem_limit_bytes=vmem_limit),
        cost_estimate=cost,
    )(x2d, *params)
    return out2d.reshape(B, S, D)


# ------------------------------ parameter init --------------------------------

def init_params(key, *, S, D, K, num_conv_block):
    d_ff = 4 * D
    keys = jax.random.split(key, 8 * num_conv_block + 32)
    kit = iter(keys)

    def normal(shape, scale=0.1, dtype=jnp.float32):
        return (scale * jax.random.normal(next(kit), shape, jnp.float32)).astype(dtype)

    # sinusoidal positional encoding (S, D): pe[:,0::2]=sin, pe[:,1::2]=cos
    pos = jnp.arange(S, dtype=jnp.float32)[:, None]
    idx = jnp.arange(0, D, 2, dtype=jnp.float32)[None, :]
    div = jnp.exp(-idx * (math.log(10000.0) / D))
    pe = jnp.stack([jnp.sin(pos * div), jnp.cos(pos * div)], axis=-1).reshape(S, D)

    conv = []
    for _ in range(num_conv_block):
        conv.append(dict(
            dw=normal((K, 1, D)),                 # depthwise taps (f32, VPU)
            pw_w=normal((D, D), dtype=BF16),      # pointwise weights (bf16, MXU)
            pw_b=normal((1, D)),
            gamma=1.0 + normal((1, D)),
            beta=normal((1, D)),
        ))

    attn = dict(
        wqkv=normal((D, 3 * D), dtype=BF16),      # fused Q|K|V projection
        bqkv=normal((1, 3 * D)),
        wo=normal((D, D), dtype=BF16), bo=normal((1, D)),
        gamma=1.0 + normal((1, D)), beta=normal((1, D)),
    )
    ffn = dict(
        w1=normal((D, d_ff), dtype=BF16), b1=normal((1, d_ff)),
        w2=normal((d_ff, D), dtype=BF16), b2=normal((1, D)),
        gamma=1.0 + normal((1, D)), beta=normal((1, D)),
    )
    return dict(pe=pe, conv=conv, attn=attn, ffn=ffn)


# ----------------------------- pure-JAX reference ------------------------------

def reference_forward(x, p, *, num_conv_block, ksize, num_head):
    prec = jax.lax.Precision.HIGHEST
    f32 = jnp.float32

    def ln(v, g, b):
        mu = v.mean(-1, keepdims=True)
        var = ((v - mu) ** 2).mean(-1, keepdims=True)
        return (v - mu) / jnp.sqrt(var + EPS) * g + b

    B, S, D = x.shape
    dh = D // num_head
    pad = ksize // 2

    x = x + p["pe"][None]
    for i in range(num_conv_block):
        cp = p["conv"][i]
        h = ln(x, cp["gamma"], cp["beta"])
        hpad = jnp.pad(h, ((0, 0), (pad, pad), (0, 0)))
        y = sum(hpad[:, k:k + S, :] * cp["dw"][k] for k in range(ksize))
        z = jnp.einsum("bsd,de->bse", y, cp["pw_w"].astype(f32),
                       precision=prec) + cp["pw_b"]
        x = jnp.maximum(z, 0.0) + x

    ap = p["attn"]
    h = ln(x, ap["gamma"], ap["beta"])
    qkv = jnp.einsum("bsd,de->bse", h, ap["wqkv"].astype(f32),
                     precision=prec) + ap["bqkv"]
    q, k, v = qkv[..., :D], qkv[..., D:2 * D], qkv[..., 2 * D:]
    qh = q.reshape(B, S, num_head, dh).transpose(0, 2, 1, 3)
    kh = k.reshape(B, S, num_head, dh).transpose(0, 2, 1, 3)
    vh = v.reshape(B, S, num_head, dh).transpose(0, 2, 1, 3)
    scores = jnp.einsum("bhqd,bhkd->bhqk", qh, kh, precision=prec) / math.sqrt(dh)
    probs = jax.nn.softmax(scores, axis=-1)
    ctx = jnp.einsum("bhqk,bhkd->bhqd", probs, vh, precision=prec)
    ctx = ctx.transpose(0, 2, 1, 3).reshape(B, S, D)
    x = jnp.einsum("bsd,de->bse", ctx, ap["wo"].astype(f32),
                   precision=prec) + ap["bo"] + x

    fp = p["ffn"]
    h = ln(x, fp["gamma"], fp["beta"])
    hid = jnp.maximum(
        jnp.einsum("bsd,dh->bsh", h, fp["w1"].astype(f32), precision=prec) + fp["b1"],
        0.0)
    x = jnp.einsum("bsh,hd->bsd", hid, fp["w2"].astype(f32),
                   precision=prec) + fp["b2"] + x
    return x


# ----------------------------------- main --------------------------------------

if __name__ == "__main__":
    # D=128 / H=8 / K=5 are the module defaults; D=128 keeps the lane dim dense.
    B, S, D, H, K, NCONV = 4, 16, 128, 8, 5, 2
    BT = 2  # batch elements folded per grid step (grid=(2,) -> both TCs busy on v7x)

    key = jax.random.PRNGKey(0)
    kx, kp = jax.random.split(key)
    x = jax.random.normal(kx, (B, S, D), jnp.float32)
    params = init_params(kp, S=S, D=D, K=K, num_conv_block=NCONV)

    out = encoder_block_forward(x, params, num_conv_block=NCONV, ksize=K,
                                num_head=H, batch_block=BT)
    out = jax.block_until_ready(out)

    ref = reference_forward(x, params, num_conv_block=NCONV, ksize=K, num_head=H)
    assert out.shape == x.shape and out.dtype == x.dtype
    # bf16 MXU inputs + approx reciprocal in the softmax denominator deviate
    # slightly from the f32-HIGHEST reference; 1e-1 abs still catches any
    # structural bug (wrong mask / slice / residual), which would be O(1).
    err = float(jnp.max(jnp.abs(out - ref)))
    if not np.isfinite(err) or err > 1e-1:
        raise AssertionError(f"mismatch vs reference: max abs err {err}")

    print("KERNEL_OK")
</pallas_src>

<mosaic_0001>
module attributes {stable_mosaic.version = 11 : i64} {
  func.func @fused_encoder_kernel(%arg0: i32, %arg1: memref<32x128xf32, #tpu.memory_space<vmem>>, %arg2: memref<32x128xf32, #tpu.memory_space<vmem>>, %arg3: memref<5x1x128xf32, #tpu.memory_space<vmem>>, %arg4: memref<128x128xbf16, #tpu.memory_space<vmem>>, %arg5: memref<1x128xf32, #tpu.memory_space<vmem>>, %arg6: memref<1x128xf32, #tpu.memory_space<vmem>>, %arg7: memref<1x128xf32, #tpu.memory_space<vmem>>, %arg8: memref<5x1x128xf32, #tpu.memory_space<vmem>>, %arg9: memref<128x128xbf16, #tpu.memory_space<vmem>>, %arg10: memref<1x128xf32, #tpu.memory_space<vmem>>, %arg11: memref<1x128xf32, #tpu.memory_space<vmem>>, %arg12: memref<1x128xf32, #tpu.memory_space<vmem>>, %arg13: memref<128x384xbf16, #tpu.memory_space<vmem>>, %arg14: memref<1x384xf32, #tpu.memory_space<vmem>>, %arg15: memref<128x128xbf16, #tpu.memory_space<vmem>>, %arg16: memref<1x128xf32, #tpu.memory_space<vmem>>, %arg17: memref<1x128xf32, #tpu.memory_space<vmem>>, %arg18: memref<1x128xf32, #tpu.memory_space<vmem>>, %arg19: memref<128x512xbf16, #tpu.memory_space<vmem>>, %arg20: memref<1x512xf32, #tpu.memory_space<vmem>>, %arg21: memref<512x128xbf16, #tpu.memory_space<vmem>>, %arg22: memref<1x128xf32, #tpu.memory_space<vmem>>, %arg23: memref<1x128xf32, #tpu.memory_space<vmem>>, %arg24: memref<1x128xf32, #tpu.memory_space<vmem>>, %arg25: memref<32x128xf32, #tpu.memory_space<vmem>>, %arg26: memref<32x128xf32, #tpu.memory_space<vmem>>) attributes {dimension_semantics = [#tpu.dimension_semantics<parallel>], iteration_bounds = array<i64: 2>, scalar_prefetch = 0 : i64, scratch_operands = 1 : i64, tpu.core_type = #tpu.core_type<tc>, window_params = [{transform_indices = @transform_0, window_bounds = array<i64: 32, 128>}, {pipeline_mode = #tpu.pipeline_mode<synchronous>, transform_indices = @transform_1, window_bounds = array<i64: 32, 128>}, {pipeline_mode = #tpu.pipeline_mode<synchronous>, transform_indices = @transform_2, window_bounds = array<i64: 5, 1, 128>}, {pipeline_mode = #tpu.pipeline_mode<synchronous>, transform_indices = @transform_3, window_bounds = array<i64: 128, 128>}, {pipeline_mode = #tpu.pipeline_mode<synchronous>, transform_indices = @transform_4, window_bounds = array<i64: 1, 128>}, {pipeline_mode = #tpu.pipeline_mode<synchronous>, transform_indices = @transform_5, window_bounds = array<i64: 1, 128>}, {pipeline_mode = #tpu.pipeline_mode<synchronous>, transform_indices = @transform_6, window_bounds = array<i64: 1, 128>}, {pipeline_mode = #tpu.pipeline_mode<synchronous>, transform_indices = @transform_7, window_bounds = array<i64: 5, 1, 128>}, {pipeline_mode = #tpu.pipeline_mode<synchronous>, transform_indices = @transform_8, window_bounds = array<i64: 128, 128>}, {pipeline_mode = #tpu.pipeline_mode<synchronous>, transform_indices = @transform_9, window_bounds = array<i64: 1, 128>}, {pipeline_mode = #tpu.pipeline_mode<synchronous>, transform_indices = @transform_10, window_bounds = array<i64: 1, 128>}, {pipeline_mode = #tpu.pipeline_mode<synchronous>, transform_indices = @transform_11, window_bounds = array<i64: 1, 128>}, {pipeline_mode = #tpu.pipeline_mode<synchronous>, transform_indices = @transform_12, window_bounds = array<i64: 128, 384>}, {pipeline_mode = #tpu.pipeline_mode<synchronous>, transform_indices = @transform_13, window_bounds = array<i64: 1, 384>}, {pipeline_mode = #tpu.pipeline_mode<synchronous>, transform_indices = @transform_14, window_bounds = array<i64: 128, 128>}, {pipeline_mode = #tpu.pipeline_mode<synchronous>, transform_indices = @transform_15, window_bounds = array<i64: 1, 128>}, {pipeline_mode = #tpu.pipeline_mode<synchronous>, transform_indices = @transform_16, window_bounds = array<i64: 1, 128>}, {pipeline_mode = #tpu.pipeline_mode<synchronous>, transform_indices = @transform_17, window_bounds = array<i64: 1, 128>}, {pipeline_mode = #tpu.pipeline_mode<synchronous>, transform_indices = @transform_18, window_bounds = array<i64: 128, 512>}, {pipeline_mode = #tpu.pipeline_mode<synchronous>, transform_indices = @transform_19, window_bounds = array<i64: 1, 512>}, {pipeline_mode = #tpu.pipeline_mode<synchronous>, transform_indices = @transform_20, window_bounds = array<i64: 512, 128>}, {pipeline_mode = #tpu.pipeline_mode<synchronous>, transform_indices = @transform_21, window_bounds = array<i64: 1, 128>}, {pipeline_mode = #tpu.pipeline_mode<synchronous>, transform_indices = @transform_22, window_bounds = array<i64: 1, 128>}, {pipeline_mode = #tpu.pipeline_mode<synchronous>, transform_indices = @transform_23, window_bounds = array<i64: 1, 128>}, {transform_indices = @transform_24, window_bounds = array<i64: 32, 128>}]} {
    %c0 = arith.constant 0 : index
    %c0_0 = arith.constant 0 : index
    %0 = vector.load %arg1[%c0, %c0_0] : memref<32x128xf32, #tpu.memory_space<vmem>>, vector<32x128xf32>
    %c0_1 = arith.constant 0 : index
    %c0_2 = arith.constant 0 : index
    %1 = vector.load %arg2[%c0_1, %c0_2] : memref<32x128xf32, #tpu.memory_space<vmem>>, vector<32x128xf32>
    %2 = arith.addf %0, %1 : vector<32x128xf32>
    %3 = tpu.iota {dimensions = array<i32: 0>} : vector<32x1xi32>
    %c16_i32 = arith.constant 16 : i32
    %c0_i32 = arith.constant 0 : i32
    %4 = arith.cmpi eq, %c16_i32, %c0_i32 : i32
    %c1_i32 = arith.constant 1 : i32
    %5 = arith.select %4, %c1_i32, %c16_i32 : i32
    %6 = vector.broadcast %5 : i32 to vector<32x1xi32>
    %7 = arith.remsi %3, %6 : vector<32x1xi32>
    %c0_i32_3 = arith.constant 0 : i32
    %8 = vector.broadcast %c0_i32_3 : i32 to vector<32x1xi32>
    %9 = arith.cmpi ne, %7, %8 : vector<32x1xi32>
    %c0_i32_4 = arith.constant 0 : i32
    %10 = vector.broadcast %c0_i32_4 : i32 to vector<32x1xi32>
    %11 = arith.cmpi slt, %7, %10 : vector<32x1xi32>
    %c0_i32_5 = arith.constant 0 : i32
    %12 = arith.cmpi slt, %5, %c0_i32_5 : i32
    %13 = vector.broadcast %12 : i1 to vector<32x1xi1>
    %14 = vector.broadcast %13 : vector<32x1xi1> to vector<32x1xi1>
    %15 = arith.xori %11, %14 : vector<32x1xi1>
    %16 = arith.andi %15, %9 : vector<32x1xi1>
    %17 = vector.broadcast %5 : i32 to vector<32x1xi32>
    %18 = arith.addi %7, %17 : vector<32x1xi32>
    %19 = arith.select %16, %18, %7 : vector<32x1xi1>, vector<32x1xi32>
    %c-2_i32 = arith.constant -2 : i32
    %20 = vector.broadcast %c-2_i32 : i32 to vector<32x1xi32>
    %21 = arith.addi %19, %20 : vector<32x1xi32>
    %c0_i32_6 = arith.constant 0 : i32
    %22 = vector.broadcast %c0_i32_6 : i32 to vector<32x1xi32>
    %23 = arith.cmpi sge, %21, %22 : vector<32x1xi32>
    %c-2_i32_7 = arith.constant -2 : i32
    %24 = vector.broadcast %c-2_i32_7 : i32 to vector<32x1xi32>
    %25 = arith.addi %19, %24 : vector<32x1xi32>
    %c16_i32_8 = arith.constant 16 : i32
    %26 = vector.broadcast %c16_i32_8 : i32 to vector<32x1xi32>
    %27 = arith.cmpi slt, %25, %26 : vector<32x1xi32>
    %28 = arith.andi %23, %27 : vector<32x1xi1>
    %29 = arith.extui %28 : vector<32x1xi1> to vector<32x1xi32>
    %30 = arith.sitofp %29 : vector<32x1xi32> to vector<32x1xf32>
    %c-1_i32 = arith.constant -1 : i32
    %31 = vector.broadcast %c-1_i32 : i32 to vector<32x1xi32>
    %32 = arith.addi %19, %31 : vector<32x1xi32>
    %c0_i32_9 = arith.constant 0 : i32
    %33 = vector.broadcast %c0_i32_9 : i32 to vector<32x1xi32>
    %34 = arith.cmpi sge, %32, %33 : vector<32x1xi32>
    %c-1_i32_10 = arith.constant -1 : i32
    %35 = vector.broadcast %c-1_i32_10 : i32 to vector<32x1xi32>
    %36 = arith.addi %19, %35 : vector<32x1xi32>
    %c16_i32_11 = arith.constant 16 : i32
    %37 = vector.broadcast %c16_i32_11 : i32 to vector<32x1xi32>
    %38 = arith.cmpi slt, %36, %37 : vector<32x1xi32>
    %39 = arith.andi %34, %38 : vector<32x1xi1>
    %40 = arith.extui %39 : vector<32x1xi1> to vector<32x1xi32>
    %41 = arith.sitofp %40 : vector<32x1xi32> to vector<32x1xf32>
    %c1_i32_12 = arith.constant 1 : i32
    %42 = vector.broadcast %c1_i32_12 : i32 to vector<32x1xi32>
    %43 = arith.addi %19, %42 : vector<32x1xi32>
    %c0_i32_13 = arith.constant 0 : i32
    %44 = vector.broadcast %c0_i32_13 : i32 to vector<32x1xi32>
    %45 = arith.cmpi sge, %43, %44 : vector<32x1xi32>
    %c1_i32_14 = arith.constant 1 : i32
    %46 = vector.broadcast %c1_i32_14 : i32 to vector<32x1xi32>
    %47 = arith.addi %19, %46 : vector<32x1xi32>
    %c16_i32_15 = arith.constant 16 : i32
    %48 = vector.broadcast %c16_i32_15 : i32 to vector<32x1xi32>
    %49 = arith.cmpi slt, %47, %48 : vector<32x1xi32>
    %50 = arith.andi %45, %49 : vector<32x1xi1>
    %51 = arith.extui %50 : vector<32x1xi1> to vector<32x1xi32>
    %52 = arith.sitofp %51 : vector<32x1xi32> to vector<32x1xf32>
    %c2_i32 = arith.constant 2 : i32
    %53 = vector.broadcast %c2_i32 : i32 to vector<32x1xi32>
    %54 = arith.addi %19, %53 : vector<32x1xi32>
    %c0_i32_16 = arith.constant 0 : i32
    %55 = vector.broadcast %c0_i32_16 : i32 to vector<32x1xi32>
    %56 = arith.cmpi sge, %54, %55 : vector<32x1xi32>
    %c2_i32_17 = arith.constant 2 : i32
    %57 = vector.broadcast %c2_i32_17 : i32 to vector<32x1xi32>
    %58 = arith.addi %19, %57 : vector<32x1xi32>
    %c16_i32_18 = arith.constant 16 : i32
    %59 = vector.broadcast %c16_i32_18 : i32 to vector<32x1xi32>
    %60 = arith.cmpi slt, %58, %59 : vector<32x1xi32>
    %61 = arith.andi %56, %60 : vector<32x1xi1>
    %62 = arith.extui %61 : vector<32x1xi1> to vector<32x1xi32>
    %63 = arith.sitofp %62 : vector<32x1xi32> to vector<32x1xf32>
    %c0_19 = arith.constant 0 : index
    %c0_20 = arith.constant 0 : index
    %64 = vector.load %arg6[%c0_19, %c0_20] : memref<1x128xf32, #tpu.memory_space<vmem>>, vector<1x128xf32>
    %c0_21 = arith.constant 0 : index
    %c0_22 = arith.constant 0 : index
    %65 = vector.load %arg7[%c0_21, %c0_22] : memref<1x128xf32, #tpu.memory_space<vmem>>, vector<1x128xf32>
    %cst = arith.constant dense<0.000000e+00> : vector<32xf32>
    %66 = vector.multi_reduction <add>, %2, %cst [1] : vector<32x128xf32> to vector<32xf32>
    %67 = vector.shape_cast %66 : vector<32xf32> to vector<32x1xf32>
    %cst_23 = arith.constant 1.280000e+02 : f32
    %68 = vector.broadcast %cst_23 : f32 to vector<32x1xf32>
    %69 = arith.divf %67, %68 : vector<32x1xf32>
    %70 = vector.broadcast %69 : vector<32x1xf32> to vector<32x128xf32>
    %71 = arith.subf %2, %70 : vector<32x128xf32>
    %72 = arith.mulf %71, %71 : vector<32x128xf32>
    %cst_24 = arith.constant dense<0.000000e+00> : vector<32xf32>
    %73 = vector.multi_reduction <add>, %72, %cst_24 [1] : vector<32x128xf32> to vector<32xf32>
    %74 = vector.shape_cast %73 : vector<32xf32> to vector<32x1xf32>
    %cst_25 = arith.constant 1.280000e+02 : f32
    %75 = vector.broadcast %cst_25 : f32 to vector<32x1xf32>
    %76 = arith.divf %74, %75 : vector<32x1xf32>
    %77 = vector.broadcast %69 : vector<32x1xf32> to vector<32x128xf32>
    %78 = arith.subf %2, %77 : vector<32x128xf32>
    %cst_26 = arith.constant 9.99999997E-7 : f32
    %79 = vector.broadcast %cst_26 : f32 to vector<32x1xf32>
    %80 = arith.addf %76, %79 : vector<32x1xf32>
    %81 = math.rsqrt %80 : vector<32x1xf32>
    %82 = vector.broadcast %81 : vector<32x1xf32> to vector<32x128xf32>
    %83 = arith.mulf %78, %82 : vector<32x128xf32>
    %84 = vector.broadcast %64 : vector<1x128xf32> to vector<32x128xf32>
    %85 = arith.mulf %83, %84 : vector<32x128xf32>
    %86 = vector.broadcast %65 : vector<1x128xf32> to vector<32x128xf32>
    %87 = arith.addf %85, %86 : vector<32x128xf32>
    %c2 = arith.constant 2 : index
    %c0_27 = arith.constant 0 : index
    %c0_28 = arith.constant 0 : index
    %88 = vector.load %arg3[%c2, %c0_27, %c0_28] : memref<5x1x128xf32, #tpu.memory_space<vmem>>, vector<1x1x128xf32>
    %89 = vector.shape_cast %88 : vector<1x1x128xf32> to vector<1x128xf32>
    %90 = vector.broadcast %89 : vector<1x128xf32> to vector<32x128xf32>
    %91 = arith.mulf %87, %90 : vector<32x128xf32>
    %c2_i32_29 = arith.constant 2 : i32
    %92 = tpu.dynamic_rotate %87 by %c2_i32_29 dim 0 : vector<32x128xf32>, i32 -> vector<32x128xf32>
    %93 = vector.broadcast %30 : vector<32x1xf32> to vector<32x128xf32>
    %94 = arith.mulf %92, %93 : vector<32x128xf32>
    %c0_30 = arith.constant 0 : index
    %c0_31 = arith.constant 0 : index
    %c0_32 = arith.constant 0 : index
    %95 = vector.load %arg3[%c0_30, %c0_31, %c0_32] : memref<5x1x128xf32, #tpu.memory_space<vmem>>, vector<1x1x128xf32>
    %96 = vector.shape_cast %95 : vector<1x1x128xf32> to vector<1x128xf32>
    %97 = vector.broadcast %96 : vector<1x128xf32> to vector<32x128xf32>
    %98 = arith.mulf %94, %97 : vector<32x128xf32>
    %99 = arith.addf %91, %98 : vector<32x128xf32>
    %c1_i32_33 = arith.constant 1 : i32
    %100 = tpu.dynamic_rotate %87 by %c1_i32_33 dim 0 : vector<32x128xf32>, i32 -> vector<32x128xf32>
    %101 = vector.broadcast %41 : vector<32x1xf32> to vector<32x128xf32>
    %102 = arith.mulf %100, %101 : vector<32x128xf32>
    %c1 = arith.constant 1 : index
    %c0_34 = arith.constant 0 : index
    %c0_35 = arith.constant 0 : index
    %103 = vector.load %arg3[%c1, %c0_34, %c0_35] : memref<5x1x128xf32, #tpu.memory_space<vmem>>, vector<1x1x128xf32>
    %104 = vector.shape_cast %103 : vector<1x1x128xf32> to vector<1x128xf32>
    %105 = vector.broadcast %104 : vector<1x128xf32> to vector<32x128xf32>
    %106 = arith.mulf %102, %105 : vector<32x128xf32>
    %107 = arith.addf %99, %106 : vector<32x128xf32>
    %c31_i32 = arith.constant 31 : i32
    %108 = tpu.dynamic_rotate %87 by %c31_i32 dim 0 : vector<32x128xf32>, i32 -> vector<32x128xf32>
    %109 = vector.broadcast %52 : vector<32x1xf32> to vector<32x128xf32>
    %110 = arith.mulf %108, %109 : vector<32x128xf32>
    %c3 = arith.constant 3 : index
    %c0_36 = arith.constant 0 : index
    %c0_37 = arith.constant 0 : index
    %111 = vector.load %arg3[%c3, %c0_36, %c0_37] : memref<5x1x128xf32, #tpu.memory_space<vmem>>, vector<1x1x128xf32>
    %112 = vector.shape_cast %111 : vector<1x1x128xf32> to vector<1x128xf32>
    %113 = vector.broadcast %112 : vector<1x128xf32> to vector<32x128xf32>
    %114 = arith.mulf %110, %113 : vector<32x128xf32>
    %115 = arith.addf %107, %114 : vector<32x128xf32>
    %c30_i32 = arith.constant 30 : i32
    %116 = tpu.dynamic_rotate %87 by %c30_i32 dim 0 : vector<32x128xf32>, i32 -> vector<32x128xf32>
    %117 = vector.broadcast %63 : vector<32x1xf32> to vector<32x128xf32>
    %118 = arith.mulf %116, %117 : vector<32x128xf32>
    %c4 = arith.constant 4 : index
    %c0_38 = arith.constant 0 : index
    %c0_39 = arith.constant 0 : index
    %119 = vector.load %arg3[%c4, %c0_38, %c0_39] : memref<5x1x128xf32, #tpu.memory_space<vmem>>, vector<1x1x128xf32>
    %120 = vector.shape_cast %119 : vector<1x1x128xf32> to vector<1x128xf32>
    %121 = vector.broadcast %120 : vector<1x128xf32> to vector<32x128xf32>
    %122 = arith.mulf %118, %121 : vector<32x128xf32>
    %123 = arith.addf %115, %122 : vector<32x128xf32>
    %c0_40 = arith.constant 0 : index
    %c0_41 = arith.constant 0 : index
    %124 = vector.load %arg4[%c0_40, %c0_41] : memref<128x128xbf16, #tpu.memory_space<vmem>>, vector<128x128xbf16>
    %125 = arith.truncf %123 : vector<32x128xf32> to vector<32x128xbf16>
    %cst_42 = arith.constant dense<0.000000e+00> : vector<32x128xf32>
    %126 = tpu.matmul %125, %124, %cst_42 {dimension_numbers = #tpu.dot_dimension_numbers<[1], [0], [0], [1], [0, 0, 1, 1], [], []>} : vector<32x128xbf16>, vector<128x128xbf16>, vector<32x128xf32> -> vector<32x128xf32>
    %c0_43 = arith.constant 0 : index
    %c0_44 = arith.constant 0 : index
    %127 = vector.load %arg5[%c0_43, %c0_44] : memref<1x128xf32, #tpu.memory_space<vmem>>, vector<1x128xf32>
    %128 = vector.broadcast %127 : vector<1x128xf32> to vector<32x128xf32>
    %129 = arith.addf %126, %128 : vector<32x128xf32>
    %cst_45 = arith.constant 0.000000e+00 : f32
    %130 = vector.broadcast %cst_45 : f32 to vector<32x128xf32>
    %131 = arith.maximumf %129, %130 : vector<32x128xf32>
    %132 = arith.addf %131, %2 : vector<32x128xf32>
    %c0_46 = arith.constant 0 : index
    %c0_47 = arith.constant 0 : index
    %133 = vector.load %arg11[%c0_46, %c0_47] : memref<1x128xf32, #tpu.memory_space<vmem>>, vector<1x128xf32>
    %c0_48 = arith.constant 0 : index
    %c0_49 = arith.constant 0 : index
    %134 = vector.load %arg12[%c0_48, %c0_49] : memref<1x128xf32, #tpu.memory_space<vmem>>, vector<1x128xf32>
    %cst_50 = arith.constant dense<0.000000e+00> : vector<32xf32>
    %135 = vector.multi_reduction <add>, %132, %cst_50 [1] : vector<32x128xf32> to vector<32xf32>
    %136 = vector.shape_cast %135 : vector<32xf32> to vector<32x1xf32>
    %cst_51 = arith.constant 1.280000e+02 : f32
    %137 = vector.broadcast %cst_51 : f32 to vector<32x1xf32>
    %138 = arith.divf %136, %137 : vector<32x1xf32>
    %139 = vector.broadcast %138 : vector<32x1xf32> to vector<32x128xf32>
    %140 = arith.subf %132, %139 : vector<32x128xf32>
    %141 = arith.mulf %140, %140 : vector<32x128xf32>
    %cst_52 = arith.constant dense<0.000000e+00> : vector<32xf32>
    %142 = vector.multi_reduction <add>, %141, %cst_52 [1] : vector<32x128xf32> to vector<32xf32>
    %143 = vector.shape_cast %142 : vector<32xf32> to vector<32x1xf32>
    %cst_53 = arith.constant 1.280000e+02 : f32
    %144 = vector.broadcast %cst_53 : f32 to vector<32x1xf32>
    %145 = arith.divf %143, %144 : vector<32x1xf32>
    %146 = vector.broadcast %138 : vector<32x1xf32> to vector<32x128xf32>
    %147 = arith.subf %132, %146 : vector<32x128xf32>
    %cst_54 = arith.constant 9.99999997E-7 : f32
    %148 = vector.broadcast %cst_54 : f32 to vector<32x1xf32>
    %149 = arith.addf %145, %148 : vector<32x1xf32>
    %150 = math.rsqrt %149 : vector<32x1xf32>
    %151 = vector.broadcast %150 : vector<32x1xf32> to vector<32x128xf32>
    %152 = arith.mulf %147, %151 : vector<32x128xf32>
    %153 = vector.broadcast %133 : vector<1x128xf32> to vector<32x128xf32>
    %154 = arith.mulf %152, %153 : vector<32x128xf32>
    %155 = vector.broadcast %134 : vector<1x128xf32> to vector<32x128xf32>
    %156 = arith.addf %154, %155 : vector<32x128xf32>
    %c2_55 = arith.constant 2 : index
    %c0_56 = arith.constant 0 : index
    %c0_57 = arith.constant 0 : index
    %157 = vector.load %arg8[%c2_55, %c0_56, %c0_57] : memref<5x1x128xf32, #tpu.memory_space<vmem>>, vector<1x1x128xf32>
    %158 = vector.shape_cast %157 : vector<1x1x128xf32> to vector<1x128xf32>
    %159 = vector.broadcast %158 : vector<1x128xf32> to vector<32x128xf32>
    %160 = arith.mulf %156, %159 : vector<32x128xf32>
    %c2_i32_58 = arith.constant 2 : i32
    %161 = tpu.dynamic_rotate %156 by %c2_i32_58 dim 0 : vector<32x128xf32>, i32 -> vector<32x128xf32>
    %162 = vector.broadcast %30 : vector<32x1xf32> to vector<32x128xf32>
    %163 = arith.mulf %161, %162 : vector<32x128xf32>
    %c0_59 = arith.constant 0 : index
    %c0_60 = arith.constant 0 : index
    %c0_61 = arith.constant 0 : index
    %164 = vector.load %arg8[%c0_59, %c0_60, %c0_61] : memref<5x1x128xf32, #tpu.memory_space<vmem>>, vector<1x1x128xf32>
    %165 = vector.shape_cast %164 : vector<1x1x128xf32> to vector<1x128xf32>
    %166 = vector.broadcast %165 : vector<1x128xf32> to vector<32x128xf32>
    %167 = arith.mulf %163, %166 : vector<32x128xf32>
    %168 = arith.addf %160, %167 : vector<32x128xf32>
    %c1_i32_62 = arith.constant 1 : i32
    %169 = tpu.dynamic_rotate %156 by %c1_i32_62 dim 0 : vector<32x128xf32>, i32 -> vector<32x128xf32>
    %170 = vector.broadcast %41 : vector<32x1xf32> to vector<32x128xf32>
    %171 = arith.mulf %169, %170 : vector<32x128xf32>
    %c1_63 = arith.constant 1 : index
    %c0_64 = arith.constant 0 : index
    %c0_65 = arith.constant 0 : index
    %172 = vector.load %arg8[%c1_63, %c0_64, %c0_65] : memref<5x1x128xf32, #tpu.memory_space<vmem>>, vector<1x1x128xf32>
    %173 = vector.shape_cast %172 : vector<1x1x128xf32> to vector<1x128xf32>
    %174 = vector.broadcast %173 : vector<1x128xf32> to vector<32x128xf32>
    %175 = arith.mulf %171, %174 : vector<32x128xf32>
    %176 = arith.addf %168, %175 : vector<32x128xf32>
    %c31_i32_66 = arith.constant 31 : i32
    %177 = tpu.dynamic_rotate %156 by %c31_i32_66 dim 0 : vector<32x128xf32>, i32 -> vector<32x128xf32>
    %178 = vector.broadcast %52 : vector<32x1xf32> to vector<32x128xf32>
    %179 = arith.mulf %177, %178 : vector<32x128xf32>
    %c3_67 = arith.constant 3 : index
    %c0_68 = arith.constant 0 : index
    %c0_69 = arith.constant 0 : index
    %180 = vector.load %arg8[%c3_67, %c0_68, %c0_69] : memref<5x1x128xf32, #tpu.memory_space<vmem>>, vector<1x1x128xf32>
    %181 = vector.shape_cast %180 : vector<1x1x128xf32> to vector<1x128xf32>
    %182 = vector.broadcast %181 : vector<1x128xf32> to vector<32x128xf32>
    %183 = arith.mulf %179, %182 : vector<32x128xf32>
    %184 = arith.addf %176, %183 : vector<32x128xf32>
    %c30_i32_70 = arith.constant 30 : i32
    %185 = tpu.dynamic_rotate %156 by %c30_i32_70 dim 0 : vector<32x128xf32>, i32 -> vector<32x128xf32>
    %186 = vector.broadcast %63 : vector<32x1xf32> to vector<32x128xf32>
    %187 = arith.mulf %185, %186 : vector<32x128xf32>
    %c4_71 = arith.constant 4 : index
    %c0_72 = arith.constant 0 : index
    %c0_73 = arith.constant 0 : index
    %188 = vector.load %arg8[%c4_71, %c0_72, %c0_73] : memref<5x1x128xf32, #tpu.memory_space<vmem>>, vector<1x1x128xf32>
    %189 = vector.shape_cast %188 : vector<1x1x128xf32> to vector<1x128xf32>
    %190 = vector.broadcast %189 : vector<1x128xf32> to vector<32x128xf32>
    %191 = arith.mulf %187, %190 : vector<32x128xf32>
    %192 = arith.addf %184, %191 : vector<32x128xf32>
    %c0_74 = arith.constant 0 : index
    %c0_75 = arith.constant 0 : index
    %193 = vector.load %arg9[%c0_74, %c0_75] : memref<128x128xbf16, #tpu.memory_space<vmem>>, vector<128x128xbf16>
    %194 = arith.truncf %192 : vector<32x128xf32> to vector<32x128xbf16>
    %cst_76 = arith.constant dense<0.000000e+00> : vector<32x128xf32>
    %195 = tpu.matmul %194, %193, %cst_76 {dimension_numbers = #tpu.dot_dimension_numbers<[1], [0], [0], [1], [0, 0, 1, 1], [], []>} : vector<32x128xbf16>, vector<128x128xbf16>, vector<32x128xf32> -> vector<32x128xf32>
    %c0_77 = arith.constant 0 : index
    %c0_78 = arith.constant 0 : index
    %196 = vector.load %arg10[%c0_77, %c0_78] : memref<1x128xf32, #tpu.memory_space<vmem>>, vector<1x128xf32>
    %197 = vector.broadcast %196 : vector<1x128xf32> to vector<32x128xf32>
    %198 = arith.addf %195, %197 : vector<32x128xf32>
    %cst_79 = arith.constant 0.000000e+00 : f32
    %199 = vector.broadcast %cst_79 : f32 to vector<32x128xf32>
    %200 = arith.maximumf %198, %199 : vector<32x128xf32>
    %201 = arith.addf %200, %132 : vector<32x128xf32>
    %c0_80 = arith.constant 0 : index
    %c0_81 = arith.constant 0 : index
    %202 = vector.load %arg17[%c0_80, %c0_81] : memref<1x128xf32, #tpu.memory_space<vmem>>, vector<1x128xf32>
    %c0_82 = arith.constant 0 : index
    %c0_83 = arith.constant 0 : index
    %203 = vector.load %arg18[%c0_82, %c0_83] : memref<1x128xf32, #tpu.memory_space<vmem>>, vector<1x128xf32>
    %cst_84 = arith.constant dense<0.000000e+00> : vector<32xf32>
    %204 = vector.multi_reduction <add>, %201, %cst_84 [1] : vector<32x128xf32> to vector<32xf32>
    %205 = vector.shape_cast %204 : vector<32xf32> to vector<32x1xf32>
    %cst_85 = arith.constant 1.280000e+02 : f32
    %206 = vector.broadcast %cst_85 : f32 to vector<32x1xf32>
    %207 = arith.divf %205, %206 : vector<32x1xf32>
    %208 = vector.broadcast %207 : vector<32x1xf32> to vector<32x128xf32>
    %209 = arith.subf %201, %208 : vector<32x128xf32>
    %210 = arith.mulf %209, %209 : vector<32x128xf32>
    %cst_86 = arith.constant dense<0.000000e+00> : vector<32xf32>
    %211 = vector.multi_reduction <add>, %210, %cst_86 [1] : vector<32x128xf32> to vector<32xf32>
    %212 = vector.shape_cast %211 : vector<32xf32> to vector<32x1xf32>
    %cst_87 = arith.constant 1.280000e+02 : f32
    %213 = vector.broadcast %cst_87 : f32 to vector<32x1xf32>
    %214 = arith.divf %212, %213 : vector<32x1xf32>
    %215 = vector.broadcast %207 : vector<32x1xf32> to vector<32x128xf32>
    %216 = arith.subf %201, %215 : vector<32x128xf32>
    %cst_88 = arith.constant 9.99999997E-7 : f32
    %217 = vector.broadcast %cst_88 : f32 to vector<32x1xf32>
    %218 = arith.addf %214, %217 : vector<32x1xf32>
    %219 = math.rsqrt %218 : vector<32x1xf32>
    %220 = vector.broadcast %219 : vector<32x1xf32> to vector<32x128xf32>
    %221 = arith.mulf %216, %220 : vector<32x128xf32>
    %222 = vector.broadcast %202 : vector<1x128xf32> to vector<32x128xf32>
    %223 = arith.mulf %221, %222 : vector<32x128xf32>
    %224 = vector.broadcast %203 : vector<1x128xf32> to vector<32x128xf32>
    %225 = arith.addf %223, %224 : vector<32x128xf32>
    %226 = arith.truncf %225 : vector<32x128xf32> to vector<32x128xbf16>
    %c0_89 = arith.constant 0 : index
    %c0_90 = arith.constant 0 : index
    %227 = vector.load %arg13[%c0_89, %c0_90] : memref<128x384xbf16, #tpu.memory_space<vmem>>, vector<128x384xbf16>
    %cst_91 = arith.constant dense<0.000000e+00> : vector<32x384xf32>
    %228 = tpu.matmul %226, %227, %cst_91 {dimension_numbers = #tpu.dot_dimension_numbers<[1], [0], [0], [1], [0, 0, 1, 1], [], []>} : vector<32x128xbf16>, vector<128x384xbf16>, vector<32x384xf32> -> vector<32x384xf32>
    %c0_92 = arith.constant 0 : index
    %c0_93 = arith.constant 0 : index
    %229 = vector.load %arg14[%c0_92, %c0_93] : memref<1x384xf32, #tpu.memory_space<vmem>>, vector<1x384xf32>
    %230 = vector.broadcast %229 : vector<1x384xf32> to vector<32x384xf32>
    %231 = arith.addf %228, %230 : vector<32x384xf32>
    %232 = vector.extract_strided_slice %231 {offsets = [0, 0], sizes = [32, 128], strides = [1, 1]} : vector<32x384xf32> to vector<32x128xf32>
    %233 = vector.extract_strided_slice %231 {offsets = [0, 128], sizes = [32, 128], strides = [1, 1]} : vector<32x384xf32> to vector<32x128xf32>
    %234 = vector.extract_strided_slice %231 {offsets = [0, 256], sizes = [32, 128], strides = [1, 1]} : vector<32x384xf32> to vector<32x128xf32>
    %c0_94 = arith.constant 0 : index
    %c0_95 = arith.constant 0 : index
    %235 = vector.load %arg15[%c0_94, %c0_95] : memref<128x128xbf16, #tpu.memory_space<vmem>>, vector<128x128xbf16>
    %cst_96 = arith.constant 0.000000e+00 : f32
    %236 = vector.broadcast %cst_96 : f32 to vector<16x128xf32>
    %237 = vector.extract_strided_slice %232 {offsets = [0, 0], sizes = [16, 16], strides = [1, 1]} : vector<32x128xf32> to vector<16x16xf32>
    %238 = vector.extract_strided_slice %233 {offsets = [0, 0], sizes = [16, 16], strides = [1, 1]} : vector<32x128xf32> to vector<16x16xf32>
    %239 = vector.extract_strided_slice %234 {offsets = [0, 0], sizes = [16, 16], strides = [1, 1]} : vector<32x128xf32> to vector<16x16xf32>
    %240 = arith.truncf %237 : vector<16x16xf32> to vector<16x16xbf16>
    %241 = arith.truncf %238 : vector<16x16xf32> to vector<16x16xbf16>
    %cst_97 = arith.constant dense<0.000000e+00> : vector<16x16xf32>
    %242 = tpu.matmul %240, %241, %cst_97 {dimension_numbers = #tpu.dot_dimension_numbers<[1], [1], [0], [0], [0, 0, 1, 0], [], []>} : vector<16x16xbf16>, vector<16x16xbf16>, vector<16x16xf32> -> vector<16x16xf32>
    %cst_98 = arith.constant 2.500000e-01 : f32
    %243 = vector.broadcast %cst_98 : f32 to vector<16x16xf32>
    %244 = arith.mulf %242, %243 : vector<16x16xf32>
    %cst_99 = arith.constant dense<0xFF800000> : vector<16xf32>
    %245 = vector.multi_reduction <maximumf>, %244, %cst_99 [1] : vector<16x16xf32> to vector<16xf32>
    %246 = vector.shape_cast %245 : vector<16xf32> to vector<16x1xf32>
    %247 = vector.broadcast %246 : vector<16x1xf32> to vector<16x16xf32>
    %248 = arith.subf %244, %247 : vector<16x16xf32>
    %249 = math.exp %248 : vector<16x16xf32>
    %cst_100 = arith.constant dense<0.000000e+00> : vector<16xf32>
    %250 = vector.multi_reduction <add>, %249, %cst_100 [1] : vector<16x16xf32> to vector<16xf32>
    %251 = vector.shape_cast %250 : vector<16xf32> to vector<16x1xf32>
    %252 = tpu.reciprocal %251 {approx = true} : vector<16x1xf32> -> vector<16x1xf32>
    %253 = vector.broadcast %252 : vector<16x1xf32> to vector<16x16xf32>
    %254 = arith.mulf %249, %253 : vector<16x16xf32>
    %255 = arith.truncf %254 : vector<16x16xf32> to vector<16x16xbf16>
    %256 = arith.truncf %239 : vector<16x16xf32> to vector<16x16xbf16>
    %cst_101 = arith.constant dense<0.000000e+00> : vector<16x16xf32>
    %257 = tpu.matmul %255, %256, %cst_101 {dimension_numbers = #tpu.dot_dimension_numbers<[1], [0], [0], [1], [0, 0, 1, 1], [], []>} : vector<16x16xbf16>, vector<16x16xbf16>, vector<16x16xf32> -> vector<16x16xf32>
    %258 = vector.extract_strided_slice %235 {offsets = [0, 0], sizes = [16, 128], strides = [1, 1]} : vector<128x128xbf16> to vector<16x128xbf16>
    %259 = arith.truncf %257 : vector<16x16xf32> to vector<16x16xbf16>
    %cst_102 = arith.constant dense<0.000000e+00> : vector<16x128xf32>
    %260 = tpu.matmul %259, %258, %cst_102 {dimension_numbers = #tpu.dot_dimension_numbers<[1], [0], [0], [1], [0, 0, 1, 1], [], []>} : vector<16x16xbf16>, vector<16x128xbf16>, vector<16x128xf32> -> vector<16x128xf32>
    %261 = arith.addf %236, %260 : vector<16x128xf32>
    %262 = vector.extract_strided_slice %232 {offsets = [0, 16], sizes = [16, 16], strides = [1, 1]} : vector<32x128xf32> to vector<16x16xf32>
    %263 = vector.extract_strided_slice %233 {offsets = [0, 16], sizes = [16, 16], strides = [1, 1]} : vector<32x128xf32> to vector<16x16xf32>
    %264 = vector.extract_strided_slice %234 {offsets = [0, 16], sizes = [16, 16], strides = [1, 1]} : vector<32x128xf32> to vector<16x16xf32>
    %265 = arith.truncf %262 : vector<16x16xf32> to vector<16x16xbf16>
    %266 = arith.truncf %263 : vector<16x16xf32> to vector<16x16xbf16>
    %cst_103 = arith.constant dense<0.000000e+00> : vector<16x16xf32>
    %267 = tpu.matmul %265, %266, %cst_103 {dimension_numbers = #tpu.dot_dimension_numbers<[1], [1], [0], [0], [0, 0, 1, 0], [], []>} : vector<16x16xbf16>, vector<16x16xbf16>, vector<16x16xf32> -> vector<16x16xf32>
    %cst_104 = arith.constant 2.500000e-01 : f32
    %268 = vector.broadcast %cst_104 : f32 to vector<16x16xf32>
    %269 = arith.mulf %267, %268 : vector<16x16xf32>
    %cst_105 = arith.constant dense<0xFF800000> : vector<16xf32>
    %270 = vector.multi_reduction <maximumf>, %269, %cst_105 [1] : vector<16x16xf32> to vector<16xf32>
    %271 = vector.shape_cast %270 : vector<16xf32> to vector<16x1xf32>
    %272 = vector.broadcast %271 : vector<16x1xf32> to vector<16x16xf32>
    %273 = arith.subf %269, %272 : vector<16x16xf32>
    %274 = math.exp %273 : vector<16x16xf32>
    %cst_106 = arith.constant dense<0.000000e+00> : vector<16xf32>
    %275 = vector.multi_reduction <add>, %274, %cst_106 [1] : vector<16x16xf32> to vector<16xf32>
    %276 = vector.shape_cast %275 : vector<16xf32> to vector<16x1xf32>
    %277 = tpu.reciprocal %276 {approx = true} : vector<16x1xf32> -> vector<16x1xf32>
    %278 = vector.broadcast %277 : vector<16x1xf32> to vector<16x16xf32>
    %279 = arith.mulf %274, %278 : vector<16x16xf32>
    %280 = arith.truncf %279 : vector<16x16xf32> to vector<16x16xbf16>
    %281 = arith.truncf %264 : vector<16x16xf32> to vector<16x16xbf16>
    %cst_107 = arith.constant dense<0.000000e+00> : vector<16x16xf32>
    %282 = tpu.matmul %280, %281, %cst_107 {dimension_numbers = #tpu.dot_dimension_numbers<[1], [0], [0], [1], [0, 0, 1, 1], [], []>} : vector<16x16xbf16>, vector<16x16xbf16>, vector<16x16xf32> -> vector<16x16xf32>
    %283 = vector.extract_strided_slice %235 {offsets = [16, 0], sizes = [16, 128], strides = [1, 1]} : vector<128x128xbf16> to vector<16x128xbf16>
    %284 = arith.truncf %282 : vector<16x16xf32> to vector<16x16xbf16>
    %cst_108 = arith.constant dense<0.000000e+00> : vector<16x128xf32>
    %285 = tpu.matmul %284, %283, %cst_108 {dimension_numbers = #tpu.dot_dimension_numbers<[1], [0], [0], [1], [0, 0, 1, 1], [], []>} : vector<16x16xbf16>, vector<16x128xbf16>, vector<16x128xf32> -> vector<16x128xf32>
    %286 = arith.addf %261, %285 : vector<16x128xf32>
    %287 = vector.extract_strided_slice %232 {offsets = [0, 32], sizes = [16, 16], strides = [1, 1]} : vector<32x128xf32> to vector<16x16xf32>
    %288 = vector.extract_strided_slice %233 {offsets = [0, 32], sizes = [16, 16], strides = [1, 1]} : vector<32x128xf32> to vector<16x16xf32>
    %289 = vector.extract_strided_slice %234 {offsets = [0, 32], sizes = [16, 16], strides = [1, 1]} : vector<32x128xf32> to vector<16x16xf32>
    %290 = arith.truncf %287 : vector<16x16xf32> to vector<16x16xbf16>
    %291 = arith.truncf %288 : vector<16x16xf32> to vector<16x16xbf16>
    %cst_109 = arith.constant dense<0.000000e+00> : vector<16x16xf32>
    %292 = tpu.matmul %290, %291, %cst_109 {dimension_numbers = #tpu.dot_dimension_numbers<[1], [1], [0], [0], [0, 0, 1, 0], [], []>} : vector<16x16xbf16>, vector<16x16xbf16>, vector<16x16xf32> -> vector<16x16xf32>
    %cst_110 = arith.constant 2.500000e-01 : f32
    %293 = vector.broadcast %cst_110 : f32 to vector<16x16xf32>
    %294 = arith.mulf %292, %293 : vector<16x16xf32>
    %cst_111 = arith.constant dense<0xFF800000> : vector<16xf32>
    %295 = vector.multi_reduction <maximumf>, %294, %cst_111 [1] : vector<16x16xf32> to vector<16xf32>
    %296 = vector.shape_cast %295 : vector<16xf32> to vector<16x1xf32>
    %297 = vector.broadcast %296 : vector<16x1xf32> to vector<16x16xf32>
    %298 = arith.subf %294, %297 : vector<16x16xf32>
    %299 = math.exp %298 : vector<16x16xf32>
    %cst_112 = arith.constant dense<0.000000e+00> : vector<16xf32>
    %300 = vector.multi_reduction <add>, %299, %cst_112 [1] : vector<16x16xf32> to vector<16xf32>
    %301 = vector.shape_cast %300 : vector<16xf32> to vector<16x1xf32>
    %302 = tpu.reciprocal %301 {approx = true} : vector<16x1xf32> -> vector<16x1xf32>
    %303 = vector.broadcast %302 : vector<16x1xf32> to vector<16x16xf32>
    %304 = arith.mulf %299, %303 : vector<16x16xf32>
    %305 = arith.truncf %304 : vector<16x16xf32> to vector<16x16xbf16>
    %306 = arith.truncf %289 : vector<16x16xf32> to vector<16x16xbf16>
    %cst_113 = arith.constant dense<0.000000e+00> : vector<16x16xf32>
    %307 = tpu.matmul %305, %306, %cst_113 {dimension_numbers = #tpu.dot_dimension_numbers<[1], [0], [0], [1], [0, 0, 1, 1], [], []>} : vector<16x16xbf16>, vector<16x16xbf16>, vector<16x16xf32> -> vector<16x16xf32>
    %308 = vector.extract_strided_slice %235 {offsets = [32, 0], sizes = [16, 128], strides = [1, 1]} : vector<128x128xbf16> to vector<16x128xbf16>
    %309 = arith.truncf %307 : vector<16x16xf32> to vector<16x16xbf16>
    %cst_114 = arith.constant dense<0.000000e+00> : vector<16x128xf32>
    %310 = tpu.matmul %309, %308, %cst_114 {dimension_numbers = #tpu.dot_dimension_numbers<[1], [0], [0], [1], [0, 0, 1, 1], [], []>} : vector<16x16xbf16>, vector<16x128xbf16>, vector<16x128xf32> -> vector<16x128xf32>
    %311 = arith.addf %286, %310 : vector<16x128xf32>
    %312 = vector.extract_strided_slice %232 {offsets = [0, 48], sizes = [16, 16], strides = [1, 1]} : vector<32x128xf32> to vector<16x16xf32>
    %313 = vector.extract_strided_slice %233 {offsets = [0, 48], sizes = [16, 16], strides = [1, 1]} : vector<32x128xf32> to vector<16x16xf32>
    %314 = vector.extract_strided_slice %234 {offsets = [0, 48], sizes = [16, 16], strides = [1, 1]} : vector<32x128xf32> to vector<16x16xf32>
    %315 = arith.truncf %312 : vector<16x16xf32> to vector<16x16xbf16>
    %316 = arith.truncf %313 : vector<16x16xf32> to vector<16x16xbf16>
    %cst_115 = arith.constant dense<0.000000e+00> : vector<16x16xf32>
    %317 = tpu.matmul %315, %316, %cst_115 {dimension_numbers = #tpu.dot_dimension_numbers<[1], [1], [0], [0], [0, 0, 1, 0], [], []>} : vector<16x16xbf16>, vector<16x16xbf16>, vector<16x16xf32> -> vector<16x16xf32>
    %cst_116 = arith.constant 2.500000e-01 : f32
    %318 = vector.broadcast %cst_116 : f32 to vector<16x16xf32>
    %319 = arith.mulf %317, %318 : vector<16x16xf32>
    %cst_117 = arith.constant dense<0xFF800000> : vector<16xf32>
    %320 = vector.multi_reduction <maximumf>, %319, %cst_117 [1] : vector<16x16xf32> to vector<16xf32>
    %321 = vector.shape_cast %320 : vector<16xf32> to vector<16x1xf32>
    %322 = vector.broadcast %321 : vector<16x1xf32> to vector<16x16xf32>
    %323 = arith.subf %319, %322 : vector<16x16xf32>
    %324 = math.exp %323 : vector<16x16xf32>
    %cst_118 = arith.constant dense<0.000000e+00> : vector<16xf32>
    %325 = vector.multi_reduction <add>, %324, %cst_118 [1] : vector<16x16xf32> to vector<16xf32>
    %326 = vector.shape_cast %325 : vector<16xf32> to vector<16x1xf32>
    %327 = tpu.reciprocal %326 {approx = true} : vector<16x1xf32> -> vector<16x1xf32>
    %328 = vector.broadcast %327 : vector<16x1xf32> to vector<16x16xf32>
    %329 = arith.mulf %324, %328 : vector<16x16xf32>
    %330 = arith.truncf %329 : vector<16x16xf32> to vector<16x16xbf16>
    %331 = arith.truncf %314 : vector<16x16xf32> to vector<16x16xbf16>
    %cst_119 = arith.constant dense<0.000000e+00> : vector<16x16xf32>
    %332 = tpu.matmul %330, %331, %cst_119 {dimension_numbers = #tpu.dot_dimension_numbers<[1], [0], [0], [1], [0, 0, 1, 1], [], []>} : vector<16x16xbf16>, vector<16x16xbf16>, vector<16x16xf32> -> vector<16x16xf32>
    %333 = vector.extract_strided_slice %235 {offsets = [48, 0], sizes = [16, 128], strides = [1, 1]} : vector<128x128xbf16> to vector<16x128xbf16>
    %334 = arith.truncf %332 : vector<16x16xf32> to vector<16x16xbf16>
    %cst_120 = arith.constant dense<0.000000e+00> : vector<16x128xf32>
    %335 = tpu.matmul %334, %333, %cst_120 {dimension_numbers = #tpu.dot_dimension_numbers<[1], [0], [0], [1], [0, 0, 1, 1], [], []>} : vector<16x16xbf16>, vector<16x128xbf16>, vector<16x128xf32> -> vector<16x128xf32>
    %336 = arith.addf %311, %335 : vector<16x128xf32>
    %337 = vector.extract_strided_slice %232 {offsets = [0, 64], sizes = [16, 16], strides = [1, 1]} : vector<32x128xf32> to vector<16x16xf32>
    %338 = vector.extract_strided_slice %233 {offsets = [0, 64], sizes = [16, 16], strides = [1, 1]} : vector<32x128xf32> to vector<16x16xf32>
    %339 = vector.extract_strided_slice %234 {offsets = [0, 64], sizes = [16, 16], strides = [1, 1]} : vector<32x128xf32> to vector<16x16xf32>
    %340 = arith.truncf %337 : vector<16x16xf32> to vector<16x16xbf16>
    %341 = arith.truncf %338 : vector<16x16xf32> to vector<16x16xbf16>
    %cst_121 = arith.constant dense<0.000000e+00> : vector<16x16xf32>
    %342 = tpu.matmul %340, %341, %cst_121 {dimension_numbers = #tpu.dot_dimension_numbers<[1], [1], [0], [0], [0, 0, 1, 0], [], []>} : vector<16x16xbf16>, vector<16x16xbf16>, vector<16x16xf32> -> vector<16x16xf32>
    %cst_122 = arith.constant 2.500000e-01 : f32
    %343 = vector.broadcast %cst_122 : f32 to vector<16x16xf32>
    %344 = arith.mulf %342, %343 : vector<16x16xf32>
    %cst_123 = arith.constant dense<0xFF800000> : vector<16xf32>
    %345 = vector.multi_reduction <maximumf>, %344, %cst_123 [1] : vector<16x16xf32> to vector<16xf32>
    %346 = vector.shape_cast %345 : vector<16xf32> to vector<16x1xf32>
    %347 = vector.broadcast %346 : vector<16x1xf32> to vector<16x16xf32>
    %348 = arith.subf %344, %347 : vector<16x16xf32>
    %349 = math.exp %348 : vector<16x16xf32>
    %cst_124 = arith.constant dense<0.000000e+00> : vector<16xf32>
    %350 = vector.multi_reduction <add>, %349, %cst_124 [1] : vector<16x16xf32> to vector<16xf32>
    %351 = vector.shape_cast %350 : vector<16xf32> to vector<16x1xf32>
    %352 = tpu.reciprocal %351 {approx = true} : vector<16x1xf32> -> vector<16x1xf32>
    %353 = vector.broadcast %352 : vector<16x1xf32> to vector<16x16xf32>
    %354 = arith.mulf %349, %353 : vector<16x16xf32>
    %355 = arith.truncf %354 : vector<16x16xf32> to vector<16x16xbf16>
    %356 = arith.truncf %339 : vector<16x16xf32> to vector<16x16xbf16>
    %cst_125 = arith.constant dense<0.000000e+00> : vector<16x16xf32>
    %357 = tpu.matmul %355, %356, %cst_125 {dimension_numbers = #tpu.dot_dimension_numbers<[1], [0], [0], [1], [0, 0, 1, 1], [], []>} : vector<16x16xbf16>, vector<16x16xbf16>, vector<16x16xf32> -> vector<16x16xf32>
    %358 = vector.extract_strided_slice %235 {offsets = [64, 0], sizes = [16, 128], strides = [1, 1]} : vector<128x128xbf16> to vector<16x128xbf16>
    %359 = arith.truncf %357 : vector<16x16xf32> to vector<16x16xbf16>
    %cst_126 = arith.constant dense<0.000000e+00> : vector<16x128xf32>
    %360 = tpu.matmul %359, %358, %cst_126 {dimension_numbers = #tpu.dot_dimension_numbers<[1], [0], [0], [1], [0, 0, 1, 1], [], []>} : vector<16x16xbf16>, vector<16x128xbf16>, vector<16x128xf32> -> vector<16x128xf32>
    %361 = arith.addf %336, %360 : vector<16x128xf32>
    %362 = vector.extract_strided_slice %232 {offsets = [0, 80], sizes = [16, 16], strides = [1, 1]} : vector<32x128xf32> to vector<16x16xf32>
    %363 = vector.extract_strided_slice %233 {offsets = [0, 80], sizes = [16, 16], strides = [1, 1]} : vector<32x128xf32> to vector<16x16xf32>
    %364 = vector.extract_strided_slice %234 {offsets = [0, 80], sizes = [16, 16], strides = [1, 1]} : vector<32x128xf32> to vector<16x16xf32>
    %365 = arith.truncf %362 : vector<16x16xf32> to vector<16x16xbf16>
    %366 = arith.truncf %363 : vector<16x16xf32> to vector<16x16xbf16>
    %cst_127 = arith.constant dense<0.000000e+00> : vector<16x16xf32>
    %367 = tpu.matmul %365, %366, %cst_127 {dimension_numbers = #tpu.dot_dimension_numbers<[1], [1], [0], [0], [0, 0, 1, 0], [], []>} : vector<16x16xbf16>, vector<16x16xbf16>, vector<16x16xf32> -> vector<16x16xf32>
    %cst_128 = arith.constant 2.500000e-01 : f32
    %368 = vector.broadcast %cst_128 : f32 to vector<16x16xf32>
    %369 = arith.mulf %367, %368 : vector<16x16xf32>
    %cst_129 = arith.constant dense<0xFF800000> : vector<16xf32>
    %370 = vector.multi_reduction <maximumf>, %369, %cst_129 [1] : vector<16x16xf32> to vector<16xf32>
    %371 = vector.shape_cast %370 : vector<16xf32> to vector<16x1xf32>
    %372 = vector.broadcast %371 : vector<16x1xf32> to vector<16x16xf32>
    %373 = arith.subf %369, %372 : vector<16x16xf32>
    %374 = math.exp %373 : vector<16x16xf32>
    %cst_130 = arith.constant dense<0.000000e+00> : vector<16xf32>
    %375 = vector.multi_reduction <add>, %374, %cst_130 [1] : vector<16x16xf32> to vector<16xf32>
    %376 = vector.shape_cast %375 : vector<16xf32> to vector<16x1xf32>
    %377 = tpu.reciprocal %376 {approx = true} : vector<16x1xf32> -> vector<16x1xf32>
    %378 = vector.broadcast %377 : vector<16x1xf32> to vector<16x16xf32>
    %379 = arith.mulf %374, %378 : vector<16x16xf32>
    %380 = arith.truncf %379 : vector<16x16xf32> to vector<16x16xbf16>
    %381 = arith.truncf %364 : vector<16x16xf32> to vector<16x16xbf16>
    %cst_131 = arith.constant dense<0.000000e+00> : vector<16x16xf32>
    %382 = tpu.matmul %380, %381, %cst_131 {dimension_numbers = #tpu.dot_dimension_numbers<[1], [0], [0], [1], [0, 0, 1, 1], [], []>} : vector<16x16xbf16>, vector<16x16xbf16>, vector<16x16xf32> -> vector<16x16xf32>
    %383 = vector.extract_strided_slice %235 {offsets = [80, 0], sizes = [16, 128], strides = [1, 1]} : vector<128x128xbf16> to vector<16x128xbf16>
    %384 = arith.truncf %382 : vector<16x16xf32> to vector<16x16xbf16>
    %cst_132 = arith.constant dense<0.000000e+00> : vector<16x128xf32>
    %385 = tpu.matmul %384, %383, %cst_132 {dimension_numbers = #tpu.dot_dimension_numbers<[1], [0], [0], [1], [0, 0, 1, 1], [], []>} : vector<16x16xbf16>, vector<16x128xbf16>, vector<16x128xf32> -> vector<16x128xf32>
    %386 = arith.addf %361, %385 : vector<16x128xf32>
    %387 = vector.extract_strided_slice %232 {offsets = [0, 96], sizes = [16, 16], strides = [1, 1]} : vector<32x128xf32> to vector<16x16xf32>
    %388 = vector.extract_strided_slice %233 {offsets = [0, 96], sizes = [16, 16], strides = [1, 1]} : vector<32x128xf32> to vector<16x16xf32>
    %389 = vector.extract_strided_slice %234 {offsets = [0, 96], sizes = [16, 16], strides = [1, 1]} : vector<32x128xf32> to vector<16x16xf32>
    %390 = arith.truncf %387 : vector<16x16xf32> to vector<16x16xbf16>
    %391 = arith.truncf %388 : vector<16x16xf32> to vector<16x16xbf16>
    %cst_133 = arith.constant dense<0.000000e+00> : vector<16x16xf32>
    %392 = tpu.matmul %390, %391, %cst_133 {dimension_numbers = #tpu.dot_dimension_numbers<[1], [1], [0], [0], [0, 0, 1, 0], [], []>} : vector<16x16xbf16>, vector<16x16xbf16>, vector<16x16xf32> -> vector<16x16xf32>
    %cst_134 = arith.constant 2.500000e-01 : f32
    %393 = vector.broadcast %cst_134 : f32 to vector<16x16xf32>
    %394 = arith.mulf %392, %393 : vector<16x16xf32>
    %cst_135 = arith.constant dense<0xFF800000> : vector<16xf32>
    %395 = vector.multi_reduction <maximumf>, %394, %cst_135 [1] : vector<16x16xf32> to vector<16xf32>
    %396 = vector.shape_cast %395 : vector<16xf32> to vector<16x1xf32>
    %397 = vector.broadcast %396 : vector<16x1xf32> to vector<16x16xf32>
    %398 = arith.subf %394, %397 : vector<16x16xf32>
    %399 = math.exp %398 : vector<16x16xf32>
    %cst_136 = arith.constant dense<0.000000e+00> : vector<16xf32>
    %400 = vector.multi_reduction <add>, %399, %cst_136 [1] : vector<16x16xf32> to vector<16xf32>
    %401 = vector.shape_cast %400 : vector<16xf32> to vector<16x1xf32>
    %402 = tpu.reciprocal %401 {approx = true} : vector<16x1xf32> -> vector<16x1xf32>
    %403 = vector.broadcast %402 : vector<16x1xf32> to vector<16x16xf32>
    %404 = arith.mulf %399, %403 : vector<16x16xf32>
    %405 = arith.truncf %404 : vector<16x16xf32> to vector<16x16xbf16>
    %406 = arith.truncf %389 : vector<16x16xf32> to vector<16x16xbf16>
    %cst_137 = arith.constant dense<0.000000e+00> : vector<16x16xf32>
    %407 = tpu.matmul %405, %406, %cst_137 {dimension_numbers = #tpu.dot_dimension_numbers<[1], [0], [0], [1], [0, 0, 1, 1], [], []>} : vector<16x16xbf16>, vector<16x16xbf16>, vector<16x16xf32> -> vector<16x16xf32>
    %408 = vector.extract_strided_slice %235 {offsets = [96, 0], sizes = [16, 128], strides = [1, 1]} : vector<128x128xbf16> to vector<16x128xbf16>
    %409 = arith.truncf %407 : vector<16x16xf32> to vector<16x16xbf16>
    %cst_138 = arith.constant dense<0.000000e+00> : vector<16x128xf32>
    %410 = tpu.matmul %409, %408, %cst_138 {dimension_numbers = #tpu.dot_dimension_numbers<[1], [0], [0], [1], [0, 0, 1, 1], [], []>} : vector<16x16xbf16>, vector<16x128xbf16>, vector<16x128xf32> -> vector<16x128xf32>
    %411 = arith.addf %386, %410 : vector<16x128xf32>
    %412 = vector.extract_strided_slice %232 {offsets = [0, 112], sizes = [16, 16], strides = [1, 1]} : vector<32x128xf32> to vector<16x16xf32>
    %413 = vector.extract_strided_slice %233 {offsets = [0, 112], sizes = [16, 16], strides = [1, 1]} : vector<32x128xf32> to vector<16x16xf32>
    %414 = vector.extract_strided_slice %234 {offsets = [0, 112], sizes = [16, 16], strides = [1, 1]} : vector<32x128xf32> to vector<16x16xf32>
    %415 = arith.truncf %412 : vector<16x16xf32> to vector<16x16xbf16>
    %416 = arith.truncf %413 : vector<16x16xf32> to vector<16x16xbf16>
    %cst_139 = arith.constant dense<0.000000e+00> : vector<16x16xf32>
    %417 = tpu.matmul %415, %416, %cst_139 {dimension_numbers = #tpu.dot_dimension_numbers<[1], [1], [0], [0], [0, 0, 1, 0], [], []>} : vector<16x16xbf16>, vector<16x16xbf16>, vector<16x16xf32> -> vector<16x16xf32>
    %cst_140 = arith.constant 2.500000e-01 : f32
    %418 = vector.broadcast %cst_140 : f32 to vector<16x16xf32>
    %419 = arith.mulf %417, %418 : vector<16x16xf32>
    %cst_141 = arith.constant dense<0xFF800000> : vector<16xf32>
    %420 = vector.multi_reduction <maximumf>, %419, %cst_141 [1] : vector<16x16xf32> to vector<16xf32>
    %421 = vector.shape_cast %420 : vector<16xf32> to vector<16x1xf32>
    %422 = vector.broadcast %421 : vector<16x1xf32> to vector<16x16xf32>
    %423 = arith.subf %419, %422 : vector<16x16xf32>
    %424 = math.exp %423 : vector<16x16xf32>
    %cst_142 = arith.constant dense<0.000000e+00> : vector<16xf32>
    %425 = vector.multi_reduction <add>, %424, %cst_142 [1] : vector<16x16xf32> to vector<16xf32>
    %426 = vector.shape_cast %425 : vector<16xf32> to vector<16x1xf32>
    %427 = tpu.reciprocal %426 {approx = true} : vector<16x1xf32> -> vector<16x1xf32>
    %428 = vector.broadcast %427 : vector<16x1xf32> to vector<16x16xf32>
    %429 = arith.mulf %424, %428 : vector<16x16xf32>
    %430 = arith.truncf %429 : vector<16x16xf32> to vector<16x16xbf16>
    %431 = arith.truncf %414 : vector<16x16xf32> to vector<16x16xbf16>
    %cst_143 = arith.constant dense<0.000000e+00> : vector<16x16xf32>
    %432 = tpu.matmul %430, %431, %cst_143 {dimension_numbers = #tpu.dot_dimension_numbers<[1], [0], [0], [1], [0, 0, 1, 1], [], []>} : vector<16x16xbf16>, vector<16x16xbf16>, vector<16x16xf32> -> vector<16x16xf32>
    %433 = vector.extract_strided_slice %235 {offsets = [112, 0], sizes = [16, 128], strides = [1, 1]} : vector<128x128xbf16> to vector<16x128xbf16>
    %434 = arith.truncf %432 : vector<16x16xf32> to vector<16x16xbf16>
    %cst_144 = arith.constant dense<0.000000e+00> : vector<16x128xf32>
    %435 = tpu.matmul %434, %433, %cst_144 {dimension_numbers = #tpu.dot_dimension_numbers<[1], [0], [0], [1], [0, 0, 1, 1], [], []>} : vector<16x16xbf16>, vector<16x128xbf16>, vector<16x128xf32> -> vector<16x128xf32>
    %436 = arith.addf %411, %435 : vector<16x128xf32>
    %c0_145 = arith.constant 0 : index
    %c0_146 = arith.constant 0 : index
    %437 = vector.load %arg26[%c0_145, %c0_146] : memref<32x128xf32, #tpu.memory_space<vmem>>, vector<16x128xf32>
    tpu.vector_store %arg26[%c0_145, %c0_146], %436 {strides = array<i32>} : memref<32x128xf32, #tpu.memory_space<vmem>>, vector<16x128xf32>,
    %cst_147 = arith.constant 0.000000e+00 : f32
    %438 = vector.broadcast %cst_147 : f32 to vector<16x128xf32>
    %439 = vector.extract_strided_slice %232 {offsets = [16, 0], sizes = [16, 16], strides = [1, 1]} : vector<32x128xf32> to vector<16x16xf32>
    %440 = vector.extract_strided_slice %233 {offsets = [16, 0], sizes = [16, 16], strides = [1, 1]} : vector<32x128xf32> to vector<16x16xf32>
    %441 = vector.extract_strided_slice %234 {offsets = [16, 0], sizes = [16, 16], strides = [1, 1]} : vector<32x128xf32> to vector<16x16xf32>
    %442 = arith.truncf %439 : vector<16x16xf32> to vector<16x16xbf16>
    %443 = arith.truncf %440 : vector<16x16xf32> to vector<16x16xbf16>
    %cst_148 = arith.constant dense<0.000000e+00> : vector<16x16xf32>
    %444 = tpu.matmul %442, %443, %cst_148 {dimension_numbers = #tpu.dot_dimension_numbers<[1], [1], [0], [0], [0, 0, 1, 0], [], []>} : vector<16x16xbf16>, vector<16x16xbf16>, vector<16x16xf32> -> vector<16x16xf32>
    %cst_149 = arith.constant 2.500000e-01 : f32
    %445 = vector.broadcast %cst_149 : f32 to vector<16x16xf32>
    %446 = arith.mulf %444, %445 : vector<16x16xf32>
    %cst_150 = arith.constant dense<0xFF800000> : vector<16xf32>
    %447 = vector.multi_reduction <maximumf>, %446, %cst_150 [1] : vector<16x16xf32> to vector<16xf32>
    %448 = vector.shape_cast %447 : vector<16xf32> to vector<16x1xf32>
    %449 = vector.broadcast %448 : vector<16x1xf32> to vector<16x16xf32>
    %450 = arith.subf %446, %449 : vector<16x16xf32>
    %451 = math.exp %450 : vector<16x16xf32>
    %cst_151 = arith.constant dense<0.000000e+00> : vector<16xf32>
    %452 = vector.multi_reduction <add>, %451, %cst_151 [1] : vector<16x16xf32> to vector<16xf32>
    %453 = vector.shape_cast %452 : vector<16xf32> to vector<16x1xf32>
    %454 = tpu.reciprocal %453 {approx = true} : vector<16x1xf32> -> vector<16x1xf32>
    %455 = vector.broadcast %454 : vector<16x1xf32> to vector<16x16xf32>
    %456 = arith.mulf %451, %455 : vector<16x16xf32>
    %457 = arith.truncf %456 : vector<16x16xf32> to vector<16x16xbf16>
    %458 = arith.truncf %441 : vector<16x16xf32> to vector<16x16xbf16>
    %cst_152 = arith.constant dense<0.000000e+00> : vector<16x16xf32>
    %459 = tpu.matmul %457, %458, %cst_152 {dimension_numbers = #tpu.dot_dimension_numbers<[1], [0], [0], [1], [0, 0, 1, 1], [], []>} : vector<16x16xbf16>, vector<16x16xbf16>, vector<16x16xf32> -> vector<16x16xf32>
    %460 = vector.extract_strided_slice %235 {offsets = [0, 0], sizes = [16, 128], strides = [1, 1]} : vector<128x128xbf16> to vector<16x128xbf16>
    %461 = arith.truncf %459 : vector<16x16xf32> to vector<16x16xbf16>
    %cst_153 = arith.constant dense<0.000000e+00> : vector<16x128xf32>
    %462 = tpu.matmul %461, %460, %cst_153 {dimension_numbers = #tpu.dot_dimension_numbers<[1], [0], [0], [1], [0, 0, 1, 1], [], []>} : vector<16x16xbf16>, vector<16x128xbf16>, vector<16x128xf32> -> vector<16x128xf32>
    %463 = arith.addf %438, %462 : vector<16x128xf32>
    %464 = vector.extract_strided_slice %232 {offsets = [16, 16], sizes = [16, 16], strides = [1, 1]} : vector<32x128xf32> to vector<16x16xf32>
    %465 = vector.extract_strided_slice %233 {offsets = [16, 16], sizes = [16, 16], strides = [1, 1]} : vector<32x128xf32> to vector<16x16xf32>
    %466 = vector.extract_strided_slice %234 {offsets = [16, 16], sizes = [16, 16], strides = [1, 1]} : vector<32x128xf32> to vector<16x16xf32>
    %467 = arith.truncf %464 : vector<16x16xf32> to vector<16x16xbf16>
    %468 = arith.truncf %465 : vector<16x16xf32> to vector<16x16xbf16>
    %cst_154 = arith.constant dense<0.000000e+00> : vector<16x16xf32>
    %469 = tpu.matmul %467, %468, %cst_154 {dimension_numbers = #tpu.dot_dimension_numbers<[1], [1], [0], [0], [0, 0, 1, 0], [], []>} : vector<16x16xbf16>, vector<16x16xbf16>, vector<16x16xf32> -> vector<16x16xf32>
    %cst_155 = arith.constant 2.500000e-01 : f32
    %470 = vector.broadcast %cst_155 : f32 to vector<16x16xf32>
    %471 = arith.mulf %469, %470 : vector<16x16xf32>
    %cst_156 = arith.constant dense<0xFF800000> : vector<16xf32>
    %472 = vector.multi_reduction <maximumf>, %471, %cst_156 [1] : vector<16x16xf32> to vector<16xf32>
    %473 = vector.shape_cast %472 : vector<16xf32> to vector<16x1xf32>
    %474 = vector.broadcast %473 : vector<16x1xf32> to vector<16x16xf32>
    %475 = arith.subf %471, %474 : vector<16x16xf32>
    %476 = math.exp %475 : vector<16x16xf32>
    %cst_157 = arith.constant dense<0.000000e+00> : vector<16xf32>
    %477 = vector.multi_reduction <add>, %476, %cst_157 [1] : vector<16x16xf32> to vector<16xf32>
    %478 = vector.shape_cast %477 : vector<16xf32> to vector<16x1xf32>
    %479 = tpu.reciprocal %478 {approx = true} : vector<16x1xf32> -> vector<16x1xf32>
    %480 = vector.broadcast %479 : vector<16x1xf32> to vector<16x16xf32>
    %481 = arith.mulf %476, %480 : vector<16x16xf32>
    %482 = arith.truncf %481 : vector<16x16xf32> to vector<16x16xbf16>
    %483 = arith.truncf %466 : vector<16x16xf32> to vector<16x16xbf16>
    %cst_158 = arith.constant dense<0.000000e+00> : vector<16x16xf32>
    %484 = tpu.matmul %482, %483, %cst_158 {dimension_numbers = #tpu.dot_dimension_numbers<[1], [0], [0], [1], [0, 0, 1, 1], [], []>} : vector<16x16xbf16>, vector<16x16xbf16>, vector<16x16xf32> -> vector<16x16xf32>
    %485 = vector.extract_strided_slice %235 {offsets = [16, 0], sizes = [16, 128], strides = [1, 1]} : vector<128x128xbf16> to vector<16x128xbf16>
    %486 = arith.truncf %484 : vector<16x16xf32> to vector<16x16xbf16>
    %cst_159 = arith.constant dense<0.000000e+00> : vector<16x128xf32>
    %487 = tpu.matmul %486, %485, %cst_159 {dimension_numbers = #tpu.dot_dimension_numbers<[1], [0], [0], [1], [0, 0, 1, 1], [], []>} : vector<16x16xbf16>, vector<16x128xbf16>, vector<16x128xf32> -> vector<16x128xf32>
    %488 = arith.addf %463, %487 : vector<16x128xf32>
    %489 = vector.extract_strided_slice %232 {offsets = [16, 32], sizes = [16, 16], strides = [1, 1]} : vector<32x128xf32> to vector<16x16xf32>
    %490 = vector.extract_strided_slice %233 {offsets = [16, 32], sizes = [16, 16], strides = [1, 1]} : vector<32x128xf32> to vector<16x16xf32>
    %491 = vector.extract_strided_slice %234 {offsets = [16, 32], sizes = [16, 16], strides = [1, 1]} : vector<32x128xf32> to vector<16x16xf32>
    %492 = arith.truncf %489 : vector<16x16xf32> to vector<16x16xbf16>
    %493 = arith.truncf %490 : vector<16x16xf32> to vector<16x16xbf16>
    %cst_160 = arith.constant dense<0.000000e+00> : vector<16x16xf32>
    %494 = tpu.matmul %492, %493, %cst_160 {dimension_numbers = #tpu.dot_dimension_numbers<[1], [1], [0], [0], [0, 0, 1, 0], [], []>} : vector<16x16xbf16>, vector<16x16xbf16>, vector<16x16xf32> -> vector<16x16xf32>
    %cst_161 = arith.constant 2.500000e-01 : f32
    %495 = vector.broadcast %cst_161 : f32 to vector<16x16xf32>
    %496 = arith.mulf %494, %495 : vector<16x16xf32>
    %cst_162 = arith.constant dense<0xFF800000> : vector<16xf32>
    %497 = vector.multi_reduction <maximumf>, %496, %cst_162 [1] : vector<16x16xf32> to vector<16xf32>
    %498 = vector.shape_cast %497 : vector<16xf32> to vector<16x1xf32>
    %499 = vector.broadcast %498 : vector<16x1xf32> to vector<16x16xf32>
    %500 = arith.subf %496, %499 : vector<16x16xf32>
    %501 = math.exp %500 : vector<16x16xf32>
    %cst_163 = arith.constant dense<0.000000e+00> : vector<16xf32>
    %502 = vector.multi_reduction <add>, %501, %cst_163 [1] : vector<16x16xf32> to vector<16xf32>
    %503 = vector.shape_cast %502 : vector<16xf32> to vector<16x1xf32>
    %504 = tpu.reciprocal %503 {approx = true} : vector<16x1xf32> -> vector<16x1xf32>
    %505 = vector.broadcast %504 : vector<16x1xf32> to vector<16x16xf32>
    %506 = arith.mulf %501, %505 : vector<16x16xf32>
    %507 = arith.truncf %506 : vector<16x16xf32> to vector<16x16xbf16>
    %508 = arith.truncf %491 : vector<16x16xf32> to vector<16x16xbf16>
    %cst_164 = arith.constant dense<0.000000e+00> : vector<16x16xf32>
    %509 = tpu.matmul %507, %508, %cst_164 {dimension_numbers = #tpu.dot_dimension_numbers<[1], [0], [0], [1], [0, 0, 1, 1], [], []>} : vector<16x16xbf16>, vector<16x16xbf16>, vector<16x16xf32> -> vector<16x16xf32>
    %510 = vector.extract_strided_slice %235 {offsets = [32, 0], sizes = [16, 128], strides = [1, 1]} : vector<128x128xbf16> to vector<16x128xbf16>
    %511 = arith.truncf %509 : vector<16x16xf32> to vector<16x16xbf16>
    %cst_165 = arith.constant dense<0.000000e+00> : vector<16x128xf32>
    %512 = tpu.matmul %511, %510, %cst_165 {dimension_numbers = #tpu.dot_dimension_numbers<[1], [0], [0], [1], [0, 0, 1, 1], [], []>} : vector<16x16xbf16>, vector<16x128xbf16>, vector<16x128xf32> -> vector<16x128xf32>
    %513 = arith.addf %488, %512 : vector<16x128xf32>
    %514 = vector.extract_strided_slice %232 {offsets = [16, 48], sizes = [16, 16], strides = [1, 1]} : vector<32x128xf32> to vector<16x16xf32>
    %515 = vector.extract_strided_slice %233 {offsets = [16, 48], sizes = [16, 16], strides = [1, 1]} : vector<32x128xf32> to vector<16x16xf32>
    %516 = vector.extract_strided_slice %234 {offsets = [16, 48], sizes = [16, 16], strides = [1, 1]} : vector<32x128xf32> to vector<16x16xf32>
    %517 = arith.truncf %514 : vector<16x16xf32> to vector<16x16xbf16>
    %518 = arith.truncf %515 : vector<16x16xf32> to vector<16x16xbf16>
    %cst_166 = arith.constant dense<0.000000e+00> : vector<16x16xf32>
    %519 = tpu.matmul %517, %518, %cst_166 {dimension_numbers = #tpu.dot_dimension_numbers<[1], [1], [0], [0], [0, 0, 1, 0], [], []>} : vector<16x16xbf16>, vector<16x16xbf16>, vector<16x16xf32> -> vector<16x16xf32>
    %cst_167 = arith.constant 2.500000e-01 : f32
    %520 = vector.broadcast %cst_167 : f32 to vector<16x16xf32>
    %521 = arith.mulf %519, %520 : vector<16x16xf32>
    %cst_168 = arith.constant dense<0xFF800000> : vector<16xf32>
    %522 = vector.multi_reduction <maximumf>, %521, %cst_168 [1] : vector<16x16xf32> to vector<16xf32>
    %523 = vector.shape_cast %522 : vector<16xf32> to vector<16x1xf32>
    %524 = vector.broadcast %523 : vector<16x1xf32> to vector<16x16xf32>
    %525 = arith.subf %521, %524 : vector<16x16xf32>
    %526 = math.exp %525 : vector<16x16xf32>
    %cst_169 = arith.constant dense<0.000000e+00> : vector<16xf32>
    %527 = vector.multi_reduction <add>, %526, %cst_169 [1] : vector<16x16xf32> to vector<16xf32>
    %528 = vector.shape_cast %527 : vector<16xf32> to vector<16x1xf32>
    %529 = tpu.reciprocal %528 {approx = true} : vector<16x1xf32> -> vector<16x1xf32>
    %530 = vector.broadcast %529 : vector<16x1xf32> to vector<16x16xf32>
    %531 = arith.mulf %526, %530 : vector<16x16xf32>
    %532 = arith.truncf %531 : vector<16x16xf32> to vector<16x16xbf16>
    %533 = arith.truncf %516 : vector<16x16xf32> to vector<16x16xbf16>
    %cst_170 = arith.constant dense<0.000000e+00> : vector<16x16xf32>
    %534 = tpu.matmul %532, %533, %cst_170 {dimension_numbers = #tpu.dot_dimension_numbers<[1], [0], [0], [1], [0, 0, 1, 1], [], []>} : vector<16x16xbf16>, vector<16x16xbf16>, vector<16x16xf32> -> vector<16x16xf32>
    %535 = vector.extract_strided_slice %235 {offsets = [48, 0], sizes = [16, 128], strides = [1, 1]} : vector<128x128xbf16> to vector<16x128xbf16>
    %536 = arith.truncf %534 : vector<16x16xf32> to vector<16x16xbf16>
    %cst_171 = arith.constant dense<0.000000e+00> : vector<16x128xf32>
    %537 = tpu.matmul %536, %535, %cst_171 {dimension_numbers = #tpu.dot_dimension_numbers<[1], [0], [0], [1], [0, 0, 1, 1], [], []>} : vector<16x16xbf16>, vector<16x128xbf16>, vector<16x128xf32> -> vector<16x128xf32>
    %538 = arith.addf %513, %537 : vector<16x128xf32>
    %539 = vector.extract_strided_slice %232 {offsets = [16, 64], sizes = [16, 16], strides = [1, 1]} : vector<32x128xf32> to vector<16x16xf32>
    %540 = vector.extract_strided_slice %233 {offsets = [16, 64], sizes = [16, 16], strides = [1, 1]} : vector<32x128xf32> to vector<16x16xf32>
    %541 = vector.extract_strided_slice %234 {offsets = [16, 64], sizes = [16, 16], strides = [1, 1]} : vector<32x128xf32> to vector<16x16xf32>
    %542 = arith.truncf %539 : vector<16x16xf32> to vector<16x16xbf16>
    %543 = arith.truncf %540 : vector<16x16xf32> to vector<16x16xbf16>
    %cst_172 = arith.constant dense<0.000000e+00> : vector<16x16xf32>
    %544 = tpu.matmul %542, %543, %cst_172 {dimension_numbers = #tpu.dot_dimension_numbers<[1], [1], [0], [0], [0, 0, 1, 0], [], []>} : vector<16x16xbf16>, vector<16x16xbf16>, vector<16x16xf32> -> vector<16x16xf32>
    %cst_173 = arith.constant 2.500000e-01 : f32
    %545 = vector.broadcast %cst_173 : f32 to vector<16x16xf32>
    %546 = arith.mulf %544, %545 : vector<16x16xf32>
    %cst_174 = arith.constant dense<0xFF800000> : vector<16xf32>
    %547 = vector.multi_reduction <maximumf>, %546, %cst_174 [1] : vector<16x16xf32> to vector<16xf32>
    %548 = vector.shape_cast %547 : vector<16xf32> to vector<16x1xf32>
    %549 = vector.broadcast %548 : vector<16x1xf32> to vector<16x16xf32>
    %550 = arith.subf %546, %549 : vector<16x16xf32>
    %551 = math.exp %550 : vector<16x16xf32>
    %cst_175 = arith.constant dense<0.000000e+00> : vector<16xf32>
    %552 = vector.multi_reduction <add>, %551, %cst_175 [1] : vector<16x16xf32> to vector<16xf32>
    %553 = vector.shape_cast %552 : vector<16xf32> to vector<16x1xf32>
    %554 = tpu.reciprocal %553 {approx = true} : vector<16x1xf32> -> vector<16x1xf32>
    %555 = vector.broadcast %554 : vector<16x1xf32> to vector<16x16xf32>
    %556 = arith.mulf %551, %555 : vector<16x16xf32>
    %557 = arith.truncf %556 : vector<16x16xf32> to vector<16x16xbf16>
    %558 = arith.truncf %541 : vector<16x16xf32> to vector<16x16xbf16>
    %cst_176 = arith.constant dense<0.000000e+00> : vector<16x16xf32>
    %559 = tpu.matmul %557, %558, %cst_176 {dimension_numbers = #tpu.dot_dimension_numbers<[1], [0], [0], [1], [0, 0, 1, 1], [], []>} : vector<16x16xbf16>, vector<16x16xbf16>, vector<16x16xf32> -> vector<16x16xf32>
    %560 = vector.extract_strided_slice %235 {offsets = [64, 0], sizes = [16, 128], strides = [1, 1]} : vector<128x128xbf16> to vector<16x128xbf16>
    %561 = arith.truncf %559 : vector<16x16xf32> to vector<16x16xbf16>
    %cst_177 = arith.constant dense<0.000000e+00> : vector<16x128xf32>
    %562 = tpu.matmul %561, %560, %cst_177 {dimension_numbers = #tpu.dot_dimension_numbers<[1], [0], [0], [1], [0, 0, 1, 1], [], []>} : vector<16x16xbf16>, vector<16x128xbf16>, vector<16x128xf32> -> vector<16x128xf32>
    %563 = arith.addf %538, %562 : vector<16x128xf32>
    %564 = vector.extract_strided_slice %232 {offsets = [16, 80], sizes = [16, 16], strides = [1, 1]} : vector<32x128xf32> to vector<16x16xf32>
    %565 = vector.extract_strided_slice %233 {offsets = [16, 80], sizes = [16, 16], strides = [1, 1]} : vector<32x128xf32> to vector<16x16xf32>
    %566 = vector.extract_strided_slice %234 {offsets = [16, 80], sizes = [16, 16], strides = [1, 1]} : vector<32x128xf32> to vector<16x16xf32>
    %567 = arith.truncf %564 : vector<16x16xf32> to vector<16x16xbf16>
    %568 = arith.truncf %565 : vector<16x16xf32> to vector<16x16xbf16>
    %cst_178 = arith.constant dense<0.000000e+00> : vector<16x16xf32>
    %569 = tpu.matmul %567, %568, %cst_178 {dimension_numbers = #tpu.dot_dimension_numbers<[1], [1], [0], [0], [0, 0, 1, 0], [], []>} : vector<16x16xbf16>, vector<16x16xbf16>, vector<16x16xf32> -> vector<16x16xf32>
    %cst_179 = arith.constant 2.500000e-01 : f32
    %570 = vector.broadcast %cst_179 : f32 to vector<16x16xf32>
    %571 = arith.mulf %569, %570 : vector<16x16xf32>
    %cst_180 = arith.constant dense<0xFF800000> : vector<16xf32>
    %572 = vector.multi_reduction <maximumf>, %571, %cst_180 [1] : vector<16x16xf32> to vector<16xf32>
    %573 = vector.shape_cast %572 : vector<16xf32> to vector<16x1xf32>
    %574 = vector.broadcast %573 : vector<16x1xf32> to vector<16x16xf32>
    %575 = arith.subf %571, %574 : vector<16x16xf32>
    %576 = math.exp %575 : vector<16x16xf32>
    %cst_181 = arith.constant dense<0.000000e+00> : vector<16xf32>
    %577 = vector.multi_reduction <add>, %576, %cst_181 [1] : vector<16x16xf32> to vector<16xf32>
    %578 = vector.shape_cast %577 : vector<16xf32> to vector<16x1xf32>
    %579 = tpu.reciprocal %578 {approx = true} : vector<16x1xf32> -> vector<16x1xf32>
    %580 = vector.broadcast %579 : vector<16x1xf32> to vector<16x16xf32>
    %581 = arith.mulf %576, %580 : vector<16x16xf32>
    %582 = arith.truncf %581 : vector<16x16xf32> to vector<16x16xbf16>
    %583 = arith.truncf %566 : vector<16x16xf32> to vector<16x16xbf16>
    %cst_182 = arith.constant dense<0.000000e+00> : vector<16x16xf32>
    %584 = tpu.matmul %582, %583, %cst_182 {dimension_numbers = #tpu.dot_dimension_numbers<[1], [0], [0], [1], [0, 0, 1, 1], [], []>} : vector<16x16xbf16>, vector<16x16xbf16>, vector<16x16xf32> -> vector<16x16xf32>
    %585 = vector.extract_strided_slice %235 {offsets = [80, 0], sizes = [16, 128], strides = [1, 1]} : vector<128x128xbf16> to vector<16x128xbf16>
    %586 = arith.truncf %584 : vector<16x16xf32> to vector<16x16xbf16>
    %cst_183 = arith.constant dense<0.000000e+00> : vector<16x128xf32>
    %587 = tpu.matmul %586, %585, %cst_183 {dimension_numbers = #tpu.dot_dimension_numbers<[1], [0], [0], [1], [0, 0, 1, 1], [], []>} : vector<16x16xbf16>, vector<16x128xbf16>, vector<16x128xf32> -> vector<16x128xf32>
    %588 = arith.addf %563, %587 : vector<16x128xf32>
    %589 = vector.extract_strided_slice %232 {offsets = [16, 96], sizes = [16, 16], strides = [1, 1]} : vector<32x128xf32> to vector<16x16xf32>
    %590 = vector.extract_strided_slice %233 {offsets = [16, 96], sizes = [16, 16], strides = [1, 1]} : vector<32x128xf32> to vector<16x16xf32>
    %591 = vector.extract_strided_slice %234 {offsets = [16, 96], sizes = [16, 16], strides = [1, 1]} : vector<32x128xf32> to vector<16x16xf32>
    %592 = arith.truncf %589 : vector<16x16xf32> to vector<16x16xbf16>
    %593 = arith.truncf %590 : vector<16x16xf32> to vector<16x16xbf16>
    %cst_184 = arith.constant dense<0.000000e+00> : vector<16x16xf32>
    %594 = tpu.matmul %592, %593, %cst_184 {dimension_numbers = #tpu.dot_dimension_numbers<[1], [1], [0], [0], [0, 0, 1, 0], [], []>} : vector<16x16xbf16>, vector<16x16xbf16>, vector<16x16xf32> -> vector<16x16xf32>
    %cst_185 = arith.constant 2.500000e-01 : f32
    %595 = vector.broadcast %cst_185 : f32 to vector<16x16xf32>
    %596 = arith.mulf %594, %595 : vector<16x16xf32>
    %cst_186 = arith.constant dense<0xFF800000> : vector<16xf32>
    %597 = vector.multi_reduction <maximumf>, %596, %cst_186 [1] : vector<16x16xf32> to vector<16xf32>
    %598 = vector.shape_cast %597 : vector<16xf32> to vector<16x1xf32>
    %599 = vector.broadcast %598 : vector<16x1xf32> to vector<16x16xf32>
    %600 = arith.subf %596, %599 : vector<16x16xf32>
    %601 = math.exp %600 : vector<16x16xf32>
    %cst_187 = arith.constant dense<0.000000e+00> : vector<16xf32>
    %602 = vector.multi_reduction <add>, %601, %cst_187 [1] : vector<16x16xf32> to vector<16xf32>
    %603 = vector.shape_cast %602 : vector<16xf32> to vector<16x1xf32>
    %604 = tpu.reciprocal %603 {approx = true} : vector<16x1xf32> -> vector<16x1xf32>
    %605 = vector.broadcast %604 : vector<16x1xf32> to vector<16x16xf32>
    %606 = arith.mulf %601, %605 : vector<16x16xf32>
    %607 = arith.truncf %606 : vector<16x16xf32> to vector<16x16xbf16>
    %608 = arith.truncf %591 : vector<16x16xf32> to vector<16x16xbf16>
    %cst_188 = arith.constant dense<0.000000e+00> : vector<16x16xf32>
    %609 = tpu.matmul %607, %608, %cst_188 {dimension_numbers = #tpu.dot_dimension_numbers<[1], [0], [0], [1], [0, 0, 1, 1], [], []>} : vector<16x16xbf16>, vector<16x16xbf16>, vector<16x16xf32> -> vector<16x16xf32>
    %610 = vector.extract_strided_slice %235 {offsets = [96, 0], sizes = [16, 128], strides = [1, 1]} : vector<128x128xbf16> to vector<16x128xbf16>
    %611 = arith.truncf %609 : vector<16x16xf32> to vector<16x16xbf16>
    %cst_189 = arith.constant dense<0.000000e+00> : vector<16x128xf32>
    %612 = tpu.matmul %611, %610, %cst_189 {dimension_numbers = #tpu.dot_dimension_numbers<[1], [0], [0], [1], [0, 0, 1, 1], [], []>} : vector<16x16xbf16>, vector<16x128xbf16>, vector<16x128xf32> -> vector<16x128xf32>
    %613 = arith.addf %588, %612 : vector<16x128xf32>
    %614 = vector.extract_strided_slice %232 {offsets = [16, 112], sizes = [16, 16], strides = [1, 1]} : vector<32x128xf32> to vector<16x16xf32>
    %615 = vector.extract_strided_slice %233 {offsets = [16, 112], sizes = [16, 16], strides = [1, 1]} : vector<32x128xf32> to vector<16x16xf32>
    %616 = vector.extract_strided_slice %234 {offsets = [16, 112], sizes = [16, 16], strides = [1, 1]} : vector<32x128xf32> to vector<16x16xf32>
    %617 = arith.truncf %614 : vector<16x16xf32> to vector<16x16xbf16>
    %618 = arith.truncf %615 : vector<16x16xf32> to vector<16x16xbf16>
    %cst_190 = arith.constant dense<0.000000e+00> : vector<16x16xf32>
    %619 = tpu.matmul %617, %618, %cst_190 {dimension_numbers = #tpu.dot_dimension_numbers<[1], [1], [0], [0], [0, 0, 1, 0], [], []>} : vector<16x16xbf16>, vector<16x16xbf16>, vector<16x16xf32> -> vector<16x16xf32>
    %cst_191 = arith.constant 2.500000e-01 : f32
    %620 = vector.broadcast %cst_191 : f32 to vector<16x16xf32>
    %621 = arith.mulf %619, %620 : vector<16x16xf32>
    %cst_192 = arith.constant dense<0xFF800000> : vector<16xf32>
    %622 = vector.multi_reduction <maximumf>, %621, %cst_192 [1] : vector<16x16xf32> to vector<16xf32>
    %623 = vector.shape_cast %622 : vector<16xf32> to vector<16x1xf32>
    %624 = vector.broadcast %623 : vector<16x1xf32> to vector<16x16xf32>
    %625 = arith.subf %621, %624 : vector<16x16xf32>
    %626 = math.exp %625 : vector<16x16xf32>
    %cst_193 = arith.constant dense<0.000000e+00> : vector<16xf32>
    %627 = vector.multi_reduction <add>, %626, %cst_193 [1] : vector<16x16xf32> to vector<16xf32>
    %628 = vector.shape_cast %627 : vector<16xf32> to vector<16x1xf32>
    %629 = tpu.reciprocal %628 {approx = true} : vector<16x1xf32> -> vector<16x1xf32>
    %630 = vector.broadcast %629 : vector<16x1xf32> to vector<16x16xf32>
    %631 = arith.mulf %626, %630 : vector<16x16xf32>
    %632 = arith.truncf %631 : vector<16x16xf32> to vector<16x16xbf16>
    %633 = arith.truncf %616 : vector<16x16xf32> to vector<16x16xbf16>
    %cst_194 = arith.constant dense<0.000000e+00> : vector<16x16xf32>
    %634 = tpu.matmul %632, %633, %cst_194 {dimension_numbers = #tpu.dot_dimension_numbers<[1], [0], [0], [1], [0, 0, 1, 1], [], []>} : vector<16x16xbf16>, vector<16x16xbf16>, vector<16x16xf32> -> vector<16x16xf32>
    %635 = vector.extract_strided_slice %235 {offsets = [112, 0], sizes = [16, 128], strides = [1, 1]} : vector<128x128xbf16> to vector<16x128xbf16>
    %636 = arith.truncf %634 : vector<16x16xf32> to vector<16x16xbf16>
    %cst_195 = arith.constant dense<0.000000e+00> : vector<16x128xf32>
    %637 = tpu.matmul %636, %635, %cst_195 {dimension_numbers = #tpu.dot_dimension_numbers<[1], [0], [0], [1], [0, 0, 1, 1], [], []>} : vector<16x16xbf16>, vector<16x128xbf16>, vector<16x128xf32> -> vector<16x128xf32>
    %638 = arith.addf %613, %637 : vector<16x128xf32>
    %c16 = arith.constant 16 : index
    %c0_196 = arith.constant 0 : index
    %639 = vector.load %arg26[%c16, %c0_196] : memref<32x128xf32, #tpu.memory_space<vmem>>, vector<16x128xf32>
    tpu.vector_store %arg26[%c16, %c0_196], %638 {strides = array<i32>} : memref<32x128xf32, #tpu.memory_space<vmem>>, vector<16x128xf32>,
    %c0_197 = arith.constant 0 : index
    %c0_198 = arith.constant 0 : index
    %640 = vector.load %arg26[%c0_197, %c0_198] : memref<32x128xf32, #tpu.memory_space<vmem>>, vector<32x128xf32>
    %c0_199 = arith.constant 0 : index
    %c0_200 = arith.constant 0 : index
    %641 = vector.load %arg16[%c0_199, %c0_200] : memref<1x128xf32, #tpu.memory_space<vmem>>, vector<1x128xf32>
    %642 = vector.broadcast %641 : vector<1x128xf32> to vector<32x128xf32>
    %643 = arith.addf %640, %642 : vector<32x128xf32>
    %644 = arith.addf %643, %201 : vector<32x128xf32>
    %c0_201 = arith.constant 0 : index
    %c0_202 = arith.constant 0 : index
    %645 = vector.load %arg23[%c0_201, %c0_202] : memref<1x128xf32, #tpu.memory_space<vmem>>, vector<1x128xf32>
    %c0_203 = arith.constant 0 : index
    %c0_204 = arith.constant 0 : index
    %646 = vector.load %arg24[%c0_203, %c0_204] : memref<1x128xf32, #tpu.memory_space<vmem>>, vector<1x128xf32>
    %cst_205 = arith.constant dense<0.000000e+00> : vector<32xf32>
    %647 = vector.multi_reduction <add>, %644, %cst_205 [1] : vector<32x128xf32> to vector<32xf32>
    %648 = vector.shape_cast %647 : vector<32xf32> to vector<32x1xf32>
    %cst_206 = arith.constant 1.280000e+02 : f32
    %649 = vector.broadcast %cst_206 : f32 to vector<32x1xf32>
    %650 = arith.divf %648, %649 : vector<32x1xf32>
    %651 = vector.broadcast %650 : vector<32x1xf32> to vector<32x128xf32>
    %652 = arith.subf %644, %651 : vector<32x128xf32>
    %653 = arith.mulf %652, %652 : vector<32x128xf32>
    %cst_207 = arith.constant dense<0.000000e+00> : vector<32xf32>
    %654 = vector.multi_reduction <add>, %653, %cst_207 [1] : vector<32x128xf32> to vector<32xf32>
    %655 = vector.shape_cast %654 : vector<32xf32> to vector<32x1xf32>
    %cst_208 = arith.constant 1.280000e+02 : f32
    %656 = vector.broadcast %cst_208 : f32 to vector<32x1xf32>
    %657 = arith.divf %655, %656 : vector<32x1xf32>
    %658 = vector.broadcast %650 : vector<32x1xf32> to vector<32x128xf32>
    %659 = arith.subf %644, %658 : vector<32x128xf32>
    %cst_209 = arith.constant 9.99999997E-7 : f32
    %660 = vector.broadcast %cst_209 : f32 to vector<32x1xf32>
    %661 = arith.addf %657, %660 : vector<32x1xf32>
    %662 = math.rsqrt %661 : vector<32x1xf32>
    %663 = vector.broadcast %662 : vector<32x1xf32> to vector<32x128xf32>
    %664 = arith.mulf %659, %663 : vector<32x128xf32>
    %665 = vector.broadcast %645 : vector<1x128xf32> to vector<32x128xf32>
    %666 = arith.mulf %664, %665 : vector<32x128xf32>
    %667 = vector.broadcast %646 : vector<1x128xf32> to vector<32x128xf32>
    %668 = arith.addf %666, %667 : vector<32x128xf32>
    %c0_210 = arith.constant 0 : index
    %c0_211 = arith.constant 0 : index
    %669 = vector.load %arg19[%c0_210, %c0_211] : memref<128x512xbf16, #tpu.memory_space<vmem>>, vector<128x512xbf16>
    %670 = arith.truncf %668 : vector<32x128xf32> to vector<32x128xbf16>
    %cst_212 = arith.constant dense<0.000000e+00> : vector<32x512xf32>
    %671 = tpu.matmul %670, %669, %cst_212 {dimension_numbers = #tpu.dot_dimension_numbers<[1], [0], [0], [1], [0, 0, 1, 1], [], []>} : vector<32x128xbf16>, vector<128x512xbf16>, vector<32x512xf32> -> vector<32x512xf32>
    %c0_213 = arith.constant 0 : index
    %c0_214 = arith.constant 0 : index
    %672 = vector.load %arg20[%c0_213, %c0_214] : memref<1x512xf32, #tpu.memory_space<vmem>>, vector<1x512xf32>
    %673 = vector.broadcast %672 : vector<1x512xf32> to vector<32x512xf32>
    %674 = arith.addf %671, %673 : vector<32x512xf32>
    %cst_215 = arith.constant 0.000000e+00 : f32
    %675 = vector.broadcast %cst_215 : f32 to vector<32x512xf32>
    %676 = arith.maximumf %674, %675 : vector<32x512xf32>
    %c0_216 = arith.constant 0 : index
    %c0_217 = arith.constant 0 : index
    %677 = vector.load %arg21[%c0_216, %c0_217] : memref<512x128xbf16, #tpu.memory_space<vmem>>, vector<512x128xbf16>
    %678 = arith.truncf %676 : vector<32x512xf32> to vector<32x512xbf16>
    %cst_218 = arith.constant dense<0.000000e+00> : vector<32x128xf32>
    %679 = tpu.matmul %678, %677, %cst_218 {dimension_numbers = #tpu.dot_dimension_numbers<[1], [0], [0], [1], [0, 0, 1, 1], [], []>} : vector<32x512xbf16>, vector<512x128xbf16>, vector<32x128xf32> -> vector<32x128xf32>
    %c0_219 = arith.constant 0 : index
    %c0_220 = arith.constant 0 : index
    %680 = vector.load %arg22[%c0_219, %c0_220] : memref<1x128xf32, #tpu.memory_space<vmem>>, vector<1x128xf32>
    %681 = vector.broadcast %680 : vector<1x128xf32> to vector<32x128xf32>
    %682 = arith.addf %679, %681 : vector<32x128xf32>
    %683 = arith.addf %682, %644 : vector<32x128xf32>
    %c0_221 = arith.constant 0 : index
    %c0_222 = arith.constant 0 : index
    %684 = vector.load %arg25[%c0_221, %c0_222] : memref<32x128xf32, #tpu.memory_space<vmem>>, vector<32x128xf32>
    tpu.vector_store %arg25[%c0_221, %c0_222], %683 {strides = array<i32>} : memref<32x128xf32, #tpu.memory_space<vmem>>, vector<32x128xf32>,
    return
  }
  func.func @transform_0(%arg0: i32) -> (i32, i32) {
    %c0_i32 = arith.constant 0 : i32
    %c0_i32_0 = arith.constant 0 : i32
    return %arg0, %c0_i32 : i32, i32
  }
  func.func @transform_1(%arg0: i32) -> (i32, i32) {
    %c0_i32 = arith.constant 0 : i32
    %c0_i32_0 = arith.constant 0 : i32
    %c0_i32_1 = arith.constant 0 : i32
    return %c0_i32, %c0_i32_0 : i32, i32
  }
  func.func @transform_2(%arg0: i32) -> (i32, i32, i32) {
    %c0_i32 = arith.constant 0 : i32
    %c0_i32_0 = arith.constant 0 : i32
    %c0_i32_1 = arith.constant 0 : i32
    %c0_i32_2 = arith.constant 0 : i32
    return %c0_i32, %c0_i32_0, %c0_i32_1 : i32, i32, i32
  }
  func.func @transform_3(%arg0: i32) -> (i32, i32) {
    %c0_i32 = arith.constant 0 : i32
    %c0_i32_0 = arith.constant 0 : i32
    %c0_i32_1 = arith.constant 0 : i32
    return %c0_i32, %c0_i32_0 : i32, i32
  }
  func.func @transform_4(%arg0: i32) -> (i32, i32) {
    %c0_i32 = arith.constant 0 : i32
    %c0_i32_0 = arith.constant 0 : i32
    %c0_i32_1 = arith.constant 0 : i32
    return %c0_i32, %c0_i32_0 : i32, i32
  }
  func.func @transform_5(%arg0: i32) -> (i32, i32) {
    %c0_i32 = arith.constant 0 : i32
    %c0_i32_0 = arith.constant 0 : i32
    %c0_i32_1 = arith.constant 0 : i32
    return %c0_i32, %c0_i32_0 : i32, i32
  }
  func.func @transform_6(%arg0: i32) -> (i32, i32) {
    %c0_i32 = arith.constant 0 : i32
    %c0_i32_0 = arith.constant 0 : i32
    %c0_i32_1 = arith.constant 0 : i32
    return %c0_i32, %c0_i32_0 : i32, i32
  }
  func.func @transform_7(%arg0: i32) -> (i32, i32, i32) {
    %c0_i32 = arith.constant 0 : i32
    %c0_i32_0 = arith.constant 0 : i32
    %c0_i32_1 = arith.constant 0 : i32
    %c0_i32_2 = arith.constant 0 : i32
    return %c0_i32, %c0_i32_0, %c0_i32_1 : i32, i32, i32
  }
  func.func @transform_8(%arg0: i32) -> (i32, i32) {
    %c0_i32 = arith.constant 0 : i32
    %c0_i32_0 = arith.constant 0 : i32
    %c0_i32_1 = arith.constant 0 : i32
    return %c0_i32, %c0_i32_0 : i32, i32
  }
  func.func @transform_9(%arg0: i32) -> (i32, i32) {
    %c0_i32 = arith.constant 0 : i32
    %c0_i32_0 = arith.constant 0 : i32
    %c0_i32_1 = arith.constant 0 : i32
    return %c0_i32, %c0_i32_0 : i32, i32
  }
  func.func @transform_10(%arg0: i32) -> (i32, i32) {
    %c0_i32 = arith.constant 0 : i32
    %c0_i32_0 = arith.constant 0 : i32
    %c0_i32_1 = arith.constant 0 : i32
    return %c0_i32, %c0_i32_0 : i32, i32
  }
  func.func @transform_11(%arg0: i32) -> (i32, i32) {
    %c0_i32 = arith.constant 0 : i32
    %c0_i32_0 = arith.constant 0 : i32
    %c0_i32_1 = arith.constant 0 : i32
    return %c0_i32, %c0_i32_0 : i32, i32
  }
  func.func @transform_12(%arg0: i32) -> (i32, i32) {
    %c0_i32 = arith.constant 0 : i32
    %c0_i32_0 = arith.constant 0 : i32
    %c0_i32_1 = arith.constant 0 : i32
    return %c0_i32, %c0_i32_0 : i32, i32
  }
  func.func @transform_13(%arg0: i32) -> (i32, i32) {
    %c0_i32 = arith.constant 0 : i32
    %c0_i32_0 = arith.constant 0 : i32
    %c0_i32_1 = arith.constant 0 : i32
    return %c0_i32, %c0_i32_0 : i32, i32
  }
  func.func @transform_14(%arg0: i32) -> (i32, i32) {
    %c0_i32 = arith.constant 0 : i32
    %c0_i32_0 = arith.constant 0 : i32
    %c0_i32_1 = arith.constant 0 : i32
    return %c0_i32, %c0_i32_0 : i32, i32
  }
  func.func @transform_15(%arg0: i32) -> (i32, i32) {
    %c0_i32 = arith.constant 0 : i32
    %c0_i32_0 = arith.constant 0 : i32
    %c0_i32_1 = arith.constant 0 : i32
    return %c0_i32, %c0_i32_0 : i32, i32
  }
  func.func @transform_16(%arg0: i32) -> (i32, i32) {
    %c0_i32 = arith.constant 0 : i32
    %c0_i32_0 = arith.constant 0 : i32
    %c0_i32_1 = arith.constant 0 : i32
    return %c0_i32, %c0_i32_0 : i32, i32
  }
  func.func @transform_17(%arg0: i32) -> (i32, i32) {
    %c0_i32 = arith.constant 0 : i32
    %c0_i32_0 = arith.constant 0 : i32
    %c0_i32_1 = arith.constant 0 : i32
    return %c0_i32, %c0_i32_0 : i32, i32
  }
  func.func @transform_18(%arg0: i32) -> (i32, i32) {
    %c0_i32 = arith.constant 0 : i32
    %c0_i32_0 = arith.constant 0 : i32
    %c0_i32_1 = arith.constant 0 : i32
    return %c0_i32, %c0_i32_0 : i32, i32
  }
  func.func @transform_19(%arg0: i32) -> (i32, i32) {
    %c0_i32 = arith.constant 0 : i32
    %c0_i32_0 = arith.constant 0 : i32
    %c0_i32_1 = arith.constant 0 : i32
    return %c0_i32, %c0_i32_0 : i32, i32
  }
  func.func @transform_20(%arg0: i32) -> (i32, i32) {
    %c0_i32 = arith.constant 0 : i32
    %c0_i32_0 = arith.constant 0 : i32
    %c0_i32_1 = arith.constant 0 : i32
    return %c0_i32, %c0_i32_0 : i32, i32
  }
  func.func @transform_21(%arg0: i32) -> (i32, i32) {
    %c0_i32 = arith.constant 0 : i32
    %c0_i32_0 = arith.constant 0 : i32
    %c0_i32_1 = arith.constant 0 : i32
    return %c0_i32, %c0_i32_0 : i32, i32
  }
  func.func @transform_22(%arg0: i32) -> (i32, i32) {
    %c0_i32 = arith.constant 0 : i32
    %c0_i32_0 = arith.constant 0 : i32
    %c0_i32_1 = arith.constant 0 : i32
    return %c0_i32, %c0_i32_0 : i32, i32
  }
  func.func @transform_23(%arg0: i32) -> (i32, i32) {
    %c0_i32 = arith.constant 0 : i32
    %c0_i32_0 = arith.constant 0 : i32
    %c0_i32_1 = arith.constant 0 : i32
    return %c0_i32, %c0_i32_0 : i32, i32
  }
  func.func @transform_24(%arg0: i32) -> (i32, i32) {
    %c0_i32 = arith.constant 0 : i32
    %c0_i32_0 = arith.constant 0 : i32
    return %arg0, %c0_i32 : i32, i32
  }
}

</mosaic_0001>

<bundles_post_ra>
// kernel: tpu_custom_call.1
= control target key start
LH: loop header
LB: loop body
LE: loop exit
PB: predicated region body
PF: predicated region fallthrough
CT: control target
= control target key end

     0   :  { %s8710_s0 = inlined_call_operand.hbm [shape: f32[64,128], index: 0, kind: input, shape index: {}]   ;;  %s8711_s1 = inlined_call_operand.hbm [shape: f32[32,128], index: 1, kind: input, shape index: {}]   ;;  %s8712_s2 = inlined_call_operand.vmem [shape: f32[5,1,128], index: 2, kind: input, shape index: {}]   ;;  %s8713_s3 = inlined_call_operand.hbm [shape: bf16[128,128], index: 3, kind: input, shape index: {}]   ;;  %s8714_s4 = inlined_call_operand.vmem [shape: f32[1,128], index: 4, kind: input, shape index: {}]   ;;  %s8715_s5 = inlined_call_operand.hbm [shape: f32[1,128], index: 5, kind: input, shape index: {}]   ;;  %s8716_s6 = inlined_call_operand.vmem [shape: f32[1,128], index: 6, kind: input, shape index: {}]   ;;  %s8717_s7 = inlined_call_operand.vmem [shape: f32[5,1,128], index: 7, kind: input, shape index: {}]   ;;  %s8718_s8 = inlined_call_operand.hbm [shape: bf16[128,128], index: 8, kind: input, shape index: {}]   ;;  %s8719_s9 = inlined_call_operand.vmem [shape: f32[1,128], index: 9, kind: input, shape index: {}]   ;;  %s8720_s10 = inlined_call_operand.vmem [shape: f32[1,128], index: 10, kind: input, shape index: {}]   ;;  %s8721_s11 = inlined_call_operand.vmem [shape: f32[1,128], index: 11, kind: input, shape index: {}]   ;;  %s8722_s12 = inlined_call_operand.hbm [shape: bf16[128,384], index: 12, kind: input, shape index: {}]   ;;  %s8723_s13 = inlined_call_operand.vmem [shape: f32[1,384], index: 13, kind: input, shape index: {}]   ;;  %s8724_s14 = inlined_call_operand.hbm [shape: bf16[128,128], index: 14, kind: input, shape index: {}]   ;;  %s8725_s15 = inlined_call_operand.vmem [shape: f32[1,128], index: 15, kind: input, shape index: {}]   ;;  %s8726_s16 = inlined_call_operand.vmem [shape: f32[1,128], index: 16, kind: input, shape index: {}]   ;;  %s8727_s17 = inlined_call_operand.vmem [shape: f32[1,128], index: 17, kind: input, shape index: {}]   ;;  %s8728_s18 = inlined_call_operand.hbm [shape: bf16[128,512], index: 18, kind: input, shape index: {}]   ;;  %s8729_s19 = inlined_call_operand.vmem [shape: f32[1,512], index: 19, kind: input, shape index: {}]   ;;  %s8730_s20 = inlined_call_operand.hbm [shape: bf16[512,128], index: 20, kind: input, shape index: {}]   ;;  %s8731_s21 = inlined_call_operand.vmem [shape: f32[1,128], index: 21, kind: input, shape index: {}]   ;;  %s8732_s22 = inlined_call_operand.vmem [shape: f32[1,128], index: 22, kind: input, shape index: {}]   ;;  %s8733_s23 = inlined_call_operand.vmem [shape: f32[1,128], index: 23, kind: input, shape index: {}]   ;;  %s8734_s24 = inlined_call_operand.hbm [shape: f32[64,128], index: 24, kind: output, shape index: {}]  }
   0x1   :  { %8750 = sst [smem:[#allocation25_spill]] %s8710_s0 }
   0x2   :  { %8751 = sst [smem:[#allocation26_spill]] %s8711_s1 }
   0x3   :  { %8752 = sst [smem:[#allocation27_spill]] %s8712_s2 }
   0x4   :  { %8753 = sst [smem:[#allocation28_spill]] %s8713_s3 }
   0x5   :  { %8754 = sst [smem:[#allocation29_spill]] %s8714_s4 }
   0x6   :  { %8755 = sst [smem:[#allocation30_spill]] %s8715_s5 }
   0x7   :  { %8756 = sst [smem:[#allocation31_spill]] %s8716_s6 }
   0x8   :  { %8757 = sst [smem:[#allocation32_spill]] %s8717_s7 }
   0x9   :  { %8758 = sst [smem:[#allocation33_spill]] %s8718_s8 }
   0xa   :  { %8759 = sst [smem:[#allocation34_spill]] %s8722_s12 }
   0xb   :  { %8760 = sst [smem:[#allocation35_spill]] %s8723_s13 }
   0xc   :  { %8761 = sst [smem:[#allocation36_spill]] %s8725_s15 }
   0xd   :  { %8762 = sst [smem:[#allocation37_spill]] %s8726_s16 }
   0xe   :  { %8763 = sst [smem:[#allocation38_spill]] %s8727_s17 }
   0xf   :  { %8764 = sst [smem:[#allocation39_spill]] %s8728_s18 }
  0x10   :  { %8765 = sst [smem:[#allocation40_spill]] %s8729_s19 }
  0x11   :  { %8766 = sst [smem:[#allocation41_spill]] %s8731_s21 }
  0x12   :  { %8767 = sst [smem:[#allocation42_spill]] %s8732_s22 }
  0x13   :  { %8768 = sst [smem:[#allocation43_spill]] %s8733_s23 }
  0x14   :  { %8769 = sst [smem:[#allocation44_spill]] %s8734_s24 }
  0x15   :  { %29 = vsyncpa [#allocation4], 0 }
  0x16   :  { %31 = vsyncpa [#allocation4 + $0x1], 0 }
  0x17   :  { %32 = vsyncpa [#allocation7], 0 }
  0x18   :  { %33 = vsyncpa [#allocation10], 0 }
  0x19   :  { %34 = vsyncpa [#allocation13], 0 }
  0x1a   :  { %35 = vsyncpa [#allocation16], 0 }
  0x1b   :  { %36 = vsyncpa [#allocation5], 0 }
  0x1c   :  { %38 = vsyncpa [#allocation5 + $0x1], 0  ;;  %s7462_s5 = smov 0   ;;  %s7464_s26 = smov 0  }
  0x1d   :  { %s7466_s27 = smov 0   ;;  %s7468_s28 = smov 0  }
  0x1e LB: > { %s7307_s6 = smov [#allocation6]   ;;  %s7483_s29 = sadd.s32 4294967295, %s7305_s28   ;;  %s7305_s28 = sphi %s7468_s28, %s8816_s28   ;;  %s7301_s27 = sphi %s7466_s27, %s8815_s27   ;;  %s7297_s26 = sphi %s7464_s26, %s8814_s26   ;;  %s7293_s5 = sphi %s7462_s5, %s8813_s5  }
  0x1f   : > { %s596_s2 = sshll.u32 %s7307_s6, 4  ;;  %p5767_p0 = scmp.ge.s32.totalorder %s7305_s28, 1  ;;  %s7488_s2 = int_to_ptr.vmem [resolvable:$true] %s596_s2 }
  0x20   : > { %p8745_p1 = scmp.eq.s32.totalorder %s7483_s29, 0  ;;  %p584_p2 = scmp.lt.s32.totalorder %s7305_s28, 3 }
  0x21   : > { %s7308_s7 = smov [#allocation9]   ;;  %s7309_s25 = smov [#allocation12]  }
  0x22   : > { %p7490_p3 = pnand %p5767_p0, %p584_p2  ;;  %s629_s30 = sshll.u32 %s7308_s7, 4  ;;  %s7503_s30 = int_to_ptr.vmem [resolvable:$true] %s629_s30 }
  0x23   : > { %s667_s8 = sshll.u32 %s7309_s25, 4  ;;  %s8772_s6 = sld [smem:[#allocation26_spill]]  ;;  %s7505_s8 = int_to_ptr.vmem [resolvable:$true] %s667_s8 }
  0x24   : > { %s8770_s0 = scalar_select %p7490_p3, 1, 0 }
  0x25   : > { %p6562_p5 = pneg %p7490_p3 }
  0x27   : > { %p7499_p6 = pnand %p6562_p5, %p8745_p1 }
  0x29   : > { %s6969_s24 = scalar_lea.hbm %s8772_s6, 512  ;;  %p7515_p8 = pneg %p7499_p6 }
  0x2a   : > { %p6970_p7 = scmp.ne.s32.totalorder %s8772_s6, %s6969_s24  ;;  %p6976_p11 = scmp.lt.u32.totalorder %s6969_s24, %s8772_s6 }
  0x2c   : > { %p6972_p9 = pnand %p7515_p8, %p6970_p7 }
  0x2e   : > { %p6973_p10 = pneg %p6972_p9 }
  0x30   : > { %p6978_p12 = pnand %p6976_p11, %p6973_p10 }
  0x32   : > { %6981 = shalt.err (!%p6978_p12)
}
  0x33   : > { %s6982_s19 = scalar_lea.vmem %s7488_s2, 512  ;;  %p6990_p5 = scmp.lt.s32.totalorder %s7488_s2, %s7488_s2 }
  0x34   : > { %p6983_p13 = scmp.ne.s32.totalorder %s7488_s2, %s6982_s19  ;;  %p6991_p4 = scmp.lt.s32.totalorder %s6982_s19, %s6982_s19 }
  0x36   : > { %p6985_p0 = pnand %p6983_p13, %p7515_p8  ;;  %p6992_p7 = por %p6991_p4, %p6990_p5 }
  0x38   : > { %p6986_p2 = pneg %p6985_p0 }
  0x3a   : > { %p6993_p9 = pnand %p6992_p7, %p6986_p2 }
  0x3c   : > { %6996 = shalt.err (!%p6993_p9)
}
  0x3d   : > { %s8743_s21 = smov 128   ;;  %s8744_s23 = smov 8  }
  0x3e   : > { %6565 = dma.hbm_to_vmem [thread:$0]  (!%p7499_p6), %s8772_s6, 512, %s7488_s2, [#allocation7], %s8743_s21, %s8743_s21, %s8744_s23  }
  0x3f   : > { %s8774_s22 = sld [smem:[#allocation30_spill]] }
  0x45   : > { %s6997_s19 = scalar_lea.hbm %s8774_s22, 16 }
  0x46   : > { %p6998_p4 = scmp.ne.s32.totalorder %s8774_s22, %s6997_s19  ;;  %p7004_p12 = scmp.lt.u32.totalorder %s6997_s19, %s8774_s22 }
  0x48   : > { %p7000_p10 = pnand %p6998_p4, %p7515_p8 }
  0x4a   : > { %p7001_p11 = pneg %p7000_p10 }
  0x4c   : > { %p7006_p13 = pnand %p7004_p12, %p7001_p11 }
  0x4e   : > { %7009 = shalt.err (!%p7006_p13)
}
  0x4f   : > { %s7010_s2 = scalar_lea.vmem %s7503_s30, 16  ;;  %s7017_s13 = scalar_lea.vmem %s7503_s30, 32 }
  0x50   : > { %p7011_p0 = scmp.ne.s32.totalorder %s7503_s30, %s7010_s2  ;;  %p7018_p7 = scmp.lt.s32.totalorder %s7503_s30, %s7503_s30 }
  0x51   : > { %p7019_p9 = scmp.lt.s32.totalorder %s7017_s13, %s7010_s2 }
  0x52   : > { %p7013_p2 = pnand %p7011_p0, %p7515_p8 }
  0x53   : > { %p7020_p4 = por %p7019_p9, %p7018_p7 }
  0x54   : > { %p7014_p5 = pneg %p7013_p2 }
  0x56   : > { %p7021_p10 = pnand %p7020_p4, %p7014_p5 }
  0x58   : > { %7024 = shalt.err (!%p7021_p10)
}
  0x59   : > { %6571 = dma.hbm_to_vmem [thread:$0]  (!%p7499_p6), %s8774_s22, 16, %s7503_s30, [#allocation10]  }
  0x5a   : > { %s8775_s12 = sld [smem:[#allocation34_spill]] }
  0x60   : > { %s7025_s4 = scalar_lea.hbm %s8775_s12, 3072 }
  0x61   : > { %p7026_p11 = scmp.ne.s32.totalorder %s8775_s12, %s7025_s4  ;;  %p7032_p0 = scmp.lt.u32.totalorder %s7025_s4, %s8775_s12 }
  0x63   : > { %p7028_p12 = pnand %p7026_p11, %p7515_p8 }
  0x65   : > { %p7029_p13 = pneg %p7028_p12 }
  0x67   : > { %p7034_p2 = pnand %p7032_p0, %p7029_p13 }
  0x69   : > { %7037 = shalt.err (!%p7034_p2)
}
  0x6a   : > { %s7038_s30 = scalar_lea.vmem %s7505_s8, 3072  ;;  %p7046_p4 = scmp.lt.s32.totalorder %s7505_s8, %s7505_s8 }
  0x6b   : > { %p7039_p5 = scmp.ne.s32.totalorder %s7505_s8, %s7038_s30  ;;  %p7047_p10 = scmp.lt.s32.totalorder %s7038_s30, %s7038_s30 }
  0x6d   : > { %p7041_p7 = pnand %p7039_p5, %p7515_p8  ;;  %p7048_p11 = por %p7047_p10, %p7046_p4 }
  0x6f   : > { %p7042_p9 = pneg %p7041_p7 }
  0x71   : > { %p7049_p12 = pnand %p7048_p11, %p7042_p9 }
  0x73   : > { %7052 = shalt.err (!%p7049_p12)
}
  0x74   : > { %s7312_s13 = smov 192   ;;  %s7313_s15 = smov 12  }
  0x75   : > { %6577 = dma.hbm_to_vmem [thread:$0]  (!%p7499_p6), %s8775_s12, 3072, %s7505_s8, [#allocation13], %s7312_s13, %s7312_s13, %s7313_s15  }
  0x76   : > { %s7314_s24 = smov [#allocation15]   ;;  %s8776_s18 = sld [smem:[#allocation39_spill]] }
  0x77   : > { %s705_s4 = sshll.u32 %s7314_s24, 4  ;;  %s706_s4 = int_to_ptr.vmem [resolvable:$true] %s705_s4 }
  0x7c   : > { %s7053_s19 = scalar_lea.hbm %s8776_s18, 4096 }
  0x7d   : > { %p7054_p13 = scmp.ne.s32.totalorder %s8776_s18, %s7053_s19  ;;  %p7060_p5 = scmp.lt.u32.totalorder %s7053_s19, %s8776_s18 }
  0x7f   : > { %p7056_p0 = pnand %p7054_p13, %p7515_p8 }
  0x81   : > { %p7057_p2 = pneg %p7056_p0 }
  0x83   : > { %p7062_p7 = pnand %p7060_p5, %p7057_p2 }
  0x85   : > { %7065 = shalt.err (!%p7062_p7)
}
  0x86   : > { %s7066_s8 = scalar_lea.vmem %s706_s4, 4096  ;;  %p7074_p11 = scmp.lt.s32.totalorder %s706_s4, %s706_s4 }
  0x87   : > { %p7067_p9 = scmp.ne.s32.totalorder %s706_s4, %s7066_s8  ;;  %p7075_p12 = scmp.lt.s32.totalorder %s7066_s8, %s7066_s8 }
  0x89   : > { %p7069_p4 = pnand %p7067_p9, %p7515_p8  ;;  %p7076_p1 = por %p7075_p12, %p7074_p11 }
  0x8b   : > { %p7070_p10 = pneg %p7069_p4 }
  0x8d   : > { %p7077_p3 = pnand %p7076_p1, %p7070_p10 }
  0x8f   : > { %7080 = shalt.err (!%p7077_p3)
}
  0x90   : > { %s7315_s13 = smov 256   ;;  %s7316_s15 = smov 16  }
  0x91   : > { %6583 = dma.hbm_to_vmem [thread:$0]  (!%p7499_p6), %s8776_s18, 4096, %s706_s4, [#allocation16], %s7315_s13, %s7315_s13, %s7316_s15  }
  0x92   : > { %s7317_s16 = smov [#allocation8]   ;;  %s8777_s25 = sld [smem:[#allocation28_spill]] }
  0x93   : > { %s612_s17 = sshll.u32 %s7317_s16, 4  ;;  %s613_s17 = int_to_ptr.vmem [resolvable:$true] %s612_s17 }
  0x98   : > { %s7081_s19 = scalar_lea.hbm %s8777_s25, 1024 }
  0x99   : > { %p7082_p1 = scmp.ne.s32.totalorder %s8777_s25, %s7081_s19  ;;  %p7088_p0 = scmp.lt.u32.totalorder %s7081_s19, %s8777_s25 }
  0x9b   : > { %p7084_p3 = pnand %p7082_p1, %p7515_p8 }
  0x9d   : > { %p7085_p13 = pneg %p7084_p3 }
  0x9f   : > { %p7090_p2 = pnand %p7088_p0, %p7085_p13 }
  0xa1   : > { %7093 = shalt.err (!%p7090_p2)
}
  0xa2   : > { %s7094_s4 = scalar_lea.vmem %s613_s17, 1024  ;;  %p7102_p4 = scmp.lt.s32.totalorder %s613_s17, %s613_s17 }
  0xa3   : > { %p7095_p5 = scmp.ne.s32.totalorder %s613_s17, %s7094_s4  ;;  %p7103_p10 = scmp.lt.s32.totalorder %s7094_s4, %s7094_s4 }
  0xa5   : > { %p7097_p7 = pnand %p7095_p5, %p7515_p8  ;;  %p7104_p11 = por %p7103_p10, %p7102_p4 }
  0xa7   : > { %p7098_p9 = pneg %p7097_p7 }
  0xa9   : > { %p7105_p12 = pnand %p7104_p11, %p7098_p9 }
  0xab   : > { %7108 = shalt.err (!%p7105_p12)
}
  0xac   : > { %s7318_s13 = smov 64   ;;  %s7319_s15 = smov 4  }
  0xad   : > { %6568 = dma.hbm_to_vmem [thread:$0]  (!%p7499_p6), %s8777_s25, 1024, %s613_s17, [#allocation7], %s7318_s13, %s7318_s13, %s7319_s15  }
  0xae   : > { %s7320_s23 = smov [#allocation11]   ;;  %s7321_s24 = smov [#allocation14]  }
  0xaf   : > { %s645_s16 = sshll.u32 %s7320_s23, 4  ;;  %s683_s1 = sshll.u32 %s7321_s24, 4  ;;  %s646_s16 = int_to_ptr.vmem [resolvable:$true] %s645_s16  ;;  %s684_s1 = int_to_ptr.vmem [resolvable:$true] %s683_s1 }
  0xb0   : > { %s8778_s30 = sld [smem:[#allocation33_spill]] }
  0xb6   : > { %s7109_s8 = scalar_lea.hbm %s8778_s30, 1024 }
  0xb7   : > { %p7110_p1 = scmp.ne.s32.totalorder %s8778_s30, %s7109_s8  ;;  %p7116_p0 = scmp.lt.u32.totalorder %s7109_s8, %s8778_s30 }
  0xb9   : > { %p7112_p3 = pnand %p7110_p1, %p7515_p8 }
  0xbb   : > { %p7113_p13 = pneg %p7112_p3 }
  0xbd   : > { %p7118_p2 = pnand %p7116_p0, %p7113_p13 }
  0xbf   : > { %7121 = shalt.err (!%p7118_p2)
}
  0xc0   : > { %s7122_s17 = scalar_lea.vmem %s646_s16, 1024  ;;  %p7130_p4 = scmp.lt.s32.totalorder %s646_s16, %s646_s16 }
  0xc1   : > { %p7123_p5 = scmp.ne.s32.totalorder %s646_s16, %s7122_s17  ;;  %p7131_p10 = scmp.lt.s32.totalorder %s7122_s17, %s7122_s17 }
  0xc3   : > { %p7125_p7 = pnand %p7123_p5, %p7515_p8  ;;  %p7132_p11 = por %p7131_p10, %p7130_p4 }
  0xc5   : > { %p7126_p9 = pneg %p7125_p7 }
  0xc7   : > { %p7133_p12 = pnand %p7132_p11, %p7126_p9 }
  0xc9   : > { %7136 = shalt.err (!%p7133_p12)
}
  0xca   : > { %6574 = dma.hbm_to_vmem [thread:$0]  (!%p7499_p6), %s8778_s30, 1024, %s646_s16, [#allocation10], %s7318_s13, %s7318_s13, %s7319_s15  }
  0xcb   : > { %s7137_s21 = scalar_lea.hbm %s8724_s14, 1024 }
  0xcc   : > { %p7138_p1 = scmp.ne.s32.totalorder %s8724_s14, %s7137_s21  ;;  %p7144_p0 = scmp.lt.u32.totalorder %s7137_s21, %s8724_s14 }
  0xce   : > { %p7140_p3 = pnand %p7138_p1, %p7515_p8 }
  0xd0   : > { %p7141_p13 = pneg %p7140_p3 }
  0xd2   : > { %p7146_p2 = pnand %p7144_p0, %p7141_p13 }
  0xd4   : > { %7149 = shalt.err (!%p7146_p2)
}
  0xd5   : > { %s7150_s8 = scalar_lea.vmem %s684_s1, 1024  ;;  %p7158_p4 = scmp.lt.s32.totalorder %s684_s1, %s684_s1 }
  0xd6   : > { %p7151_p5 = scmp.ne.s32.totalorder %s684_s1, %s7150_s8  ;;  %p7159_p10 = scmp.lt.s32.totalorder %s7150_s8, %s7150_s8 }
  0xd8   : > { %p7153_p7 = pnand %p7151_p5, %p7515_p8  ;;  %p7160_p11 = por %p7159_p10, %p7158_p4 }
  0xda   : > { %p7154_p9 = pneg %p7153_p7 }
  0xdc   : > { %p7161_p12 = pnand %p7160_p11, %p7154_p9 }
  0xde   : > { %7164 = shalt.err (!%p7161_p12)
}
  0xdf   : > { %6580 = dma.hbm_to_vmem [thread:$0]  (!%p7499_p6), %s8724_s14, 1024, %s684_s1, [#allocation13], %s7318_s13, %s7318_s13, %s7319_s15  }
  0xe0   : > { %s7322_s17 = smov [#allocation17]   ;;  %s7165_s6 = scalar_lea.hbm %s8730_s20, 4096 }
  0xe1   : > { %s721_s12 = sshll.u32 %s7322_s17, 4  ;;  %p7166_p1 = scmp.ne.s32.totalorder %s8730_s20, %s7165_s6  ;;  %s722_s12 = int_to_ptr.vmem [resolvable:$true] %s721_s12 }
  0xe2   : > { %p7172_p0 = scmp.lt.u32.totalorder %s7165_s6, %s8730_s20 }
  0xe3   : > { %p7168_p3 = pnand %p7166_p1, %p7515_p8 }
  0xe5   : > { %p7169_p13 = pneg %p7168_p3 }
  0xe7   : > { %p7174_p2 = pnand %p7172_p0, %p7169_p13 }
  0xe9   : > { %7177 = shalt.err (!%p7174_p2)
}
  0xea   : > { %s7178_s1 = scalar_lea.vmem %s722_s12, 4096  ;;  %p7186_p4 = scmp.lt.s32.totalorder %s722_s12, %s722_s12 }
  0xeb   : > { %p7179_p5 = scmp.ne.s32.totalorder %s722_s12, %s7178_s1  ;;  %p7187_p10 = scmp.lt.s32.totalorder %s7178_s1, %s7178_s1 }
  0xed   : > { %p7181_p7 = pnand %p7179_p5, %p7515_p8  ;;  %p7188_p11 = por %p7187_p10, %p7186_p4 }
  0xef   : > { %p7182_p9 = pneg %p7181_p7 }
  0xf1   : > { %p7189_p12 = pnand %p7188_p11, %p7182_p9 }
  0xf3   : > { %7192 = shalt.err (!%p7189_p12)
}
  0xf4   : > { %6586 = dma.hbm_to_vmem [thread:$0]  (!%p7499_p6), %s8730_s20, 4096, %s722_s12, [#allocation16], %s7318_s13, %s7318_s13, %s7319_s15  }
  0xf5   : > { %s5766_s3 = sadd.s32 4294967294, %s7305_s28   ;;  %s7690_s7 = sadd.s32 1, %s7305_s28  }
  0xf6   : > { %s48_s16 = ssub.s32 %s7305_s28, %s7690_s7  ;;  %s51_s4 = sadd.s32 1, %s7301_s27 }
  0xf7   : > { %p49_p8 = scmp.eq.s32.totalorder %s48_s16, 0  ;;  %p58_p1 = scmp.ne.s32.totalorder %s7301_s27, %s7297_s26 }
  0xf8   : > { %p59_p3 = scmp.eq.s32.totalorder %s7305_s28, 0  ;;  %p64_p13 = scmp.ne.s32.totalorder %s7297_s26, %s7293_s5 }
  0xf9   : > { %s7701_s17 = scalar_select %p49_p8, %s7301_s27, %s51_s4  }
  0xfa   : > { %p7703_p0 = por %p59_p3, %p58_p1  ;;  %p8780_p2 = scmp.eq.s32.totalorder %s7483_s29, 0 }
  0xfb   : > { %p571_p5 = scmp.eq.s32.totalorder %s7483_s29, 1  ;;  %p577_p7 = scmp.eq.s32.totalorder %s5766_s3, 1 }
  0xfc   : > { %p7709_p6 = por %p8780_p2, %p64_p13  ;;  %p6603_p9 = scmp.lt.s32.totalorder %s7305_s28, 2 }
  0xfd   : > { %s744_s15 = sand.u32 1, %s7301_s27   ;;  %p7716_p4 = por %p571_p5, %p58_p1 }
  0xfe   : > { %p7720_p10 = por %p577_p7, %p64_p13  ;;  %s5777_s6 = sshll.u32 %s744_s15, 5 }
  0xff   : > { %s8782_s12 = scalar_select %p7716_p4, 1, 0 }
 0x100   : > { %s8783_s22 = scalar_select %p7720_p10, 1, 0 }
 0x101   : > { %s5994_s21 = sshll.u32 %s7305_s28, 9  ;;  %s8784_s19 = sld [smem:[#allocation25_spill]] }
 0x102   : > { %s748_s2 = scalar_lea.vmem [#allocation3], %s5777_s6  ;;  %p7734_p11 = pnand %p6603_p9, %p7703_p0 }
 0x103   : > { %s755_s8 = sshll.u32 %s748_s2, 4  ;;  %s7738_s16 = scalar_lea.sflag [#allocation4], %s744_s15  ;;  %s7730_s8 = int_to_ptr.vmem [resolvable:$true] %s755_s8 }
 0x104   : > { %p7195_p8 = pneg %p7734_p11 }
 0x107   : > { %s7728_s1 = scalar_lea.hbm %s8784_s19, %s5994_s21  ;;  %s7198_s18 = scalar_lea.hbm %s8784_s19, 1024 }
 0x108   : > { %s7193_s4 = scalar_lea.hbm %s7728_s1, 512  ;;  %p7199_p13 = scmp.lt.u32.totalorder %s7728_s1, %s8784_s19 }
 0x109   : > { %p7194_p12 = scmp.ne.s32.totalorder %s7728_s1, %s7193_s4  ;;  %p7200_p0 = scmp.lt.u32.totalorder %s7198_s18, %s7193_s4 }
 0x10a   : > { %p7202_p5 = scmp.lt.u32.totalorder %s7193_s4, %s7728_s1 }
 0x10b   : > { %p7196_p1 = pnand %p7195_p8, %p7194_p12  ;;  %p7201_p2 = por %p7200_p0, %p7199_p13 }
 0x10d   : > { %p7197_p3 = pneg %p7196_p1  ;;  %p7203_p7 = por %p7202_p5, %p7201_p2 }
 0x10f   : > { %p7204_p9 = pnand %p7203_p7, %p7197_p3 }
 0x111   : > { %7207 = shalt.err (!%p7204_p9)
}
 0x112   : > { %s7208_s15 = scalar_lea.vmem %s7730_s8, 512  ;;  %s7323_s2 = smov [#allocation3]  }
 0x113   : > { %p7209_p12 = scmp.ne.s32.totalorder %s7730_s8, %s7208_s15  ;;  %s7213_s6 = sshll.u32 %s7323_s2, 4  ;;  %s7214_s6 = int_to_ptr.vmem [resolvable:$false] %s7213_s6 }
 0x114   : > { %s7215_s21 = scalar_lea.vmem %s7214_s6, 1024  ;;  %p7216_p4 = scmp.lt.s32.totalorder %s7730_s8, %s7214_s6 }
 0x115   : > { %p7211_p1 = pnand %p7209_p12, %p7195_p8  ;;  %p7217_p13 = scmp.lt.s32.totalorder %s7215_s21, %s7208_s15 }
 0x117   : > { %p7212_p10 = pneg %p7211_p1  ;;  %p7218_p0 = por %p7217_p13, %p7216_p4 }
 0x119   : > { %p7219_p2 = pnand %p7218_p0, %p7212_p10 }
 0x11b   : > { %7222 = shalt.err (!%p7219_p2)
}
 0x11c   : > { %s8786_s4 = smov 8   ;;  %s8787_s18 = smov 128  }
 0x11d   : > { %6590 = dma.hbm_to_vmem [thread:$0]  (!%p7734_p11), %s7728_s1, 512, %s7730_s8, %s7738_s16, %s8787_s18, %s8787_s18, %s8786_s4  }
 0x11e   : > { %p8788_p8 = scmp.ne.s32.totalorder %s8770_s0, 0 }
 0x11f   : > { %s7772_s23 = sand.u32 (!%p8788_p8), 1, %s7297_s26  }
 0x120   : > { %767 = sbr.rel (%p8788_p8) target bundleno = 11303 (0x2c27), region = 116  ;;  %s5781_s24 = sshll.u32 (!%p8788_p8), %s7772_s23, 5 }
 0x121   : > { %s770_s15 = scalar_lea.sflag (!%p8788_p8), [#allocation4], %s7772_s23  ;;  %s773_s3 = scalar_lea.vmem (!%p8788_p8), [#allocation3], %s5781_s24 }
 0x127   : > { %7268 = dma.done.wait (%p7709_p6), %s770_s15, 512  }
 0x128   : > { %7270 = vsyncadd (%p7709_p6), %s770_s15, 4294966784  ;;  %p8789_p4 = scmp.eq.s32.totalorder %s7483_s29, 0 }
 0x12a   : > { %7272 = dma.done.wait (%p8789_p4), [#allocation7], 1536   ;;  %p8790_p10 = pmov %p8789_p4 }
 0x12b   : > { %p8791_p11 = pmov %p8789_p4 }
 0x12c   : > { %7274 = vsyncadd (%p8790_p10), [#allocation7], 4294965760 }
 0x12d   : > { %7276 = dma.done.wait (%p8791_p11), [#allocation10], 1040   ;;  %p8792_p3 = pmov %p8789_p4 }
 0x12f   : > { %7278 = vsyncadd (%p8792_p3), [#allocation10], 4294966256  ;;  %p8793_p5 = pmov %p8792_p3 }
 0x130   : > { %p8794_p7 = pmov %p8792_p3 }
 0x131   : > { %7280 = dma.done.wait (%p8793_p5), [#allocation13], 4096  }
 0x132   : > { %7282 = vsyncadd (%p8794_p7), [#allocation13], 4294963200  ;;  %p8795_p6 = pmov %p8792_p3 }
 0x133   : > { %p8796_p9 = pmov %p8792_p3 }
 0x134   : > { %7284 = dma.done.wait (%p8795_p6), [#allocation16], 8192  }
 0x135   : > { %7286 = vsyncadd (%p8796_p9), [#allocation16], 4294959104  ;;  %v873_v0 = vld [vmem:[%s773_s3] sm:$0xff]  ;;  %v874_v2 = vld [vmem:[%s773_s3 + $0x8] sm:$0xff]  ;;  %v885_v36 = vlaneseq  ;;  %s8797_s1 = sld [smem:[#allocation31_spill]]  ;;  %s8798_s2 = sld [smem:[#allocation27_spill]] }
 0x136   : > { %v877_v1 = vld [vmem:[#allocation6] sm:$0xff]  ;;  %v878_v4 = vld [vmem:[#allocation6 + $0x8] sm:$0xff]  ;;  %v876_v5 = vld [vmem:[%s773_s3 + $0x18] sm:$0xff]  ;;  %s8799_s16 = sld [smem:[#allocation29_spill]]  ;;  %s8800_s0 = sld [smem:[#allocation32_spill]]  ;;  %vm7326_vm12 = vmmov 0  }
 0x137   : > { %v7798_v3 = vadd.f32 %v877_v1, %v873_v0  ;;  %v880_v6 = vld [vmem:[#allocation6 + $0x18] sm:$0xff]  ;;  %v7800_v7 = vadd.f32 %v878_v4, %v874_v2  ;;  %v875_v8 = vld [vmem:[%s773_s3 + $0x10] sm:$0xff]  ;;  %v6673_v28 = vld [vmem:[#allocation8] sm:$0xff]   ;;  %v7830_v40 = vshrl.u32 %v885_v36, 7  ;;  %s8801_s8 = sld [smem:[#allocation37_spill]]  ;;  %s8802_s21 = sld [smem:[#allocation38_spill]] }
 0x138   : > { %v879_v9 = vld [vmem:[#allocation6 + $0x10] sm:$0xff]  ;;  %v7803_v10 = vadd.f32 %v880_v6, %v876_v5  ;;  %6178 = vmatprep.subr.bf16.mxu0 %v6673_v28  ;;  %v6674_v29 = vld [vmem:[#allocation8 + $0x8] sm:$0xff]   ;;  %v6676_v31 = vld [vmem:[#allocation8 + $0x18] sm:$0xff]   ;;  %s8803_s15 = sld [smem:[#allocation35_spill]]  ;;  %vm2042_vm13 = vcmask 130048   ;;  %s7327_s3 = smov 112  }
 0x139   : > { %1036 = vadd.xlane.f32.xlu0 %v7798_v3  ;;  %1038 = vadd.xlane.f32.xlu1 %v7800_v7  ;;  %v7806_v11 = vadd.f32 %v879_v9, %v875_v8  ;;  %v6675_v30 = vld [vmem:[#allocation8 + $0x10] sm:$0xff]   ;;  %v6677_v32 = vld [vmem:[#allocation8 + $0x20] sm:$0xff]   ;;  %v6678_v33 = vld [vmem:[#allocation8 + $0x28] sm:$0xff]   ;;  %v894_v45 = vand.u32 15, %v7830_v40  ;;  %v887_v48 = vadd.s32 8, %v7830_v40  ;;  %v889_v49 = vadd.s32 24, %v7830_v40 }
 0x13a   : > { %6179 = vmatpush3.bf16.msra.mxu0 %v6673_v28  ;;  %v6679_v34 = vld [vmem:[#allocation8 + $0x30] sm:$0xff]   ;;  %v6680_v35 = vld [vmem:[#allocation8 + $0x38] sm:$0xff]   ;;  %v888_v51 = vadd.s32 16, %v7830_v40  ;;  %v5799_v60 = vld [vmem:[#allocation9] ss:$0 sm:$0xff]  ;;  %v7324_v8 = vmov 0.0  }
 0x13b   : > { %6180 = vmatprep.subr.bf16.mxu0 %v6674_v29  ;;  %v938_v53 = vadd.s32 4294967294, %v894_v45  ;;  %v901_v55 = vand.u32 15, %v887_v48  ;;  %v915_v56 = vand.u32 15, %v889_v49  ;;  %v962_v57 = vadd.s32 4294967295, %v894_v45  ;;  %v5800_v4 = vld [vmem:[%s8797_s1] ss:$0 sm:$0xff] }
 0x13c   : > { %v908_v58 = vand.u32 15, %v888_v51  ;;  %vm1117_vm2 = vcmp.lt.s32.totalorder %v7830_v40, 2  ;;  %vm1145_vm8 = vcmp.lt.s32.totalorder %v7830_v40, 1  ;;  %vm1174_vm9 = vcmp.lt.s32.totalorder %v7830_v40, 7  ;;  %v5805_v48 = vld [vmem:[%s8798_s2 + $0x1] ss:$0 sm:$0xff] }
 0x13d   : > { %1042 = vadd.xlane.f32.xlu0 %v7803_v10  ;;  %1040 = vadd.xlane.f32.xlu1 %v7806_v11  ;;  %vm942_vm0 = vcmp.ge.s32.totalorder %v938_v53, 0  ;;  %v987_v61 = vadd.s32 1, %v901_v55  ;;  %v1011_v62 = vadd.s32 2, %v901_v55  ;;  %v989_v63 = vadd.s32 1, %v915_v56  ;;  %s7328_s13 = smov 96   ;;  %s7329_s1 = smov 80  }
 0x13e   : > { %6181 = vmatpush3.bf16.msra.mxu0 %v6674_v29  ;;  %vm966_vm1 = vcmp.ge.s32.totalorder %v962_v57, 0  ;;  %v940_v1 = vadd.s32 4294967294, %v908_v58  ;;  %v1013_v2 = vadd.s32 2, %v915_v56  ;;  %v964_v5 = vadd.s32 4294967295, %v908_v58  ;;  %s7332_s6 = smov 32   ;;  %s8807_s18 = sld [smem:[#allocation40_spill]] }
 0x13f   : > { %6182 = vmatprep.subr.bf16.mxu0 %v6675_v30  ;;  %v7841_v9 = vsel %vm942_vm0, 1.0, %v7324_v8  ;;  %vm995_vm3 = vcmp.lt.s32.totalorder %v987_v61, 16  ;;  %vm1019_vm4 = vcmp.lt.s32.totalorder %v1011_v62, 16  ;;  %vm997_vm5 = vcmp.lt.s32.totalorder %v989_v63, 16  ;;  %p8810_p1 = scmp.ne.s32.totalorder %s8782_s12, 0 }
 0x140   : > { %vm944_vm6 = vcmp.ge.s32.totalorder %v940_v1, 0  ;;  %vm1021_vm7 = vcmp.lt.s32.totalorder %v1013_v2, 16  ;;  %vm968_vm10 = vcmp.ge.s32.totalorder %v964_v5, 0  ;;  %vm1203_vm11 = vcmp.lt.s32.totalorder %v7830_v40, 6 }
 0x142   : > { %6183 = vmatpush3.bf16.msra.mxu0 %v6675_v30 }
 0x143   : > { %6184 = vmatprep.subr.bf16.mxu0 %v6676_v31 }
 0x146   : > { %6185 = vmatpush3.bf16.msra.mxu0 %v6676_v31  ;;  %v7881_v31 = vsel %vm968_vm10, 1.0, %v7324_v8 }
 0x147   : > { %6186 = vmatprep.subr.bf16.mxu0 %v6677_v32 }
 0x14a   : > { %6187 = vmatpush3.bf16.msra.mxu0 %v6677_v32 }
 0x14b   : > { %6188 = vmatprep.subr.bf16.mxu0 %v6678_v33 }
 0x14e   : > { %6189 = vmatpush3.bf16.msra.mxu0 %v6678_v33 }
 0x14f   : > { %6190 = vmatprep.subr.bf16.mxu0 %v6679_v34 }
 0x152   : > { %6191 = vmatpush3.bf16.msra.mxu0 %v6679_v34 }
 0x153   : > { %6192 = vmatprep.subr.bf16.mxu0 %v6680_v35 }
 0x156   : > { %6193 = vmatpush3.bf16.msra.mxu0 %v6680_v35 }
 0x1c6   : > { %v1037_v12 = vpop.xlane.xlu0 %1036  ;;  %v1039_v14 = vpop.xlane.xlu1 %1038 }
 0x1c7   : > { %v1045_v13 = vmul.f32 0.0078125, %v1037_v12  ;;  %v1046_v15 = vmul.f32 0.0078125, %v1039_v14 }
 0x1c9   : > { %v7811_v16 = vsub.f32 %v7798_v3, %v1045_v13  ;;  %v7814_v18 = vsub.f32 %v7800_v7, %v1046_v15  ;;  %v7845_v13 = vsel %vm966_vm1, 1.0, %v7324_v8 }
 0x1ca   : > { %v1043_v17 = vpop.xlane.xlu0 %1042  ;;  %v1041_v21 = vpop.xlane.xlu1 %1040 }
 0x1cb   : > { %v1048_v19 = vmul.f32 0.0078125, %v1043_v17  ;;  %v1053_v20 = vmul.f32 %v7811_v16, %v7811_v16  ;;  %v1047_v22 = vmul.f32 0.0078125, %v1041_v21  ;;  %v1054_v23 = vmul.f32 %v7814_v18, %v7814_v18 }
 0x1cc   : > { %v7859_v21 = vsel %vm995_vm3, 1.0, %v7324_v8 }
 0x1cd   : > { %1057 = vadd.xlane.f32.xlu0 %v1053_v20  ;;  %v7821_v24 = vsub.f32 %v7803_v10, %v1048_v19  ;;  %v7824_v25 = vsub.f32 %v7806_v11, %v1047_v22  ;;  %v7854_v19 = vld [vmem:[%s8798_s2 + $0x2] ss:$0 sm:$0xff]  ;;  %v7862_v22 = vsel %vm1019_vm4, 1.0, %v7324_v8 }
 0x1cf   : > { %v1056_v26 = vmul.f32 %v7821_v24, %v7821_v24  ;;  %v1055_v27 = vmul.f32 %v7824_v25, %v7824_v25 }
 0x1d1   : > { %1059 = vadd.xlane.f32.xlu0 %v1054_v23  ;;  %1063 = vadd.xlane.f32.xlu1 %v1056_v26  ;;  %v7870_v26 = vsel %vm997_vm5, 1.0, %v7324_v8 }
 0x1d5   : > { %1061 = vadd.xlane.f32.xlu1 %v1055_v27  ;;  %v7873_v27 = vsel %vm1021_vm7, 1.0, %v7324_v8 }
 0x25a   : > { %v1058_v37 = vpop.xlane.xlu0 %1057 }
 0x25b   : > { %v1065_v38 = vmul.f32 0.0078125, %v1058_v37 }
 0x25d   : > { %v1069_v39 = vadd.f32 1e-06, %v1065_v38 }
 0x25e   : > { %v1064_v41 = vpop.xlane.xlu1 %1063  ;;  %v1060_v42 = vpop.xlane.xlu0 %1059 }
 0x25f   : > { %6809 = vrsqrt.f32 %v1069_v39  ;;  %v1068_v43 = vmul.f32 0.0078125, %v1064_v41  ;;  %v1066_v44 = vmul.f32 0.0078125, %v1060_v42  ;;  %v5803_v41 = vld [vmem:[%s8798_s2] ss:$0 sm:$0xff] }
 0x261   : > { %v1072_v46 = vadd.f32 1e-06, %v1068_v43  ;;  %v1070_v47 = vadd.f32 1e-06, %v1066_v44 }
 0x262   : > { %v1062_v50 = vpop.xlane.xlu1 %1061 }
 0x263   : > { %6811 = vrsqrt.f32 %v1072_v46  ;;  %v1067_v52 = vmul.f32 0.0078125, %v1062_v50 }
 0x264   : > { %6813 = vrsqrt.f32 %v1070_v47 }
 0x265   : > { %v1071_v54 = vadd.f32 1e-06, %v1067_v52 }
 0x267   : > { %6815 = vrsqrt.f32 %v1071_v54  ;;  %v5807_v54 = vld [vmem:[%s8798_s2 + $0x3] ss:$0 sm:$0xff] }
 0x269   : > { %v6810_v59 = vpop.eup %6809 }
 0x26a   : > { %v1077_v0 = vmul.f32 %v6810_v59, %v7811_v16  ;;  %v5809_v59 = vld [vmem:[%s8798_s2 + $0x4] ss:$0 sm:$0xff] }
 0x26c   : > { %v1087_v6 = vmul.f32 %v5799_v60, %v1077_v0 }
 0x26d   : > { %v6812_v12 = vpop.eup %6811 }
 0x26e   : > { %v6814_v14 = vpop.eup %6813  ;;  %v7847_v15 = vadd.f32 %v5800_v4, %v1087_v6  ;;  %v1080_v16 = vmul.f32 %v6812_v12, %v7821_v24  ;;  %v7866_v24 = vsel %vm944_vm6, 1.0, %v7324_v8 }
 0x26f   : > { %v1078_v17 = vmul.f32 %v6814_v14, %v7814_v18 }
 0x270   : > { %v1090_v20 = vmul.f32 %v5799_v60, %v1080_v16  ;;  %v1109_v30 = vmul.f32 %v7854_v19, %v7847_v15  ;;  %v1113_v33 = vrot.slane %v7847_v15, 6  ;;  %v1141_v34 = vrot.slane %v7847_v15, 7 }
 0x271   : > { %v6816_v18 = vpop.eup %6815  ;;  %v1088_v23 = vmul.f32 %v5799_v60, %v1078_v17  ;;  %v1170_v35 = vrot.slane %v7847_v15, 1 }
 0x272   : > { %v7875_v28 = vadd.f32 %v5800_v4, %v1090_v20  ;;  %v1079_v29 = vmul.f32 %v6816_v18, %v7824_v25  ;;  %v1199_v25 = vrot.slane %v7847_v15, 2 }
 0x273   : > { %v1098_v32 = vadd.f32 %v5800_v4, %v1088_v23 }
 0x274   : > { %v1089_v36 = vmul.f32 %v5799_v60, %v1079_v29  ;;  %v1116_v37 = vrot.slane %v7875_v28, 6  ;;  %v1144_v38 = vrot.slane %v7875_v28, 7  ;;  %v1112_v44 = vmul.f32 %v7854_v19, %v7875_v28 }
 0x275   : > { %v1114_v39 = vrot.slane %v1098_v32, 6  ;;  %v1142_v42 = vrot.slane %v1098_v32, 7  ;;  %v1171_v43 = vrot.slane %v1098_v32, 1  ;;  %v1200_v49 = vrot.slane %v1098_v32, 2 }
 0x276   : > { %v7894_v45 = vadd.f32 %v5800_v4, %v1089_v36  ;;  %v1121_v46 = vsel %vm1117_vm2, %v1116_v37, %v1113_v33  ;;  %v1149_v47 = vsel %vm1145_vm8, %v1144_v38, %v1141_v34  ;;  %v1110_v55 = vmul.f32 %v7854_v19, %v1098_v32 }
 0x277   : > { %v1120_v50 = vsel %vm1117_vm2, %v1113_v33, %v1114_v39  ;;  %v1122_v51 = vmul.f32 %v7841_v9, %v1121_v46  ;;  %v1148_v52 = vsel %vm1145_vm8, %v1141_v34, %v1142_v42  ;;  %v1150_v53 = vmul.f32 %v7845_v13, %v1149_v47 }
 0x278   : > { %v1134_v56 = vmul.f32 %v5803_v41, %v1120_v50  ;;  %v1172_v57 = vrot.slane %v7894_v45, 1  ;;  %v1177_v58 = vsel %vm1174_vm9, %v1170_v35, %v1171_v43  ;;  %v1163_v62 = vmul.f32 %v5805_v48, %v1148_v52 }
 0x279   : > { %v1133_v60 = vmul.f32 %v5803_v41, %v1122_v51  ;;  %v1162_v61 = vmul.f32 %v5805_v48, %v1150_v53  ;;  %v1201_v63 = vrot.slane %v7894_v45, 2  ;;  %v1191_v2 = vmul.f32 %v5807_v54, %v1177_v58 }
 0x27a   : > { %v1138_v0 = vadd.f32 %v1134_v56, %v1110_v55  ;;  %v1176_v1 = vsel %vm1174_vm9, %v1171_v43, %v1172_v57  ;;  %v1206_v4 = vsel %vm1203_vm11, %v1199_v25, %v1200_v49  ;;  %v1115_v20 = vrot.slane %v7894_v45, 6 }
 0x27b   : > { %v1137_v5 = vadd.f32 %v1133_v60, %v1109_v30  ;;  %v1180_v6 = vmul.f32 %v7859_v21, %v1176_v1  ;;  %v1205_v12 = vsel %vm1203_vm11, %v1200_v49, %v1201_v63  ;;  %v1220_v14 = vmul.f32 %v5809_v59, %v1206_v4 }
 0x27c   : > { %v1167_v16 = vadd.f32 %v1163_v62, %v1138_v0  ;;  %v1209_v17 = vmul.f32 %v7862_v22, %v1205_v12  ;;  %v1143_v18 = vrot.slane %v7894_v45, 7  ;;  %v1173_v32 = vrot.slane %v7875_v28, 1 }
 0x27d   : > { %v1166_v23 = vadd.f32 %v1162_v61, %v1137_v5  ;;  %v1192_v29 = vmul.f32 %v5807_v54, %v1180_v6  ;;  %v1202_v33 = vrot.slane %v7875_v28, 2  ;;  %v1118_v34 = vsel %vm1117_vm2, %v1115_v20, %v1116_v37 }
 0x27e   : > { %v1221_v30 = vmul.f32 %v5809_v59, %v1209_v17  ;;  %v1119_v36 = vsel %vm1117_vm2, %v1114_v39, %v1115_v20  ;;  %v1146_v43 = vsel %vm1145_vm8, %v1143_v18, %v1144_v38  ;;  %v1136_v50 = vmul.f32 %v5803_v41, %v1118_v34 }
 0x27f   : > { %v1195_v46 = vadd.f32 %v1191_v2, %v1166_v23  ;;  %v1196_v47 = vadd.f32 %v1192_v29, %v1167_v16  ;;  %v1124_v49 = vmul.f32 %v7866_v24, %v1119_v36  ;;  %v1111_v51 = vmul.f32 %v7854_v19, %v7894_v45 }
 0x280   : > { %v1147_v28 = vsel %vm1145_vm8, %v1142_v42, %v1143_v18  ;;  %v1165_v52 = vmul.f32 %v5805_v48, %v1146_v43  ;;  %v1178_v37 = vsel %vm1174_vm9, %v1173_v32, %v1170_v35  ;;  %v1140_v56 = vadd.f32 %v1136_v50, %v1112_v44 }
 0x281   : > { %v1224_v53 = vadd.f32 %v1220_v14, %v1195_v46  ;;  %v1225_v39 = vadd.f32 %v1221_v30, %v1196_v47  ;;  %v1135_v55 = vmul.f32 %v5803_v41, %v1124_v49  ;;  %v1152_v38 = vmul.f32 %v7881_v31, %v1147_v28 }
 0x282   : > { %v1175_v58 = vsel %vm1174_vm9, %v1172_v57, %v1173_v32  ;;  %v1182_v60 = vmul.f32 %v7870_v26, %v1178_v37  ;;  %v1169_v45 = vadd.f32 %v1165_v52, %v1140_v56  ;;  %v1207_v42 = vsel %vm1203_vm11, %v1202_v33, %v1199_v25  ;;  %v5810_v25 = vld [vmem:[%s8799_s16] ss:$0 sm:$0xff]  ;;  %v6681_v56 = vld [vmem:[#allocation11] sm:$0xff]   ;;  %s7331_s16 = smov 48  }
 0x283   : > { %v1244_v61 = vpack.c.bf16 %v1225_v39, %v1224_v53  ;;  %v1139_v19 = vadd.f32 %v1135_v55, %v1111_v51  ;;  %v1164_v35 = vmul.f32 %v5805_v48, %v1152_v38  ;;  %v1211_v41 = vmul.f32 %v7873_v27, %v1207_v42  ;;  %6198 = vmatprep.subr.bf16.mxu1 %v6681_v56  ;;  %v6682_v38 = vld [vmem:[#allocation11 + $0x8] sm:$0xff]   ;;  %v6688_v42 = vld [vmem:[#allocation11 + $0x38] sm:$0xff]  }
 0x284   : > { %v1194_v62 = vmul.f32 %v5807_v54, %v1182_v60  ;;  %v1204_v44 = vsel %vm1203_vm11, %v1201_v63, %v1202_v33  ;;  %v1193_v57 = vmul.f32 %v5807_v54, %v1175_v58  ;;  %6199 = vmatpush3.bf16.msra.mxu1 %v6681_v56  ;;  %v6683_v58 = vld [vmem:[#allocation11 + $0x10] sm:$0xff]   ;;  %v6684_v60 = vld [vmem:[#allocation11 + $0x18] sm:$0xff]  }
 0x285   : > { %6194 = vmatprep.mubr.bf16.mxu0 %v1244_v61  ;;  %v1168_v0 = vadd.f32 %v1164_v35, %v1139_v19  ;;  %v1222_v4 = vmul.f32 %v5809_v59, %v1204_v44  ;;  %v1223_v5 = vmul.f32 %v5809_v59, %v1211_v41  ;;  %6200 = vmatprep.subr.bf16.mxu1 %v6682_v38  ;;  %v6685_v61 = vld [vmem:[#allocation11 + $0x20] sm:$0xff]   ;;  %v6686_v19 = vld [vmem:[#allocation11 + $0x28] sm:$0xff]  }
 0x286   : > { %v1198_v1 = vadd.f32 %v1194_v62, %v1169_v45  ;;  %v6687_v45 = vld [vmem:[#allocation11 + $0x30] sm:$0xff]  }
 0x287   : > { %v1197_v2 = vadd.f32 %v1193_v57, %v1168_v0 }
 0x288   : > { %v1227_v12 = vadd.f32 %v1223_v5, %v1198_v1  ;;  %6201 = vmatpush3.bf16.msra.mxu1 %v6682_v38 }
 0x289   : > { %v1226_v6 = vadd.f32 %v1222_v4, %v1197_v2  ;;  %6202 = vmatprep.subr.bf16.mxu1 %v6683_v58 }
 0x28b   : > { %v1245_v15 = vpack.c.bf16 %v1227_v12, %v1226_v6 }
 0x28c   : > { %6203 = vmatpush3.bf16.msra.mxu1 %v6683_v58  ;;  %v5825_v58 = vld [vmem:[%s8800_s0 + $0x1] ss:$0 sm:$0xff] }
 0x28d   : > { %6195 = vmatmul.mubr.bf16.vlgmr.msra.gmra.mrb[0].mxu0 %v1245_v15  ;;  %6204 = vmatprep.subr.bf16.mxu1 %v6684_v60 }
 0x290   : > { %6205 = vmatpush3.bf16.msra.mxu1 %v6684_v60 }
 0x291   : > { %6206 = vmatprep.subr.bf16.mxu1 %v6685_v61 }
 0x294   : > { %6207 = vmatpush3.bf16.msra.mxu1 %v6685_v61 }
 0x295   : > { %6208 = vmatprep.subr.bf16.mxu1 %v6686_v19 }
 0x298   : > { %6209 = vmatpush3.bf16.msra.mxu1 %v6686_v19 }
 0x299   : > { %6210 = vmatprep.subr.bf16.mxu1 %v6687_v45 }
 0x29c   : > { %6211 = vmatpush3.bf16.msra.mxu1 %v6687_v45 }
 0x29d   : > { %6212 = vmatprep.subr.bf16.mxu1 %v6688_v42 }
 0x2a0   : > { %6213 = vmatpush3.bf16.msra.mxu1 %v6688_v42 }
 0x360   : > { %v6196_v48 = vpop.f32.mrb[0].mxu0 }
 0x361   : > { %v1335_v14 = vpop.f32.mrb[1].mxu0  ;;  %v1344_v20 = vadd.f32 %v6196_v48, %v5810_v25 }
 0x362   : > { %v1336_v16 = vadd.f32 %v5810_v25, %v1335_v14  ;;  %v6197_v17 = vpop.f32.mrb[2].mxu0 }
 0x363   : > { %v1347_v63 = vadd.f32 %v6197_v17, %v5810_v25  ;;  %v1338_v18 = vpop.f32.mrb[3].mxu0  ;;  %v1352_v33 = vmax.f32 %v1344_v20, 0.0 }
 0x364   : > { %v1350_v54 = vmax.f32 %v1336_v16, 0.0  ;;  %v1339_v23 = vadd.f32 %v5810_v25, %v1338_v18  ;;  %v5819_v25 = vld [vmem:[%s8720_s10] ss:$0 sm:$0xff] }
 0x365   : > { %v1353_v29 = vmax.f32 %v1347_v63, 0.0  ;;  %v7973_v36 = vadd.f32 %v1352_v33, %v7806_v11  ;;  %v5820_v16 = vld [vmem:[%s8721_s11] ss:$0 sm:$0xff] }
 0x366   : > { %v7962_v59 = vadd.f32 %v1350_v54, %v7798_v3  ;;  %v1351_v32 = vmax.f32 %v1339_v23, 0.0 }
 0x367   : > { %v7965_v30 = vadd.f32 %v1353_v29, %v7803_v10 }
 0x368   : > { %1360 = vadd.xlane.f32.xlu0 %v7962_v59  ;;  %v7970_v34 = vadd.f32 %v1351_v32, %v7800_v7 }
 0x369   : > { %1366 = vadd.xlane.f32.xlu1 %v7965_v30 }
 0x36c   : > { %1362 = vadd.xlane.f32.xlu0 %v7970_v34 }
 0x36d   : > { %1364 = vadd.xlane.f32.xlu1 %v7973_v36 }
 0x3f5   : > { %v1361_v3 = vpop.xlane.xlu0 %1360 }
 0x3f6   : > { %v1368_v43 = vmul.f32 0.0078125, %v1361_v3  ;;  %v1367_v46 = vpop.xlane.xlu1 %1366  ;;  %v7994_v3 = vld [vmem:[%s8800_s0 + $0x2] ss:$0 sm:$0xff] }
 0x3f7   : > { %v1371_v47 = vmul.f32 0.0078125, %v1367_v46 }
 0x3f8   : > { %v1372_v10 = vsub.f32 %v7962_v59, %v1368_v43 }
 0x3f9   : > { %v1363_v49 = vpop.xlane.xlu0 %1362  ;;  %v1375_v50 = vsub.f32 %v7965_v30, %v1371_v47 }
 0x3fa   : > { %v1369_v51 = vmul.f32 0.0078125, %v1363_v49  ;;  %v1365_v28 = vpop.xlane.xlu1 %1364  ;;  %v1376_v7 = vmul.f32 %v1372_v10, %v1372_v10 }
 0x3fb   : > { %v1370_v52 = vmul.f32 0.0078125, %v1365_v28  ;;  %v1379_v37 = vmul.f32 %v1375_v50, %v1375_v50 }
 0x3fc   : > { %1380 = vadd.xlane.f32.xlu0 %v1376_v7  ;;  %v1373_v11 = vsub.f32 %v7970_v34, %v1369_v51 }
 0x3fd   : > { %1386 = vadd.xlane.f32.xlu1 %v1379_v37  ;;  %v1374_v53 = vsub.f32 %v7973_v36, %v1370_v52 }
 0x3fe   : > { %v1377_v39 = vmul.f32 %v1373_v11, %v1373_v11 }
 0x3ff   : > { %v1378_v55 = vmul.f32 %v1374_v53, %v1374_v53 }
 0x400   : > { %1382 = vadd.xlane.f32.xlu0 %v1377_v39 }
 0x401   : > { %1384 = vadd.xlane.f32.xlu1 %v1378_v55 }
 0x489   : > { %v1381_v35 = vpop.xlane.xlu0 %1380 }
 0x48a   : > { %v1388_v62 = vmul.f32 0.0078125, %v1381_v35  ;;  %v1387_v41 = vpop.xlane.xlu1 %1386 }
 0x48b   : > { %v1391_v44 = vmul.f32 0.0078125, %v1387_v41 }
 0x48c   : > { %v1392_v0 = vadd.f32 1e-06, %v1388_v62 }
 0x48d   : > { %v1395_v57 = vadd.f32 1e-06, %v1391_v44  ;;  %v1383_v1 = vpop.xlane.xlu0 %1382 }
 0x48e   : > { %6817 = vrsqrt.f32 %v1392_v0  ;;  %v1389_v2 = vmul.f32 0.0078125, %v1383_v1  ;;  %v1385_v4 = vpop.xlane.xlu1 %1384  ;;  %v5827_v1 = vld [vmem:[%s8800_s0 + $0x3] ss:$0 sm:$0xff] }
 0x48f   : > { %6819 = vrsqrt.f32 %v1395_v57  ;;  %v1390_v5 = vmul.f32 0.0078125, %v1385_v4 }
 0x490   : > { %v1393_v6 = vadd.f32 1e-06, %v1389_v2 }
 0x491   : > { %v1394_v12 = vadd.f32 1e-06, %v1390_v5 }
 0x492   : > { %6821 = vrsqrt.f32 %v1393_v6 }
 0x493   : > { %6823 = vrsqrt.f32 %v1394_v12 }
 0x498   : > { %v6818_v15 = vpop.eup %6817 }
 0x499   : > { %v6820_v48 = vpop.eup %6819  ;;  %v1400_v14 = vmul.f32 %v6818_v15, %v1372_v10 }
 0x49a   : > { %v1403_v17 = vmul.f32 %v6820_v48, %v1375_v50 }
 0x49b   : > { %v1410_v20 = vmul.f32 %v5819_v25, %v1400_v14  ;;  %v5829_v14 = vld [vmem:[%s8800_s0 + $0x4] ss:$0 sm:$0xff] }
 0x49c   : > { %v6822_v63 = vpop.eup %6821  ;;  %v1413_v18 = vmul.f32 %v5819_v25, %v1403_v17 }
 0x49d   : > { %v6824_v54 = vpop.eup %6823  ;;  %v7987_v23 = vadd.f32 %v5820_v16, %v1410_v20  ;;  %v1401_v29 = vmul.f32 %v6822_v63, %v1373_v11  ;;  %v5823_v11 = vld [vmem:[%s8800_s0] ss:$0 sm:$0xff] }
 0x49e   : > { %v7989_v32 = vadd.f32 %v5820_v16, %v1413_v18  ;;  %v1402_v33 = vmul.f32 %v6824_v54, %v1374_v53 }
 0x49f   : > { %v1411_v43 = vmul.f32 %v5819_v25, %v1401_v29  ;;  %v1436_v46 = vrot.slane %v7987_v23, 6  ;;  %v1463_v47 = vrot.slane %v7987_v23, 7  ;;  %v1432_v28 = vmul.f32 %v7994_v3, %v7987_v23 }
 0x4a0   : > { %v1412_v10 = vmul.f32 %v5819_v25, %v1402_v33  ;;  %v1439_v49 = vrot.slane %v7989_v32, 6  ;;  %v1466_v50 = vrot.slane %v7989_v32, 7  ;;  %v1491_v7 = vrot.slane %v7987_v23, 1 }
 0x4a1   : > { %v1421_v51 = vadd.f32 %v5820_v16, %v1411_v43  ;;  %v1519_v39 = vrot.slane %v7987_v23, 2  ;;  %v1494_v60 = vrot.slane %v7989_v32, 1  ;;  %v1522_v23 = vrot.slane %v7989_v32, 2 }
 0x4a2   : > { %v8003_v52 = vadd.f32 %v5820_v16, %v1412_v10  ;;  %v1443_v37 = vsel %vm1117_vm2, %v1439_v49, %v1436_v46  ;;  %v1470_v53 = vsel %vm1145_vm8, %v1466_v50, %v1463_v47 }
 0x4a3   : > { %v1437_v55 = vrot.slane %v1421_v51, 6  ;;  %v1444_v56 = vmul.f32 %v7841_v9, %v1443_v37  ;;  %v1464_v38 = vrot.slane %v1421_v51, 7  ;;  %v1471_v61 = vmul.f32 %v7845_v13, %v1470_v53 }
 0x4a4   : > { %v1492_v19 = vrot.slane %v1421_v51, 1  ;;  %v1493_v45 = vrot.slane %v8003_v52, 1  ;;  %v1520_v42 = vrot.slane %v1421_v51, 2  ;;  %v1521_v41 = vrot.slane %v8003_v52, 2 }
 0x4a5   : > { %v1442_v35 = vsel %vm1117_vm2, %v1436_v46, %v1437_v55  ;;  %v1455_v62 = vmul.f32 %v5823_v11, %v1444_v56  ;;  %v1469_v9 = vsel %vm1145_vm8, %v1463_v47, %v1464_v38  ;;  %v1433_v44 = vmul.f32 %v7994_v3, %v1421_v51 }
 0x4a6   : > { %v1456_v0 = vmul.f32 %v5823_v11, %v1442_v35  ;;  %v1483_v57 = vmul.f32 %v5825_v58, %v1471_v61  ;;  %v1496_v13 = vsel %vm1174_vm9, %v1492_v19, %v1493_v45  ;;  %v1497_v4 = vsel %vm1174_vm9, %v1491_v7, %v1492_v19 }
 0x4a7   : > { %v1459_v2 = vadd.f32 %v1455_v62, %v1432_v28  ;;  %v1500_v5 = vmul.f32 %v7859_v21, %v1496_v13  ;;  %v1524_v6 = vsel %vm1203_vm11, %v1520_v42, %v1521_v41  ;;  %v1484_v15 = vmul.f32 %v5825_v58, %v1469_v9 }
 0x4a8   : > { %v1460_v12 = vadd.f32 %v1456_v0, %v1433_v44  ;;  %v1525_v25 = vsel %vm1203_vm11, %v1519_v39, %v1520_v42  ;;  %v1528_v48 = vmul.f32 %v7862_v22, %v1524_v6  ;;  %v1511_v17 = vmul.f32 %v5827_v1, %v1497_v4 }
 0x4a9   : > { %v1487_v16 = vadd.f32 %v1483_v57, %v1459_v2  ;;  %v1512_v20 = vmul.f32 %v5827_v1, %v1500_v5  ;;  %v1435_v21 = vmul.f32 %v7994_v3, %v7989_v32  ;;  %v1438_v18 = vrot.slane %v8003_v52, 6 }
 0x4aa   : > { %v1488_v63 = vadd.f32 %v1484_v15, %v1460_v12  ;;  %v1465_v54 = vrot.slane %v8003_v52, 7  ;;  %v1539_v33 = vmul.f32 %v5829_v14, %v1525_v25  ;;  %v1540_v22 = vmul.f32 %v5829_v14, %v1528_v48 }
 0x4ab   : > { %v1515_v29 = vadd.f32 %v1511_v17, %v1487_v16  ;;  %v1498_v43 = vsel %vm1174_vm9, %v1494_v60, %v1491_v7  ;;  %v1440_v47 = vsel %vm1117_vm2, %v1438_v18, %v1439_v49  ;;  %v1441_v10 = vsel %vm1117_vm2, %v1437_v55, %v1438_v18  ;;  %v6689_v16 = vld [vmem:[#allocation12] ss:$12 sps:$4 sm:$0xff]   ;;  %v6691_v17 = vld [vmem:[#allocation12 + $0x4] ss:$12 sps:$4 sm:$0xff]  }
 0x4ac   : > { %v1516_v46 = vadd.f32 %v1512_v20, %v1488_v63  ;;  %v1467_v51 = vsel %vm1145_vm8, %v1465_v54, %v1466_v50  ;;  %v1446_v37 = vmul.f32 %v7866_v24, %v1441_v10  ;;  %v1458_v32 = vmul.f32 %v5823_v11, %v1440_v47  ;;  %v6694_v20 = vld [vmem:[#allocation12 + $0x1c] ss:$12 sps:$4 sm:$0xff]   ;;  %1922 = vmatprep.subr.bf16.mxu0 %v6691_v17 }
 0x4ad   : > { %v1543_v28 = vadd.f32 %v1539_v33, %v1515_v29  ;;  %v1468_v53 = vsel %vm1145_vm8, %v1464_v38, %v1465_v54  ;;  %v1434_v7 = vmul.f32 %v7994_v3, %v8003_v52  ;;  %v1502_v49 = vmul.f32 %v7870_v26, %v1498_v43  ;;  %1923 = vmatpush1.bf16.msra.mxu0 %v6689_v16  ;;  %v6695_v10 = vld [vmem:[#allocation12 + $0x30] ss:$12 sps:$4 sm:$0xff]   ;;  %v6719_v16 = vld [vmem:[#allocation12 + $0x98] ss:$12 sps:$4 sm:$0xff]  }
 0x4ae   : > { %v1544_v56 = vadd.f32 %v1540_v22, %v1516_v46  ;;  %v1473_v61 = vmul.f32 %v7881_v31, %v1468_v53  ;;  %v1457_v19 = vmul.f32 %v5823_v11, %v1446_v37  ;;  %v1462_v55 = vadd.f32 %v1458_v32, %v1435_v21  ;;  %v6692_v21 = vld [vmem:[#allocation12 + $0x18] ss:$12 sps:$4 sm:$0xff]   ;;  %1924 = vmatprep.subr.bf16.mxu0 %v6694_v20  ;;  %v6698_v37 = vld [vmem:[#allocation12 + $0x48] ss:$12 sps:$4 sm:$0xff]   ;;  %v6701_v53 = vld [vmem:[#allocation12 + $0x60] ss:$12 sps:$4 sm:$0xff]  }
 0x4af   : > { %v1486_v42 = vmul.f32 %v5825_v58, %v1467_v51  ;;  %v1526_v50 = vsel %vm1203_vm11, %v1522_v23, %v1519_v39  ;;  %v1495_v62 = vsel %vm1174_vm9, %v1493_v45, %v1494_v60  ;;  %v1514_v44 = vmul.f32 %v5827_v1, %v1502_v49  ;;  %v5830_v60 = vld [vmem:[%s8719_s9] ss:$0 sm:$0xff]  ;;  %v6697_v51 = vld [vmem:[#allocation12 + $0x34] ss:$12 sps:$4 sm:$0xff]   ;;  %v6703_v32 = vld [vmem:[#allocation12 + $0x64] ss:$12 sps:$4 sm:$0xff]  }
 0x4b0   : > { %v1563_v35 = vpack.c.bf16 %v1544_v56, %v1543_v28  ;;  %v1485_v24 = vmul.f32 %v5825_v58, %v1473_v61  ;;  %v1461_v38 = vadd.f32 %v1457_v19, %v1434_v7  ;;  %v1530_v3 = vmul.f32 %v7873_v27, %v1526_v50  ;;  %v6700_v28 = vld [vmem:[#allocation12 + $0x4c] ss:$12 sps:$4 sm:$0xff]   ;;  %v6709_v7 = vld [vmem:[#allocation12 + $0x94] ss:$12 sps:$4 sm:$0xff]   ;;  %v6707_v61 = vld [vmem:[#allocation12 + $0x90] ss:$12 sps:$4 sm:$0xff]  }
 0x4b1   : > { %v1490_v9 = vadd.f32 %v1486_v42, %v1462_v55  ;;  %v1523_v26 = vsel %vm1203_vm11, %v1521_v41, %v1522_v23  ;;  %v1513_v52 = vmul.f32 %v5827_v1, %v1495_v62  ;;  %1925 = vmatpush1.bf16.msra.mxu0 %v6692_v21  ;;  %v6704_v56 = vld [vmem:[#allocation12 + $0x78] ss:$12 sps:$4 sm:$0xff]   ;;  %v6710_v19 = vld [vmem:[#allocation12 + $0xa8] ss:$12 sps:$4 sm:$0xff]   ;;  %v6714_v42 = vld [vmem:[#allocation12 + $0x20] ss:$12 sps:$4 sm:$0xff]  }
 0x4b2   : > { %6214 = vmatprep.mubr.bf16.mxu1 %v1563_v35  ;;  %v1489_v31 = vadd.f32 %v1485_v24, %v1461_v38  ;;  %v1541_v57 = vmul.f32 %v5829_v14, %v1523_v26  ;;  %v1542_v39 = vmul.f32 %v5829_v14, %v1530_v3  ;;  %1926 = vmatprep.subr.bf16.mxu0 %v6697_v51  ;;  %v6712_v49 = vld [vmem:[#allocation12 + $0xac] ss:$12 sps:$4 sm:$0xff]   ;;  %v6713_v55 = vld [vmem:[#allocation12 + $0x8] ss:$12 sps:$4 sm:$0xff]   ;;  %v6720_v17 = vld [vmem:[#allocation12 + $0xb0] ss:$12 sps:$4 sm:$0xff]  }
 0x4b3   : > { %v1518_v11 = vadd.f32 %v1514_v44, %v1490_v9  ;;  %6218 = vmatprep.subr.bf16.mxu1 %v6713_v55 }
 0x4b4   : > { %v1517_v0 = vadd.f32 %v1513_v52, %v1489_v31 }
 0x4b5   : > { %v1546_v58 = vadd.f32 %v1542_v39, %v1518_v11  ;;  %1927 = vmatpush1.bf16.msra.mxu0 %v6695_v10 }
 0x4b6   : > { %v1545_v13 = vadd.f32 %v1541_v57, %v1517_v0  ;;  %1928 = vmatprep.subr.bf16.mxu0 %v6700_v28 }
 0x4b8   : > { %v1564_v2 = vpack.c.bf16 %v1546_v58, %v1545_v13  ;;  %v5839_v13 = vld [vmem:[%s8801_s8] ss:$0 sm:$0xff]  ;;  %s7330_s8 = smov 64  }
 0x4b9   : > { %1929 = vmatpush1.bf16.msra.mxu0 %v6698_v37  ;;  %v1781_v37 = vsub.s32 0, %v7830_v40 }
 0x4ba   : > { %6215 = vmatmul.mubr.bf16.vlgmr.msra.gmra.mrb[0].mxu1 %v1564_v2  ;;  %1930 = vmatprep.subr.bf16.mxu0 %v6703_v32  ;;  %v1777_v32 = vld [vmem:[%s8803_s15] sm:$0x7]  ;;  %s8804_s15 = sld [smem:[#allocation36_spill]] }
 0x4bb   : > { %6219 = vmatpush3.bf16.msra.mxu1 %v6713_v55 }
 0x4bc   : > { %6220 = vmatprep.subr.bf16.mxu1 %v6714_v42 }
 0x4bd   : > { %1931 = vmatpush1.bf16.msra.mxu0 %v6701_v53  ;;  %v1785_v53 = vsub.s32 1, %v7830_v40 }
 0x4bf   : > { %6221 = vmatpush3.bf16.msra.mxu1 %v6714_v42 }
 0x58d   : > { %v6216_v45 = vpop.f32.mrb[0].mxu1 }
 0x58e   : > { %v1663_v27 = vadd.f32 %v6216_v45, %v5830_v60  ;;  %v1654_v4 = vpop.f32.mrb[1].mxu1 }
 0x58f   : > { %v1655_v5 = vadd.f32 %v5830_v60, %v1654_v4  ;;  %v6217_v6 = vpop.f32.mrb[2].mxu1 }
 0x590   : > { %v1666_v41 = vadd.f32 %v6217_v6, %v5830_v60  ;;  %v1657_v12 = vpop.f32.mrb[3].mxu1 }
 0x591   : > { %v1669_v1 = vmax.f32 %v1655_v5, 0.0  ;;  %v1658_v15 = vadd.f32 %v5830_v60, %v1657_v12  ;;  %v6715_v12 = vld [vmem:[#allocation12 + $0x38] ss:$12 sps:$4 sm:$0xff]  }
 0x592   : > { %v1672_v22 = vmax.f32 %v1666_v41, 0.0  ;;  %6222 = vmatprep.subr.bf16.mxu1 %v6715_v12 }
 0x593   : > { %v8073_v25 = vadd.f32 %v1669_v1, %v7962_v59  ;;  %v1670_v48 = vmax.f32 %v1658_v15, 0.0  ;;  %v6716_v1 = vld [vmem:[#allocation12 + $0x50] ss:$12 sps:$4 sm:$0xff]   ;;  %6223 = vmatpush3.bf16.msra.mxu1 %v6715_v12  ;;  %v6717_v15 = vld [vmem:[#allocation12 + $0x68] ss:$12 sps:$4 sm:$0xff]  }
 0x594   : > { %v8094_v47 = vadd.f32 %v1672_v22, %v7965_v30  ;;  %v7325_v30 = vmov 0   ;;  %6224 = vmatprep.subr.bf16.mxu1 %v6716_v1 }
 0x595   : > { %v8076_v14 = vadd.f32 %v1670_v48, %v7970_v34  ;;  %1679 = vadd.xlane.f32.xlu0 %v8073_v25  ;;  %v1671_v34 = vmax.f32 %v1663_v27, 0.0  ;;  %1954 = vmatprep.mubr.bf16.mxu0 %v7325_v30  ;;  %v5840_v27 = vld [vmem:[%s8802_s21] ss:$0 sm:$0xff]  ;;  %v6718_v48 = vld [vmem:[#allocation12 + $0x80] ss:$12 sps:$4 sm:$0xff]   ;;  %s7333_s21 = smov 16  }
 0x597   : > { %1681 = vadd.xlane.f32.xlu1 %v8076_v14  ;;  %v8091_v46 = vadd.f32 %v1671_v34, %v7973_v36  ;;  %v6706_v36 = vld [vmem:[#allocation12 + $0x7c] ss:$12 sps:$4 sm:$0xff]   ;;  %6225 = vmatpush3.bf16.msra.mxu1 %v6716_v1 }
 0x598   : > { %1932 = vmatprep.subr.bf16.mxu0 %v6706_v36  ;;  %6226 = vmatprep.subr.bf16.mxu1 %v6717_v15  ;;  %v1782_v36 = vrot.slane %v1777_v32, %v1781_v37 }
 0x599   : > { %1933 = vmatpush1.bf16.msra.mxu0 %v6704_v56 }
 0x59a   : > { %1934 = vmatprep.subr.bf16.mxu0 %v6709_v7  ;;  %v1786_v7 = vrot.slane %v1777_v32, %v1785_v53 }
 0x59b   : > { %6227 = vmatpush3.bf16.msra.mxu1 %v6717_v15 }
 0x59c   : > { %6228 = vmatprep.subr.bf16.mxu1 %v6718_v48 }
 0x59d   : > { %1935 = vmatpush1.bf16.msra.mxu0 %v6707_v61 }
 0x59e   : > { %1936 = vmatprep.subr.bf16.mxu0 %v6712_v49 }
 0x59f   : > { %6229 = vmatpush3.bf16.msra.mxu1 %v6718_v48 }
 0x5a0   : > { %6230 = vmatprep.subr.bf16.mxu1 %v6719_v16 }
 0x5a1   : > { %1937 = vmatpush1.bf16.msra.mxu0 %v6710_v19 }
 0x5a2   : > { %6244 = vmatprep.subr.bf16.mxu0 %v7324_v8 }
 0x5a3   : > { %6231 = vmatpush3.bf16.msra.mxu1 %v6719_v16 }
 0x5a4   : > { %6232 = vmatprep.subr.bf16.mxu1 %v6720_v17 }
 0x5a7   : > { %6233 = vmatpush3.bf16.msra.mxu1 %v6720_v17 }
 0x5a8   : > { %6238 = vmatprep.subr.bf16.mxu1 %v7324_v8 }
 0x622   : > { %v1680_v63 = vpop.xlane.xlu0 %1679 }
 0x623   : > { %v1687_v18 = vmul.f32 0.0078125, %v1680_v63 }
 0x624   : > { %v1682_v59 = vpop.xlane.xlu1 %1681 }
 0x625   : > { %v1688_v54 = vmul.f32 0.0078125, %v1682_v59  ;;  %v8081_v23 = vsub.f32 %v8073_v25, %v1687_v18 }
 0x627   : > { %v1695_v29 = vmul.f32 %v8081_v23, %v8081_v23  ;;  %v8086_v33 = vsub.f32 %v8076_v14, %v1688_v54 }
 0x629   : > { %1699 = vadd.xlane.f32.xlu0 %v1695_v29  ;;  %v1696_v43 = vmul.f32 %v8086_v33, %v8086_v33 }
 0x62b   : > { %1701 = vadd.xlane.f32.xlu1 %v1696_v43 }
 0x62d   : > { %1683 = vadd.xlane.f32.xlu0 %v8091_v46 }
 0x62f   : > { %1685 = vadd.xlane.f32.xlu1 %v8094_v47 }
 0x6b6   : > { %v1700_v50 = vpop.xlane.xlu0 %1699 }
 0x6b7   : > { %v1707_v35 = vmul.f32 0.0078125, %v1700_v50 }
 0x6b8   : > { %v1702_v24 = vpop.xlane.xlu1 %1701 }
 0x6b9   : > { %v1711_v62 = vadd.f32 1e-06, %v1707_v35  ;;  %v1708_v38 = vmul.f32 0.0078125, %v1702_v24 }
 0x6ba   : > { %v1684_v9 = vpop.xlane.xlu0 %1683 }
 0x6bb   : > { %6825 = vrsqrt.f32 %v1711_v62  ;;  %v1712_v44 = vadd.f32 1e-06, %v1708_v38  ;;  %v1689_v3 = vmul.f32 0.0078125, %v1684_v9 }
 0x6bc   : > { %v1686_v26 = vpop.xlane.xlu1 %1685 }
 0x6bd   : > { %6827 = vrsqrt.f32 %v1712_v44  ;;  %v1690_v31 = vmul.f32 0.0078125, %v1686_v26  ;;  %v1693_v52 = vsub.f32 %v8091_v46, %v1689_v3  ;;  %v1789_v26 = vsub.s32 2, %v7830_v40 }
 0x6bf   : > { %v1697_v11 = vmul.f32 %v1693_v52, %v1693_v52  ;;  %v1694_v0 = vsub.f32 %v8094_v47, %v1690_v31  ;;  %v1790_v31 = vrot.slane %v1777_v32, %v1789_v26 }
 0x6c1   : > { %1703 = vadd.xlane.f32.xlu0 %v1697_v11  ;;  %v1698_v57 = vmul.f32 %v1694_v0, %v1694_v0 }
 0x6c3   : > { %1705 = vadd.xlane.f32.xlu1 %v1698_v57 }
 0x6c5   : > { %v6826_v39 = vpop.eup %6825 }
 0x6c6   : > { %v1719_v58 = vmul.f32 %v6826_v39, %v8081_v23 }
 0x6c7   : > { %v6828_v2 = vpop.eup %6827 }
 0x6c8   : > { %v1720_v60 = vmul.f32 %v6828_v2, %v8086_v33  ;;  %v1729_v45 = vmul.f32 %v5839_v13, %v1719_v58 }
 0x6ca   : > { %v1730_v4 = vmul.f32 %v5839_v13, %v1720_v60  ;;  %v1739_v5 = vadd.f32 %v5840_v27, %v1729_v45 }
 0x6cc   : > { %v1740_v6 = vadd.f32 %v5840_v27, %v1730_v4 }
 0x6ce   : > { %v1743_v41 = vpack.c.bf16 %v1740_v6, %v1739_v5 }
 0x6d0   : > { %1955 = vmatmul.mubr.bf16.vlgmr.msra.gmra.mrb[4].mxu0 %v1743_v41  ;;  %6234 = vmatprep.mubr.bf16.mxu1 %v1743_v41 }
 0x6d1   : > { %1964 = vmatprep.mubr.bf16.mxu0 %v7325_v30 }
 0x74e   : > { %v1704_v20 = vpop.xlane.xlu0 %1703 }
 0x74f   : > { %v1709_v21 = vmul.f32 0.0078125, %v1704_v20 }
 0x750   : > { %v1706_v63 = vpop.xlane.xlu1 %1705 }
 0x751   : > { %v1713_v18 = vadd.f32 1e-06, %v1709_v21  ;;  %v1710_v59 = vmul.f32 0.0078125, %v1706_v63 }
 0x753   : > { %6829 = vrsqrt.f32 %v1713_v18  ;;  %v1714_v54 = vadd.f32 1e-06, %v1710_v59 }
 0x755   : > { %6831 = vrsqrt.f32 %v1714_v54 }
 0x75d   : > { %v6830_v23 = vpop.eup %6829 }
 0x75e   : > { %v1721_v34 = vmul.f32 %v6830_v23, %v1693_v52 }
 0x75f   : > { %v6832_v29 = vpop.eup %6831 }
 0x760   : > { %v1722_v33 = vmul.f32 %v6832_v29, %v1694_v0  ;;  %v1731_v22 = vmul.f32 %v5839_v13, %v1721_v34 }
 0x762   : > { %v1732_v43 = vmul.f32 %v5839_v13, %v1722_v33  ;;  %v1741_v10 = vadd.f32 %v5840_v27, %v1731_v22 }
 0x764   : > { %v1742_v51 = vadd.f32 %v5840_v27, %v1732_v43 }
 0x766   : > { %v1744_v28 = vpack.c.bf16 %v1742_v51, %v1741_v10 }
 0x768   : > { %1965 = vmatmul.mubr.bf16.gmra.mrb[8].mxu0 %v1744_v28  ;;  %6235 = vmatmul.mubr.bf16.vlgmr.msra.gmra.mrb[4].mxu1 %v1744_v28 }
 0x769   : > { %6240 = vmatprep.mubr.msk.bf16.mxu1 %vm7326_vm12, %v7324_v8  ;;  %6246 = vmatprep.mubr.msk.bf16.mxu0 %vm7326_vm12, %v7324_v8 }
 0x7a3   : > { %v1956_v56 = vpop.f32.mrb[4].mxu0 }
 0x7a4   : > { %v1958_v61 = vpop.f32.mrb[5].mxu0  ;;  %v1957_v19 = vadd.f32 %v1956_v56, %v1782_v36 }
 0x7a5   : > { %v1960_v49 = vpop.f32.mrb[6].mxu0  ;;  %v1959_v50 = vadd.f32 %v1958_v61, %v1786_v7 }
 0x7a6   : > { %v1961_v55 = vadd.f32 %v1960_v49, %v1782_v36  ;;  %v1962_v42 = vpop.f32.mrb[7].mxu0 }
 0x7a7   : > { %v1963_v35 = vadd.f32 %v1962_v42, %v1786_v7 }
 0x7a8   : > { %v8125_v24 = vpack.c.bf16 %v1961_v55, %v1957_v19 }
 0x7a9   : > { %v8127_v62 = vpack.c.bf16 %v1963_v35, %v1959_v50 }
 0x7aa   : > { %2162 = vrot.lane.b32.xlu1 %v8125_v24, %s7327_s3 }
 0x7ab   : > { %2165 = vrot.lane.b32.xlu0 %v8127_v62, %s7327_s3  ;;  %v2047_v38 = vsel %vm2042_vm13, %v8127_v62, 0 }
 0x7ac   : > { %6239 = vmatpush3.bf16.xpose.msra.mxu1 %v2047_v38 }
 0x7ad   : > { %6250 = vmatprep.subr.bf16.mxu1 %v7324_v8 }
 0x7b3   : > { %6241 = vmatmul.mubr.msk.bf16.vlgmr.msra.gmra.mrb[8].mxu1 %vm2042_vm13, %v8125_v24 }
 0x7b4   : > { %6252 = vmatprep.mubr.msk.bf16.mxu1 %vm7326_vm12, %v7324_v8 }
 0x81c   : > { %v2163_v3 = vpop.permute.xlu1 %2162 }
 0x81d   : > { %v2166_v9 = vpop.permute.xlu0 %2165 }
 0x81e   : > { %v2171_v44 = vsel %vm2042_vm13, %v2166_v9, 0 }
 0x81f   : > { %6251 = vmatpush3.bf16.xpose.msra.mxu1 %v2171_v44 }
 0x820   : > { %6262 = vmatprep.subr.bf16.mxu1 %v7324_v8 }
 0x826   : > { %6253 = vmatmul.mubr.msk.bf16.vlgmr.msra.gmra.mrb[12].mxu1 %vm2042_vm13, %v2163_v3 }
 0x827   : > { %6264 = vmatprep.mubr.msk.bf16.mxu1 %vm7326_vm12, %v7324_v8 }
 0x83b   : > { %v1966_v52 = vpop.f32.mrb[8].mxu0  ;;  %v6236_v11 = vpop.f32.mrb[4].mxu1 }
 0x83c   : > { %v2018_v0 = vadd.f32 %v6236_v11, %v1790_v31  ;;  %v1968_v57 = vpop.f32.mrb[9].mxu0  ;;  %v2009_v39 = vpop.f32.mrb[5].mxu1  ;;  %v1967_v2 = vadd.f32 %v1966_v52, %v1782_v36 }
 0x83d   : > { %v1970_v13 = vpop.f32.mrb[10].mxu0  ;;  %v6237_v58 = vpop.f32.mrb[6].mxu1  ;;  %v1969_v5 = vadd.f32 %v1968_v57, %v1786_v7  ;;  %v2010_v6 = vadd.f32 %v2009_v39, %v1790_v31 }
 0x83e   : > { %v1971_v60 = vadd.f32 %v1970_v13, %v1782_v36  ;;  %v2021_v45 = vadd.f32 %v6237_v58, %v1790_v31  ;;  %v1972_v27 = vpop.f32.mrb[11].mxu0  ;;  %v2012_v4 = vpop.f32.mrb[7].mxu1 }
 0x83f   : > { %v1973_v41 = vadd.f32 %v1972_v27, %v1786_v7  ;;  %v2013_v12 = vadd.f32 %v2012_v4, %v1790_v31  ;;  %v8175_v4 = vld [vmem:[#allocation14 + $0x8] sm:$0xff]  }
 0x840   : > { %v8148_v1 = vpack.c.bf16 %v1971_v60, %v1967_v2  ;;  %v8150_v15 = vpack.c.bf16 %v2021_v45, %v2018_v0  ;;  %6263 = vmatpush3.bf16.msra.mxu1 %v8175_v4 }
 0x841   : > { %v8152_v48 = vpack.c.bf16 %v1973_v41, %v1969_v5  ;;  %v8154_v16 = vpack.c.bf16 %v2013_v12, %v2010_v6  ;;  %6274 = vmatprep.subr.bf16.mxu1 %v7324_v8 }
 0x843   : > { %6245 = vmatpush3.bf16.msra.mxu0 %v8154_v16 }
 0x844   : > { %6256 = vmatprep.subr.bf16.mxu0 %v7324_v8 }
 0x886   : > { %v2083_v17 = vpop.f32.mrb[8].mxu1 }
 0x887   : > { %v2090_v20 = vmul.f32 0.25, %v2083_v17  ;;  %v6242_v21 = vpop.f32.mrb[9].mxu1 }
 0x888   : > { %v2086_v63 = vpop.f32.mrb[10].mxu1 }
 0x889   : > { %v2091_v18 = vmul.f32 0.25, %v2086_v63  ;;  %v6243_v59 = vpop.f32.mrb[11].mxu1  ;;  %v2092_v54 = vsel %vm2042_vm13, %v2090_v20, -inf  ;;  %v8180_v63 = vld [vmem:[#allocation14] sm:$0xff]  }
 0x88a   : > { %2093 = vmax.xlane.f32.xlu1 %v2092_v54 }
 0x88b   : > { %v2095_v23 = vsel %vm2042_vm13, %v2091_v18, -inf }
 0x88c   : > { %2096 = vmax.xlane.f32.xlu0 %v2095_v23 }
 0x8f9   : > { %v2207_v34 = vpop.f32.mrb[12].mxu1 }
 0x8fa   : > { %v2214_v29 = vmul.f32 0.25, %v2207_v34  ;;  %v6254_v33 = vpop.f32.mrb[13].mxu1 }
 0x8fb   : > { %v2210_v22 = vpop.f32.mrb[14].mxu1 }
 0x8fc   : > { %v2215_v43 = vmul.f32 0.25, %v2210_v22  ;;  %v6255_v10 = vpop.f32.mrb[15].mxu1  ;;  %v2216_v51 = vsel %vm2042_vm13, %v2214_v29, -inf }
 0x8fd   : > { %2217 = vmax.xlane.f32.xlu0 %v2216_v51 }
 0x8fe   : > { %v2219_v28 = vsel %vm2042_vm13, %v2215_v43, -inf }
 0x8ff   : > { %2220 = vmax.xlane.f32.xlu1 %v2219_v28 }
 0x917   : > { %v2094_v32 = vpop.xlane.xlu1 %2093 }
 0x918   : > { %v2098_v36 = vsub.f32 %v2090_v20, %v2094_v32 }
 0x919   : > { %v2097_v56 = vpop.xlane.xlu0 %2096 }
 0x91a   : > { %v2100_v7 = vmul.f32 1.442695, %v2098_v36  ;;  %v2099_v61 = vsub.f32 %v2091_v18, %v2097_v56 }
 0x91c   : > { %6833 = vpow2.f32 %v2100_v7  ;;  %v2102_v49 = vmul.f32 1.442695, %v2099_v61 }
 0x91e   : > { %6835 = vpow2.f32 %v2102_v49 }
 0x926   : > { %v6834_v19 = vpop.eup %6833 }
 0x927   : > { %v2104_v55 = vsel %vm2042_vm13, %v6834_v19, 0.0 }
 0x928   : > { %v6836_v42 = vpop.eup %6835  ;;  %2105 = vadd.xlane.f32.xlu0 %v2104_v55 }
 0x929   : > { %v2107_v50 = vsel %vm2042_vm13, %v6836_v42, 0.0 }
 0x92a   : > { %2108 = vadd.xlane.f32.xlu1 %v2107_v50 }
 0x98a   : > { %v2218_v35 = vpop.xlane.xlu0 %2217 }
 0x98b   : > { %v2222_v38 = vsub.f32 %v2214_v29, %v2218_v35 }
 0x98c   : > { %v2221_v9 = vpop.xlane.xlu1 %2220 }
 0x98d   : > { %v2224_v44 = vmul.f32 1.442695, %v2222_v38  ;;  %v2223_v3 = vsub.f32 %v2215_v43, %v2221_v9 }
 0x98f   : > { %6837 = vpow2.f32 %v2224_v44  ;;  %v2226_v31 = vmul.f32 1.442695, %v2223_v3 }
 0x991   : > { %6839 = vpow2.f32 %v2226_v31 }
 0x999   : > { %v6838_v52 = vpop.eup %6837 }
 0x99a   : > { %v2228_v11 = vsel %vm2042_vm13, %v6838_v52, 0.0 }
 0x99b   : > { %v6840_v0 = vpop.eup %6839  ;;  %2229 = vadd.xlane.f32.xlu0 %v2228_v11 }
 0x99c   : > { %v2231_v57 = vsel %vm2042_vm13, %v6840_v0, 0.0 }
 0x99d   : > { %2232 = vadd.xlane.f32.xlu1 %v2231_v57 }
 0x9ae   : > { %2390 = vrot.lane.b32.xlu1 %v8127_v62, %s7328_s13 }
 0x9b1   : > { %2240 = vrot.lane.b32.xlu0 %v8154_v16, %s7327_s3 }
 0x9b2   : > { %2388 = vrot.lane.b32.xlu1 %v8125_v24, %s7328_s13 }
 0x9b5   : > { %v2106_v39 = vpop.xlane.xlu0 %2105 }
 0x9b6   : > { %6841 = vrcp.f32 %v2106_v39 }
 0x9b7   : > { %v2109_v13 = vpop.xlane.xlu1 %2108 }
 0x9b8   : > { %6843 = vrcp.f32 %v2109_v13 }
 0x9c0   : > { %v6842_v58 = vpop.eup %6841 }
 0x9c1   : > { %v2112_v60 = vmul.f32 %v6842_v58, %v6834_v19 }
 0x9c2   : > { %v6844_v2 = vpop.eup %6843 }
 0x9c3   : > { %v2113_v45 = vmul.f32 %v6844_v2, %v6836_v42 }
 0x9c5   : > { %v2114_v27 = vpack.c.bf16 %v2113_v45, %v2112_v60 }
 0x9c7   : > { %6247 = vmatmul.mubr.msk.bf16.vlgmr.msra.gmra.mrb[12].mxu0 %vm2042_vm13, %v2114_v27 }
 0x9c8   : > { %6258 = vmatprep.mubr.msk.bf16.mxu0 %vm7326_vm12, %v7324_v8 }
 0xa28   : > { %v2230_v5 = vpop.xlane.xlu0 %2229 }
 0xa29   : > { %6845 = vrcp.f32 %v2230_v5 }
 0xa2a   : > { %v2233_v6 = vpop.xlane.xlu1 %2232 }
 0xa2b   : > { %6847 = vrcp.f32 %v2233_v6 }
 0xa2c   : > { %v2241_v41 = vpop.permute.xlu0 %2240 }
 0xa2d   : > { %6257 = vmatpush3.bf16.msra.mxu0 %v2241_v41 }
 0xa2e   : > { %6268 = vmatprep.subr.bf16.mxu0 %v7324_v8  ;;  %v2391_v43 = vpop.permute.xlu1 %2390 }
 0xa2f   : > { %v2396_v32 = vsel %vm2042_vm13, %v2391_v43, 0 }
 0xa32   : > { %v2389_v36 = vpop.permute.xlu1 %2388 }
 0xa33   : > { %v6846_v12 = vpop.eup %6845 }
 0xa34   : > { %v2236_v20 = vmul.f32 %v6846_v12, %v6838_v52 }
 0xa35   : > { %v6848_v17 = vpop.eup %6847 }
 0xa36   : > { %v2237_v21 = vmul.f32 %v6848_v17, %v6840_v0 }
 0xa38   : > { %v2238_v18 = vpack.c.bf16 %v2237_v21, %v2236_v20 }
 0xa3a   : > { %6259 = vmatmul.mubr.msk.bf16.vlgmr.msra.gmra.mrb[16].mxu0 %vm2042_vm13, %v2238_v18 }
 0xa3b   : > { %6269 = vmatpush3.bf16.msra.mxu0 %v8180_v63  ;;  %6270 = vmatprep.mubr.msk.bf16.mxu0 %vm7326_vm12, %v7324_v8 }
 0xa3c   : > { %6280 = vmatprep.subr.bf16.mxu0 %v7324_v8 }
 0xa9a   : > { %v2153_v59 = vpop.f32.mrb[12].mxu0 }
 0xa9b   : > { %v6248_v54 = vpop.f32.mrb[13].mxu0 }
 0xa9c   : > { %v2156_v23 = vpop.f32.mrb[14].mxu0 }
 0xa9d   : > { %v2160_v34 = vpack.c.bf16 %v2156_v23, %v2153_v59  ;;  %v6249_v29 = vpop.f32.mrb[15].mxu0 }
 0xa9f   : > { %6271 = vmatmul.mubr.msk.bf16.vlgmr.msra.gmra.mrb[20].mxu0 %vm2042_vm13, %v2160_v34 }
 0xaa0   : > { %6282 = vmatprep.mubr.msk.bf16.mxu0 %vm7326_vm12, %v7324_v8 }
 0xb0d   : > { %v2280_v33 = vpop.f32.mrb[16].mxu0 }
 0xb0e   : > { %v6260_v22 = vpop.f32.mrb[17].mxu0 }
 0xb0f   : > { %v2283_v10 = vpop.f32.mrb[18].mxu0  ;;  %v8221_v22 = vld [vmem:[#allocation14 + $0x10] sm:$0xff]  }
 0xb10   : > { %v2287_v51 = vpack.c.bf16 %v2283_v10, %v2280_v33  ;;  %v6261_v28 = vpop.f32.mrb[19].mxu0 }
 0xb12   : > { %6265 = vmatmul.mubr.msk.bf16.vlgmr.msra.gmra.mrb[16].mxu1 %vm2042_vm13, %v2287_v51 }
 0xb13   : > { %6275 = vmatpush3.bf16.xpose.msra.mxu1 %v2396_v32  ;;  %6276 = vmatprep.mubr.msk.bf16.mxu1 %vm7326_vm12, %v7324_v8 }
 0xb14   : > { %6286 = vmatprep.subr.bf16.mxu1 %v7324_v8 }
 0xb1a   : > { %6277 = vmatmul.mubr.msk.bf16.vlgmr.msra.gmra.mrb[20].mxu1 %vm2042_vm13, %v2389_v36 }
 0xb1b   : > { %6288 = vmatprep.mubr.msk.bf16.mxu1 %vm7326_vm12, %v7324_v8  ;;  %6287 = vmatpush3.bf16.msra.mxu1 %v8221_v22 }
 0xb1c   : > { %6298 = vmatprep.subr.bf16.mxu1 %v7324_v8 }
 0xb72   : > { %v2381_v56 = vpop.f32.mrb[20].mxu0 }
 0xb73   : > { %v6272_v7 = vpop.f32.mrb[21].mxu0 }
 0xb74   : > { %v2384_v61 = vpop.f32.mrb[22].mxu0 }
 0xb75   : > { %v6273_v49 = vpop.f32.mrb[23].mxu0 }
 0xbe5   : > { %v2331_v19 = vpop.f32.mrb[16].mxu1 }
 0xbe6   : > { %v8198_v55 = vadd.f32 %v2381_v56, %v2331_v19  ;;  %v6266_v42 = vpop.f32.mrb[17].mxu1 }
 0xbe7   : > { %v2334_v50 = vpop.f32.mrb[18].mxu1 }
 0xbe8   : > { %v8200_v35 = vadd.f32 %v2384_v61, %v2334_v50  ;;  %v6267_v38 = vpop.f32.mrb[19].mxu1 }
 0xbed   : > { %v2432_v9 = vpop.f32.mrb[20].mxu1 }
 0xbee   : > { %v2439_v44 = vmul.f32 0.25, %v2432_v9  ;;  %v6278_v3 = vpop.f32.mrb[21].mxu1 }
 0xbef   : > { %v2435_v31 = vpop.f32.mrb[22].mxu1 }
 0xbf0   : > { %v2440_v52 = vmul.f32 0.25, %v2435_v31  ;;  %v6279_v11 = vpop.f32.mrb[23].mxu1  ;;  %v2441_v0 = vsel %vm2042_vm13, %v2439_v44, -inf }
 0xbf1   : > { %2442 = vmax.xlane.f32.xlu1 %v2441_v0 }
 0xbf2   : > { %v2444_v57 = vsel %vm2042_vm13, %v2440_v52, -inf }
 0xbf3   : > { %2445 = vmax.xlane.f32.xlu0 %v2444_v57 }
 0xc02   : > { %2464 = vrot.lane.b32.xlu1 %v8154_v16, %s7328_s13 }
 0xc06   : > { %2564 = vrot.lane.b32.xlu1 %v8125_v24, %s7329_s1 }
 0xc7e   : > { %v2443_v39 = vpop.xlane.xlu1 %2442 }
 0xc7f   : > { %v2447_v13 = vsub.f32 %v2439_v44, %v2443_v39 }
 0xc80   : > { %v2446_v58 = vpop.xlane.xlu0 %2445 }
 0xc81   : > { %v2449_v2 = vmul.f32 1.442695, %v2447_v13  ;;  %v2448_v60 = vsub.f32 %v2440_v52, %v2446_v58 }
 0xc82   : > { %v2465_v45 = vpop.permute.xlu1 %2464 }
 0xc83   : > { %6849 = vpow2.f32 %v2449_v2  ;;  %v2451_v27 = vmul.f32 1.442695, %v2448_v60  ;;  %6281 = vmatpush3.bf16.msra.mxu0 %v2465_v45 }
 0xc84   : > { %6292 = vmatprep.subr.bf16.mxu0 %v7324_v8 }
 0xc85   : > { %6851 = vpow2.f32 %v2451_v27 }
 0xc86   : > { %v2565_v33 = vpop.permute.xlu1 %2564 }
 0xc8d   : > { %v6850_v5 = vpop.eup %6849 }
 0xc8e   : > { %v2453_v6 = vsel %vm2042_vm13, %v6850_v5, 0.0 }
 0xc8f   : > { %v6852_v41 = vpop.eup %6851  ;;  %2454 = vadd.xlane.f32.xlu0 %v2453_v6 }
 0xc90   : > { %v2456_v12 = vsel %vm2042_vm13, %v6852_v41, 0.0 }
 0xc93   : > { %2457 = vadd.xlane.f32.xlu0 %v2456_v12 }
 0xca9   : > { %2566 = vrot.lane.b32.xlu0 %v8127_v62, %s7329_s1 }
 0xd1c   : > { %v2455_v17 = vpop.xlane.xlu0 %2454 }
 0xd1d   : > { %6853 = vrcp.f32 %v2455_v17 }
 0xd20   : > { %v2458_v20 = vpop.xlane.xlu0 %2457 }
 0xd21   : > { %6855 = vrcp.f32 %v2458_v20 }
 0xd24   : > { %v2567_v23 = vpop.permute.xlu0 %2566 }
 0xd25   : > { %v2572_v29 = vsel %vm2042_vm13, %v2567_v23, 0 }
 0xd27   : > { %v6854_v21 = vpop.eup %6853 }
 0xd28   : > { %v2461_v59 = vmul.f32 %v6854_v21, %v6850_v5 }
 0xd2b   : > { %v6856_v18 = vpop.eup %6855 }
 0xd2c   : > { %v2462_v54 = vmul.f32 %v6856_v18, %v6852_v41 }
 0xd2e   : > { %v2463_v34 = vpack.c.bf16 %v2462_v54, %v2461_v59  ;;  %v8253_v54 = vld [vmem:[#allocation14 + $0x18] sm:$0xff]  }
 0xd30   : > { %6283 = vmatmul.mubr.msk.bf16.vlgmr.msra.gmra.mrb[24].mxu0 %vm2042_vm13, %v2463_v34 }
 0xd31   : > { %6293 = vmatpush3.bf16.xpose.msra.mxu0 %v2572_v29  ;;  %6294 = vmatprep.mubr.msk.bf16.mxu0 %vm7326_vm12, %v7324_v8 }
 0xd32   : > { %6304 = vmatprep.subr.bf16.mxu0 %v7324_v8 }
 0xd38   : > { %6295 = vmatmul.mubr.msk.bf16.vlgmr.msra.gmra.mrb[28].mxu0 %vm2042_vm13, %v2565_v33 }
 0xd39   : > { %6306 = vmatprep.mubr.msk.bf16.mxu0 %vm7326_vm12, %v7324_v8  ;;  %6305 = vmatpush3.bf16.msra.mxu0 %v8253_v54 }
 0xd3a   : > { %6316 = vmatprep.subr.bf16.mxu0 %v7324_v8 }
 0xe03   : > { %v2504_v43 = vpop.f32.mrb[24].mxu0 }
 0xe04   : > { %v6284_v10 = vpop.f32.mrb[25].mxu0 }
 0xe05   : > { %v2507_v51 = vpop.f32.mrb[26].mxu0 }
 0xe06   : > { %v2511_v28 = vpack.c.bf16 %v2507_v51, %v2504_v43  ;;  %v6285_v32 = vpop.f32.mrb[27].mxu0 }
 0xe08   : > { %6289 = vmatmul.mubr.msk.bf16.vlgmr.msra.gmra.mrb[24].mxu1 %vm2042_vm13, %v2511_v28 }
 0xe09   : > { %6300 = vmatprep.mubr.msk.bf16.mxu1 %vm7326_vm12, %v7324_v8 }
 0xe0b   : > { %v2608_v36 = vpop.f32.mrb[28].mxu0 }
 0xe0c   : > { %v2615_v56 = vmul.f32 0.25, %v2608_v36  ;;  %v6296_v7 = vpop.f32.mrb[29].mxu0 }
 0xe0d   : > { %v2611_v61 = vpop.f32.mrb[30].mxu0 }
 0xe0e   : > { %v2616_v49 = vmul.f32 0.25, %v2611_v61  ;;  %v6297_v19 = vpop.f32.mrb[31].mxu0  ;;  %v2617_v42 = vsel %vm2042_vm13, %v2615_v56, -inf }
 0xe0f   : > { %2618 = vmax.xlane.f32.xlu1 %v2617_v42 }
 0xe10   : > { %v2620_v50 = vsel %vm2042_vm13, %v2616_v49, -inf }
 0xe11   : > { %2621 = vmax.xlane.f32.xlu0 %v2620_v50 }
 0xe9c   : > { %v2619_v38 = vpop.xlane.xlu1 %2618 }
 0xe9d   : > { %v2623_v9 = vsub.f32 %v2615_v56, %v2619_v38 }
 0xe9e   : > { %v2622_v44 = vpop.xlane.xlu0 %2621 }
 0xe9f   : > { %v2625_v3 = vmul.f32 1.442695, %v2623_v9  ;;  %v2624_v31 = vsub.f32 %v2616_v49, %v2622_v44 }
 0xea1   : > { %6857 = vpow2.f32 %v2625_v3  ;;  %v2627_v52 = vmul.f32 1.442695, %v2624_v31 }
 0xea3   : > { %6859 = vpow2.f32 %v2627_v52 }
 0xeab   : > { %v6858_v11 = vpop.eup %6857 }
 0xeac   : > { %v2629_v0 = vsel %vm2042_vm13, %v6858_v11, 0.0 }
 0xead   : > { %v6860_v57 = vpop.eup %6859  ;;  %2630 = vadd.xlane.f32.xlu0 %v2629_v0 }
 0xeae   : > { %v2632_v39 = vsel %vm2042_vm13, %v6860_v57, 0.0 }
 0xeaf   : > { %2633 = vadd.xlane.f32.xlu1 %v2632_v39 }
 0xec0   : > { %2742 = vrot.lane.b32.xlu1 %v8127_v62, %s7330_s8 }
 0xec3   : > { %2640 = vrot.lane.b32.xlu0 %v8154_v16, %s7329_s1 }
 0xec4   : > { %2740 = vrot.lane.b32.xlu1 %v8125_v24, %s7330_s8 }
 0xedb   : > { %v2555_v13 = vpop.f32.mrb[24].mxu1 }
 0xedc   : > { %v8239_v58 = vadd.f32 %v2555_v13, %v8198_v55  ;;  %v6290_v2 = vpop.f32.mrb[25].mxu1 }
 0xedd   : > { %v2558_v60 = vpop.f32.mrb[26].mxu1 }
 0xede   : > { %v8242_v45 = vadd.f32 %v2558_v60, %v8200_v35  ;;  %v6291_v27 = vpop.f32.mrb[27].mxu1 }
 0xf3a   : > { %v2631_v5 = vpop.xlane.xlu0 %2630 }
 0xf3b   : > { %6861 = vrcp.f32 %v2631_v5 }
 0xf3c   : > { %v2634_v6 = vpop.xlane.xlu1 %2633 }
 0xf3d   : > { %6863 = vrcp.f32 %v2634_v6 }
 0xf3e   : > { %v2641_v41 = vpop.permute.xlu0 %2640 }
 0xf3f   : > { %6299 = vmatpush3.bf16.msra.mxu1 %v2641_v41 }
 0xf40   : > { %6310 = vmatprep.subr.bf16.mxu1 %v7324_v8  ;;  %v2743_v55 = vpop.permute.xlu1 %2742 }
 0xf41   : > { %v2748_v59 = vsel %vm2042_vm13, %v2743_v55, 0 }
 0xf44   : > { %v2741_v35 = vpop.permute.xlu1 %2740 }
 0xf45   : > { %v6862_v12 = vpop.eup %6861 }
 0xf46   : > { %v2637_v20 = vmul.f32 %v6862_v12, %v6858_v11 }
 0xf47   : > { %v6864_v17 = vpop.eup %6863 }
 0xf48   : > { %v2638_v21 = vmul.f32 %v6864_v17, %v6860_v57 }
 0xf4a   : > { %v2639_v18 = vpack.c.bf16 %v2638_v21, %v2637_v20 }
 0xf4c   : > { %6301 = vmatmul.mubr.msk.bf16.vlgmr.msra.gmra.mrb[28].mxu1 %vm2042_vm13, %v2639_v18 }
 0xf4d   : > { %6311 = vmatpush3.bf16.xpose.msra.mxu1 %v2748_v59  ;;  %6312 = vmatprep.mubr.msk.bf16.mxu1 %vm7326_vm12, %v7324_v8 }
 0xf4e   : > { %6322 = vmatprep.subr.bf16.mxu1 %v7324_v8 }
 0xf54   : > { %6313 = vmatmul.mubr.msk.bf16.vlgmr.msra.gmra.mrb[32].mxu1 %vm2042_vm13, %v2741_v35 }
 0xf55   : > { %6324 = vmatprep.mubr.msk.bf16.mxu1 %vm7326_vm12, %v7324_v8 }
0x101f   : > { %v2680_v23 = vpop.f32.mrb[28].mxu1 }
0x1020   : > { %v6302_v34 = vpop.f32.mrb[29].mxu1 }
0x1021   : > { %v2683_v29 = vpop.f32.mrb[30].mxu1 }
0x1022   : > { %v2687_v33 = vpack.c.bf16 %v2683_v29, %v2680_v23  ;;  %v6303_v43 = vpop.f32.mrb[31].mxu1 }
0x1024   : > { %6307 = vmatmul.mubr.msk.bf16.vlgmr.msra.gmra.mrb[32].mxu0 %vm2042_vm13, %v2687_v33 }
0x1025   : > { %6318 = vmatprep.mubr.msk.bf16.mxu0 %vm7326_vm12, %v7324_v8 }
0x1027   : > { %v2784_v10 = vpop.f32.mrb[32].mxu1 }
0x1028   : > { %v2791_v51 = vmul.f32 0.25, %v2784_v10  ;;  %v6314_v28 = vpop.f32.mrb[33].mxu1 }
0x1029   : > { %v2787_v32 = vpop.f32.mrb[34].mxu1 }
0x102a   : > { %v2792_v36 = vmul.f32 0.25, %v2787_v32  ;;  %v6315_v56 = vpop.f32.mrb[35].mxu1  ;;  %v2793_v7 = vsel %vm2042_vm13, %v2791_v51, -inf }
0x102b   : > { %2794 = vmax.xlane.f32.xlu1 %v2793_v7 }
0x102c   : > { %v2796_v61 = vsel %vm2042_vm13, %v2792_v36, -inf }
0x102d   : > { %2797 = vmax.xlane.f32.xlu0 %v2796_v61 }
0x103c   : > { %2816 = vrot.lane.b32.xlu1 %v8154_v16, %s7330_s8 }
0x1040   : > { %2916 = vrot.lane.b32.xlu1 %v8125_v24, %s7331_s16 }
0x10b8   : > { %v2795_v49 = vpop.xlane.xlu1 %2794 }
0x10b9   : > { %v2799_v19 = vsub.f32 %v2791_v51, %v2795_v49 }
0x10ba   : > { %v2798_v42 = vpop.xlane.xlu0 %2797 }
0x10bb   : > { %v2801_v50 = vmul.f32 1.442695, %v2799_v19  ;;  %v2800_v38 = vsub.f32 %v2792_v36, %v2798_v42 }
0x10bc   : > { %v2817_v9 = vpop.permute.xlu1 %2816 }
0x10bd   : > { %6865 = vpow2.f32 %v2801_v50  ;;  %v2803_v44 = vmul.f32 1.442695, %v2800_v38  ;;  %6317 = vmatpush3.bf16.msra.mxu0 %v2817_v9 }
0x10be   : > { %6328 = vmatprep.subr.bf16.mxu0 %v7324_v8 }
0x10bf   : > { %6867 = vpow2.f32 %v2803_v44 }
0x10c7   : > { %v6866_v3 = vpop.eup %6865 }
0x10c8   : > { %v2805_v31 = vsel %vm2042_vm13, %v6866_v3, 0.0 }
0x10c9   : > { %v6868_v52 = vpop.eup %6867  ;;  %2806 = vadd.xlane.f32.xlu0 %v2805_v31 }
0x10ca   : > { %v2808_v11 = vsel %vm2042_vm13, %v6868_v52, 0.0 }
0x10cd   : > { %2809 = vadd.xlane.f32.xlu0 %v2808_v11 }
0x10e3   : > { %2918 = vrot.lane.b32.xlu0 %v8127_v62, %s7331_s16 }
0x10f7   : > { %v2731_v0 = vpop.f32.mrb[32].mxu0 }
0x10f8   : > { %v2738_v57 = vadd.f32 %v2731_v0, %v8239_v58  ;;  %v6308_v39 = vpop.f32.mrb[33].mxu0  ;;  %v2917_v58 = vpop.permute.xlu1 %2916 }
0x10f9   : > { %v2734_v13 = vpop.f32.mrb[34].mxu0 }
0x10fa   : > { %v2739_v2 = vadd.f32 %v2734_v13, %v8242_v45  ;;  %v6309_v60 = vpop.f32.mrb[35].mxu0  ;;  %v8281_v45 = vld [vmem:[#allocation14 + $0x20] sm:$0xff]  }
0x10fb   : > { %6323 = vmatpush3.bf16.msra.mxu1 %v8281_v45 }
0x10fc   : > { %6334 = vmatprep.subr.bf16.mxu1 %v7324_v8 }
0x1156   : > { %v2807_v27 = vpop.xlane.xlu0 %2806 }
0x1157   : > { %6869 = vrcp.f32 %v2807_v27 }
0x115a   : > { %v2810_v5 = vpop.xlane.xlu0 %2809 }
0x115b   : > { %6871 = vrcp.f32 %v2810_v5 }
0x115e   : > { %v2919_v20 = vpop.permute.xlu0 %2918 }
0x115f   : > { %v2924_v55 = vsel %vm2042_vm13, %v2919_v20, 0 }
0x1161   : > { %v6870_v6 = vpop.eup %6869 }
0x1162   : > { %v2813_v12 = vmul.f32 %v6870_v6, %v6866_v3 }
0x1165   : > { %v6872_v41 = vpop.eup %6871 }
0x1166   : > { %v2814_v17 = vmul.f32 %v6872_v41, %v6868_v52 }
0x1168   : > { %v2815_v21 = vpack.c.bf16 %v2814_v17, %v2813_v12 }
0x116a   : > { %6319 = vmatmul.mubr.msk.bf16.vlgmr.msra.gmra.mrb[36].mxu0 %vm2042_vm13, %v2815_v21  ;;  %v8311_v21 = vld [vmem:[#allocation14 + $0x28] sm:$0xff]  }
0x116b   : > { %6329 = vmatpush3.bf16.xpose.msra.mxu0 %v2924_v55  ;;  %6330 = vmatprep.mubr.msk.bf16.mxu0 %vm7326_vm12, %v7324_v8 }
0x116c   : > { %6340 = vmatprep.subr.bf16.mxu0 %v7324_v8 }
0x1172   : > { %6331 = vmatmul.mubr.msk.bf16.vlgmr.msra.gmra.mrb[40].mxu0 %vm2042_vm13, %v2917_v58 }
0x1173   : > { %6342 = vmatprep.mubr.msk.bf16.mxu0 %vm7326_vm12, %v7324_v8  ;;  %6341 = vmatpush3.bf16.msra.mxu0 %v8311_v21 }
0x1174   : > { %6352 = vmatprep.subr.bf16.mxu0 %v7324_v8 }
0x123d   : > { %v2856_v18 = vpop.f32.mrb[36].mxu0 }
0x123e   : > { %v6320_v59 = vpop.f32.mrb[37].mxu0 }
0x123f   : > { %v2859_v35 = vpop.f32.mrb[38].mxu0 }
0x1240   : > { %v2863_v23 = vpack.c.bf16 %v2859_v35, %v2856_v18  ;;  %v6321_v34 = vpop.f32.mrb[39].mxu0 }
0x1242   : > { %6325 = vmatmul.mubr.msk.bf16.vlgmr.msra.gmra.mrb[36].mxu1 %vm2042_vm13, %v2863_v23 }
0x1243   : > { %6336 = vmatprep.mubr.msk.bf16.mxu1 %vm7326_vm12, %v7324_v8 }
0x1245   : > { %v2960_v29 = vpop.f32.mrb[40].mxu0 }
0x1246   : > { %v2967_v33 = vmul.f32 0.25, %v2960_v29  ;;  %v6332_v43 = vpop.f32.mrb[41].mxu0 }
0x1247   : > { %v2963_v10 = vpop.f32.mrb[42].mxu0 }
0x1248   : > { %v2968_v51 = vmul.f32 0.25, %v2963_v10  ;;  %v6333_v28 = vpop.f32.mrb[43].mxu0  ;;  %v2969_v32 = vsel %vm2042_vm13, %v2967_v33, -inf }
0x1249   : > { %2970 = vmax.xlane.f32.xlu1 %v2969_v32 }
0x124a   : > { %v2972_v36 = vsel %vm2042_vm13, %v2968_v51, -inf }
0x124b   : > { %2973 = vmax.xlane.f32.xlu0 %v2972_v36 }
0x12d6   : > { %v2971_v56 = vpop.xlane.xlu1 %2970 }
0x12d7   : > { %v2975_v7 = vsub.f32 %v2967_v33, %v2971_v56 }
0x12d8   : > { %v2974_v61 = vpop.xlane.xlu0 %2973 }
0x12d9   : > { %v2977_v49 = vmul.f32 1.442695, %v2975_v7  ;;  %v2976_v19 = vsub.f32 %v2968_v51, %v2974_v61 }
0x12db   : > { %6873 = vpow2.f32 %v2977_v49  ;;  %v2979_v42 = vmul.f32 1.442695, %v2976_v19 }
0x12dd   : > { %6875 = vpow2.f32 %v2979_v42 }
0x12e5   : > { %v6874_v50 = vpop.eup %6873 }
0x12e6   : > { %v2981_v38 = vsel %vm2042_vm13, %v6874_v50, 0.0 }
0x12e7   : > { %v6876_v9 = vpop.eup %6875  ;;  %2982 = vadd.xlane.f32.xlu0 %v2981_v38 }
0x12e8   : > { %v2984_v44 = vsel %vm2042_vm13, %v6876_v9, 0.0 }
0x12e9   : > { %2985 = vadd.xlane.f32.xlu1 %v2984_v44 }
0x12fa   : > { %3094 = vrot.lane.b32.xlu1 %v8127_v62, %s7332_s6 }
0x12fd   : > { %2992 = vrot.lane.b32.xlu0 %v8154_v16, %s7331_s16 }
0x12fe   : > { %3092 = vrot.lane.b32.xlu1 %v8125_v24, %s7332_s6 }
0x1315   : > { %v2907_v3 = vpop.f32.mrb[36].mxu1 }
0x1316   : > { %v8298_v31 = vadd.f32 %v2907_v3, %v2738_v57  ;;  %v6326_v52 = vpop.f32.mrb[37].mxu1 }
0x1317   : > { %v2910_v11 = vpop.f32.mrb[38].mxu1 }
0x1318   : > { %v8300_v0 = vadd.f32 %v2910_v11, %v2739_v2  ;;  %v6327_v39 = vpop.f32.mrb[39].mxu1 }
0x1374   : > { %v2983_v13 = vpop.xlane.xlu0 %2982 }
0x1375   : > { %6877 = vrcp.f32 %v2983_v13 }
0x1376   : > { %v2986_v60 = vpop.xlane.xlu1 %2985 }
0x1377   : > { %6879 = vrcp.f32 %v2986_v60 }
0x1378   : > { %v2993_v27 = vpop.permute.xlu0 %2992 }
0x1379   : > { %6335 = vmatpush3.bf16.msra.mxu1 %v2993_v27 }
0x137a   : > { %6346 = vmatprep.subr.bf16.mxu1 %v7324_v8  ;;  %v3095_v17 = vpop.permute.xlu1 %3094 }
0x137b   : > { %v3100_v20 = vsel %vm2042_vm13, %v3095_v17, 0 }
0x137e   : > { %v3093_v2 = vpop.permute.xlu1 %3092 }
0x137f   : > { %v6878_v5 = vpop.eup %6877 }
0x1380   : > { %v2989_v41 = vmul.f32 %v6878_v5, %v6874_v50 }
0x1381   : > { %v6880_v6 = vpop.eup %6879 }
0x1382   : > { %v2990_v12 = vmul.f32 %v6880_v6, %v6876_v9 }
0x1384   : > { %v2991_v57 = vpack.c.bf16 %v2990_v12, %v2989_v41 }
0x1386   : > { %6337 = vmatmul.mubr.msk.bf16.vlgmr.msra.gmra.mrb[40].mxu1 %vm2042_vm13, %v2991_v57 }
0x1387   : > { %6347 = vmatpush3.bf16.xpose.msra.mxu1 %v3100_v20  ;;  %6348 = vmatprep.mubr.msk.bf16.mxu1 %vm7326_vm12, %v7324_v8 }
0x1388   : > { %6358 = vmatprep.subr.bf16.mxu1 %v7324_v8 }
0x138e   : > { %6349 = vmatmul.mubr.msk.bf16.vlgmr.msra.gmra.mrb[44].mxu1 %vm2042_vm13, %v3093_v2 }
0x138f   : > { %6360 = vmatprep.mubr.msk.bf16.mxu1 %vm7326_vm12, %v7324_v8 }
0x1459   : > { %v3032_v55 = vpop.f32.mrb[40].mxu1 }
0x145a   : > { %v6338_v58 = vpop.f32.mrb[41].mxu1 }
0x145b   : > { %v3035_v18 = vpop.f32.mrb[42].mxu1 }
0x145c   : > { %v3039_v59 = vpack.c.bf16 %v3035_v18, %v3032_v55  ;;  %v6339_v35 = vpop.f32.mrb[43].mxu1 }
0x145e   : > { %6343 = vmatmul.mubr.msk.bf16.vlgmr.msra.gmra.mrb[44].mxu0 %vm2042_vm13, %v3039_v59 }
0x145f   : > { %6354 = vmatprep.mubr.msk.bf16.mxu0 %vm7326_vm12, %v7324_v8 }
0x1461   : > { %v3136_v23 = vpop.f32.mrb[44].mxu1 }
0x1462   : > { %v3143_v34 = vmul.f32 0.25, %v3136_v23  ;;  %v6350_v29 = vpop.f32.mrb[45].mxu1 }
0x1463   : > { %v3139_v33 = vpop.f32.mrb[46].mxu1 }
0x1464   : > { %v3144_v43 = vmul.f32 0.25, %v3139_v33  ;;  %v6351_v10 = vpop.f32.mrb[47].mxu1  ;;  %v3145_v51 = vsel %vm2042_vm13, %v3143_v34, -inf }
0x1465   : > { %3146 = vmax.xlane.f32.xlu1 %v3145_v51 }
0x1466   : > { %v3148_v28 = vsel %vm2042_vm13, %v3144_v43, -inf }
0x1467   : > { %3149 = vmax.xlane.f32.xlu0 %v3148_v28 }
0x1476   : > { %3168 = vrot.lane.b32.xlu1 %v8154_v16, %s7332_s6 }
0x147a   : > { %3268 = vrot.lane.b32.xlu1 %v8125_v24, %s7333_s21 }
0x14f2   : > { %v3147_v32 = vpop.xlane.xlu1 %3146 }
0x14f3   : > { %v3151_v36 = vsub.f32 %v3143_v34, %v3147_v32 }
0x14f4   : > { %v3150_v56 = vpop.xlane.xlu0 %3149 }
0x14f5   : > { %v3153_v7 = vmul.f32 1.442695, %v3151_v36  ;;  %v3152_v61 = vsub.f32 %v3144_v43, %v3150_v56 }
0x14f6   : > { %v3169_v49 = vpop.permute.xlu1 %3168 }
0x14f7   : > { %6881 = vpow2.f32 %v3153_v7  ;;  %v3155_v19 = vmul.f32 1.442695, %v3152_v61  ;;  %6353 = vmatpush3.bf16.msra.mxu0 %v3169_v49 }
0x14f8   : > { %6364 = vmatprep.subr.bf16.mxu0 %v7324_v8 }
0x14f9   : > { %6883 = vpow2.f32 %v3155_v19 }
0x1501   : > { %v6882_v42 = vpop.eup %6881 }
0x1502   : > { %v3157_v50 = vsel %vm2042_vm13, %v6882_v42, 0.0 }
0x1503   : > { %v6884_v38 = vpop.eup %6883  ;;  %3158 = vadd.xlane.f32.xlu0 %v3157_v50 }
0x1504   : > { %v3160_v9 = vsel %vm2042_vm13, %v6884_v38, 0.0 }
0x1507   : > { %3161 = vadd.xlane.f32.xlu0 %v3160_v9 }
0x151d   : > { %3270 = vrot.lane.b32.xlu0 %v8127_v62, %s7333_s21 }
0x1531   : > { %v3083_v24 = vpop.f32.mrb[44].mxu0 }
0x1532   : > { %v3090_v44 = vadd.f32 %v3083_v24, %v8298_v31  ;;  %v6344_v3 = vpop.f32.mrb[45].mxu0  ;;  %v3269_v31 = vpop.permute.xlu1 %3268 }
0x1533   : > { %v3086_v52 = vpop.f32.mrb[46].mxu0 }
0x1534   : > { %v3091_v11 = vadd.f32 %v3086_v52, %v8300_v0  ;;  %v6345_v39 = vpop.f32.mrb[47].mxu0  ;;  %v8339_v0 = vld [vmem:[#allocation14 + $0x30] sm:$0xff]  }
0x1535   : > { %6359 = vmatpush3.bf16.msra.mxu1 %v8339_v0 }
0x1536   : > { %6370 = vmatprep.subr.bf16.mxu1 %v7324_v8 }
0x1590   : > { %v3159_v13 = vpop.xlane.xlu0 %3158 }
0x1591   : > { %6885 = vrcp.f32 %v3159_v13 }
0x1594   : > { %v3162_v60 = vpop.xlane.xlu0 %3161 }
0x1595   : > { %6887 = vrcp.f32 %v3162_v60 }
0x1598   : > { %v3271_v12 = vpop.permute.xlu0 %3270 }
0x1599   : > { %v3276_v62 = vsel %vm2042_vm13, %v3271_v12, 0 }
0x159b   : > { %v6886_v27 = vpop.eup %6885 }
0x159c   : > { %v3165_v6 = vmul.f32 %v6886_v27, %v6882_v42 }
0x159f   : > { %v6888_v5 = vpop.eup %6887 }
0x15a0   : > { %v3166_v41 = vmul.f32 %v6888_v5, %v6884_v38 }
0x15a2   : > { %v3167_v17 = vpack.c.bf16 %v3166_v41, %v3165_v6 }
0x15a4   : > { %6355 = vmatmul.mubr.msk.bf16.vlgmr.msra.gmra.mrb[48].mxu0 %vm2042_vm13, %v3167_v17  ;;  %v8378_v17 = vld [vmem:[#allocation14 + $0x38] sm:$0xff]  }
0x15a5   : > { %6365 = vmatpush3.bf16.xpose.msra.mxu0 %v3276_v62  ;;  %6366 = vmatprep.mubr.msk.bf16.mxu0 %vm7326_vm12, %v7324_v8 }
0x15a6   : > { %6376 = vmatprep.subr.bf16.mxu0 %v7324_v8 }
0x15ac   : > { %6367 = vmatmul.mubr.msk.bf16.vlgmr.msra.gmra.mrb[52].mxu0 %vm2042_vm13, %v3269_v31 }
0x15ad   : > { %6378 = vmatprep.mubr.msk.bf16.mxu0 %vm7326_vm12, %v7324_v8  ;;  %6377 = vmatpush3.bf16.msra.mxu0 %v8378_v17 }
0x15ae   : > { %6388 = vmatprep.subr.bf16.mxu0 %v7324_v8 }
0x1677   : > { %v3208_v57 = vpop.f32.mrb[48].mxu0 }
0x1678   : > { %v6356_v20 = vpop.f32.mrb[49].mxu0 }
0x1679   : > { %v3211_v2 = vpop.f32.mrb[50].mxu0 }
0x167a   : > { %v3215_v55 = vpack.c.bf16 %v3211_v2, %v3208_v57  ;;  %v6357_v58 = vpop.f32.mrb[51].mxu0 }
0x167c   : > { %6361 = vmatmul.mubr.msk.bf16.vlgmr.msra.gmra.mrb[48].mxu1 %vm2042_vm13, %v3215_v55 }
0x167d   : > { %6372 = vmatprep.mubr.msk.bf16.mxu1 %vm7326_vm12, %v7324_v8 }
0x167f   : > { %v3312_v18 = vpop.f32.mrb[52].mxu0 }
0x1680   : > { %v3319_v59 = vmul.f32 0.25, %v3312_v18  ;;  %v6368_v35 = vpop.f32.mrb[53].mxu0 }
0x1681   : > { %v3315_v23 = vpop.f32.mrb[54].mxu0 }
0x1682   : > { %v3320_v34 = vmul.f32 0.25, %v3315_v23  ;;  %v6369_v29 = vpop.f32.mrb[55].mxu0  ;;  %v3321_v33 = vsel %vm2042_vm13, %v3319_v59, -inf }
0x1683   : > { %3322 = vmax.xlane.f32.xlu1 %v3321_v33 }
0x1684   : > { %v3324_v43 = vsel %vm2042_vm13, %v3320_v34, -inf }
0x1685   : > { %3325 = vmax.xlane.f32.xlu0 %v3324_v43 }
0x1710   : > { %v3323_v10 = vpop.xlane.xlu1 %3322 }
0x1711   : > { %v3327_v51 = vsub.f32 %v3319_v59, %v3323_v10 }
0x1712   : > { %v3326_v28 = vpop.xlane.xlu0 %3325 }
0x1713   : > { %v3329_v32 = vmul.f32 1.442695, %v3327_v51  ;;  %v3328_v36 = vsub.f32 %v3320_v34, %v3326_v28 }
0x1715   : > { %6889 = vpow2.f32 %v3329_v32  ;;  %v3331_v56 = vmul.f32 1.442695, %v3328_v36 }
0x1717   : > { %6891 = vpow2.f32 %v3331_v56 }
0x171f   : > { %v6890_v7 = vpop.eup %6889 }
0x1720   : > { %v3333_v61 = vsel %vm2042_vm13, %v6890_v7, 0.0 }
0x1721   : > { %v6892_v49 = vpop.eup %6891  ;;  %3334 = vadd.xlane.f32.xlu0 %v3333_v61 }
0x1722   : > { %v3336_v19 = vsel %vm2042_vm13, %v6892_v49, 0.0 }
0x1723   : > { %3337 = vadd.xlane.f32.xlu1 %v3336_v19 }
0x1734   : > { %3570 = vrot.lane.b32.xlu1 %v8152_v48, %s7327_s3 }
0x1737   : > { %3344 = vrot.lane.b32.xlu0 %v8154_v16, %s7333_s21 }
0x1738   : > { %3567 = vrot.lane.b32.xlu1 %v8148_v1, %s7327_s3 }
0x174f   : > { %v3259_v42 = vpop.f32.mrb[48].mxu1 }
0x1750   : > { %v8356_v50 = vadd.f32 %v3259_v42, %v3090_v44  ;;  %v6362_v38 = vpop.f32.mrb[49].mxu1  ;;  %v3452_v44 = vsel %vm2042_vm13, %v8152_v48, 0 }
0x1751   : > { %v3262_v9 = vpop.f32.mrb[50].mxu1 }
0x1752   : > { %v8358_v24 = vadd.f32 %v3262_v9, %v3091_v11  ;;  %v6363_v3 = vpop.f32.mrb[51].mxu1 }
0x17ae   : > { %v3335_v52 = vpop.xlane.xlu0 %3334 }
0x17af   : > { %6893 = vrcp.f32 %v3335_v52 }
0x17b0   : > { %v3338_v39 = vpop.xlane.xlu1 %3337 }
0x17b1   : > { %6895 = vrcp.f32 %v3338_v39 }
0x17b2   : > { %v3345_v13 = vpop.permute.xlu0 %3344 }
0x17b3   : > { %6371 = vmatpush3.bf16.msra.mxu1 %v3345_v13 }
0x17b4   : > { %6382 = vmatprep.subr.bf16.mxu1 %v7324_v8  ;;  %v3571_v11 = vpop.permute.xlu1 %3570 }
0x17b5   : > { %v3576_v41 = vsel %vm2042_vm13, %v3571_v11, 0 }
0x17b8   : > { %v3568_v12 = vpop.permute.xlu1 %3567 }
0x17b9   : > { %v6894_v16 = vpop.eup %6893 }
0x17ba   : > { %v3341_v27 = vmul.f32 %v6894_v16, %v6890_v7 }
0x17bb   : > { %v6896_v60 = vpop.eup %6895 }
0x17bc   : > { %v3342_v5 = vmul.f32 %v6896_v60, %v6892_v49 }
0x17be   : > { %v3343_v6 = vpack.c.bf16 %v3342_v5, %v3341_v27 }
0x17c0   : > { %6373 = vmatmul.mubr.msk.bf16.vlgmr.msra.gmra.mrb[52].mxu1 %vm2042_vm13, %v3343_v6 }
0x17c1   : > { %6383 = vmatpush3.bf16.xpose.msra.mxu1 %v3452_v44  ;;  %6384 = vmatprep.mubr.msk.bf16.mxu1 %vm7326_vm12, %v7324_v8 }
0x17c2   : > { %6394 = vmatprep.subr.bf16.mxu1 %v7324_v8 }
0x17c8   : > { %6385 = vmatmul.mubr.msk.bf16.vlgmr.msra.gmra.mrb[56].mxu1 %vm2042_vm13, %v8148_v1 }
0x17c9   : > { %6395 = vmatpush3.bf16.xpose.msra.mxu1 %v3576_v41  ;;  %6396 = vmatprep.mubr.msk.bf16.mxu1 %vm7326_vm12, %v7324_v8 }
0x17ca   : > { %6406 = vmatprep.subr.bf16.mxu1 %v7324_v8 }
0x17d0   : > { %6397 = vmatmul.mubr.msk.bf16.vlgmr.msra.gmra.mrb[60].mxu1 %vm2042_vm13, %v3568_v12 }
0x17d1   : > { %6407 = vmatpush3.bf16.msra.mxu1 %v8175_v4  ;;  %6408 = vmatprep.mubr.msk.bf16.mxu1 %vm7326_vm12, %v7324_v8 }
0x17d2   : > { %6418 = vmatprep.subr.bf16.mxu1 %v7324_v8 }
0x1893   : > { %v3384_v62 = vpop.f32.mrb[52].mxu1 }
0x1894   : > { %v6374_v31 = vpop.f32.mrb[53].mxu1 }
0x1895   : > { %v3387_v57 = vpop.f32.mrb[54].mxu1 }
0x1896   : > { %v3391_v20 = vpack.c.bf16 %v3387_v57, %v3384_v62  ;;  %v6375_v2 = vpop.f32.mrb[55].mxu1 }
0x1898   : > { %6379 = vmatmul.mubr.msk.bf16.vlgmr.msra.gmra.mrb[56].mxu0 %vm2042_vm13, %v3391_v20 }
0x1899   : > { %6389 = vmatpush3.bf16.msra.mxu0 %v8150_v15  ;;  %6390 = vmatprep.mubr.msk.bf16.mxu0 %vm7326_vm12, %v7324_v8 }
0x189a   : > { %6400 = vmatprep.subr.bf16.mxu0 %v7324_v8 }
0x189b   : > { %v3488_v4 = vpop.f32.mrb[56].mxu1 }
0x189c   : > { %v3495_v55 = vmul.f32 0.25, %v3488_v4  ;;  %v6386_v58 = vpop.f32.mrb[57].mxu1 }
0x189d   : > { %v3491_v18 = vpop.f32.mrb[58].mxu1 }
0x189e   : > { %v3496_v59 = vmul.f32 0.25, %v3491_v18  ;;  %v6387_v35 = vpop.f32.mrb[59].mxu1  ;;  %v3497_v23 = vsel %vm2042_vm13, %v3495_v55, -inf }
0x189f   : > { %3498 = vmax.xlane.f32.xlu1 %v3497_v23 }
0x18a0   : > { %v3500_v34 = vsel %vm2042_vm13, %v3496_v59, -inf }
0x18a1   : > { %3501 = vmax.xlane.f32.xlu0 %v3500_v34 }
0x18a3   : > { %v3612_v29 = vpop.f32.mrb[60].mxu1 }
0x18a4   : > { %v3619_v33 = vmul.f32 0.25, %v3612_v29  ;;  %v6398_v43 = vpop.f32.mrb[61].mxu1 }
0x18a5   : > { %v3615_v10 = vpop.f32.mrb[62].mxu1 }
0x18a6   : > { %v3620_v51 = vmul.f32 0.25, %v3615_v10  ;;  %v6399_v28 = vpop.f32.mrb[63].mxu1  ;;  %v3621_v32 = vsel %vm2042_vm13, %v3619_v33, -inf }
0x18a7   : > { %3622 = vmax.xlane.f32.xlu0 %v3621_v32 }
0x18a8   : > { %v3624_v36 = vsel %vm2042_vm13, %v3620_v51, -inf }
0x18ab   : > { %3625 = vmax.xlane.f32.xlu0 %v3624_v36 }
0x192c   : > { %v3499_v56 = vpop.xlane.xlu1 %3498 }
0x192d   : > { %v3503_v7 = vsub.f32 %v3495_v55, %v3499_v56 }
0x192e   : > { %v3502_v61 = vpop.xlane.xlu0 %3501 }
0x192f   : > { %v3505_v49 = vmul.f32 1.442695, %v3503_v7  ;;  %v3504_v19 = vsub.f32 %v3496_v59, %v3502_v61 }
0x1931   : > { %6897 = vpow2.f32 %v3505_v49  ;;  %v3507_v42 = vmul.f32 1.442695, %v3504_v19 }
0x1933   : > { %6899 = vpow2.f32 %v3507_v42 }
0x1934   : > { %v3623_v38 = vpop.xlane.xlu0 %3622 }
0x1935   : > { %v3627_v9 = vsub.f32 %v3619_v33, %v3623_v38 }
0x1937   : > { %v3629_v3 = vmul.f32 1.442695, %v3627_v9 }
0x1938   : > { %v3626_v52 = vpop.xlane.xlu0 %3625 }
0x1939   : > { %6901 = vpow2.f32 %v3629_v3  ;;  %v3628_v39 = vsub.f32 %v3620_v51, %v3626_v52 }
0x193b   : > { %v6898_v13 = vpop.eup %6897  ;;  %v3631_v16 = vmul.f32 1.442695, %v3628_v39 }
0x193c   : > { %v3509_v60 = vsel %vm2042_vm13, %v6898_v13, 0.0 }
0x193d   : > { %v6900_v27 = vpop.eup %6899  ;;  %6903 = vpow2.f32 %v3631_v16  ;;  %3510 = vadd.xlane.f32.xlu1 %v3509_v60 }
0x193e   : > { %v3512_v5 = vsel %vm2042_vm13, %v6900_v27, 0.0 }
0x193f   : > { %3513 = vadd.xlane.f32.xlu0 %v3512_v5 }
0x1943   : > { %v6902_v6 = vpop.eup %6901 }
0x1944   : > { %v3633_v44 = vsel %vm2042_vm13, %v6902_v6, 0.0 }
0x1945   : > { %3634 = vadd.xlane.f32.xlu1 %v3633_v44 }
0x1947   : > { %v6904_v11 = vpop.eup %6903 }
0x1948   : > { %v3636_v41 = vsel %vm2042_vm13, %v6904_v11, 0.0 }
0x1949   : > { %3637 = vadd.xlane.f32.xlu0 %v3636_v41 }
0x1956   : > { %3645 = vrot.lane.b32.xlu1 %v8150_v15, %s7327_s3 }
0x195a   : > { %3781 = vrot.lane.b32.xlu1 %v8148_v1, %s7328_s13 }
0x195f   : > { %3783 = vrot.lane.b32.xlu0 %v8152_v48, %s7328_s13 }
0x196b   : > { %v3435_v12 = vpop.f32.mrb[56].mxu0 }
0x196c   : > { %v8402_v62 = vadd.f32 %v3435_v12, %v8356_v50  ;;  %v6380_v31 = vpop.f32.mrb[57].mxu0 }
0x196d   : > { %v3438_v57 = vpop.f32.mrb[58].mxu0 }
0x196e   : > { %v8405_v20 = vadd.f32 %v3438_v57, %v8358_v24  ;;  %v6381_v2 = vpop.f32.mrb[59].mxu0 }
0x19ca   : > { %v3511_v4 = vpop.xlane.xlu1 %3510 }
0x19cb   : > { %6905 = vrcp.f32 %v3511_v4 }
0x19cc   : > { %v3514_v55 = vpop.xlane.xlu0 %3513 }
0x19cd   : > { %6907 = vrcp.f32 %v3514_v55 }
0x19d2   : > { %v3635_v58 = vpop.xlane.xlu1 %3634 }
0x19d3   : > { %6909 = vrcp.f32 %v3635_v58 }
0x19d5   : > { %v6906_v18 = vpop.eup %6905 }
0x19d6   : > { %v3638_v59 = vpop.xlane.xlu0 %3637  ;;  %v3517_v23 = vmul.f32 %v6906_v18, %v6898_v13  ;;  %v3646_v29 = vpop.permute.xlu1 %3645 }
0x19d7   : > { %v6908_v35 = vpop.eup %6907  ;;  %6911 = vrcp.f32 %v3638_v59 }
0x19d8   : > { %v3518_v34 = vmul.f32 %v6908_v35, %v6900_v27 }
0x19da   : > { %v3519_v50 = vpack.c.bf16 %v3518_v34, %v3517_v23  ;;  %v3784_v19 = vpop.permute.xlu0 %3783  ;;  %v3782_v3 = vpop.permute.xlu1 %3781 }
0x19db   : > { %v3789_v9 = vsel %vm2042_vm13, %v3784_v19, 0 }
0x19dc   : > { %6391 = vmatmul.mubr.msk.bf16.vlgmr.msra.gmra.mrb[60].mxu0 %vm2042_vm13, %v3519_v50 }
0x19dd   : > { %6401 = vmatpush3.bf16.msra.mxu0 %v3646_v29  ;;  %6402 = vmatprep.mubr.msk.bf16.mxu0 %vm7326_vm12, %v7324_v8  ;;  %v6910_v24 = vpop.eup %6909 }
0x19de   : > { %6412 = vmatprep.subr.bf16.mxu0 %v7324_v8  ;;  %v3641_v43 = vmul.f32 %v6910_v24, %v6902_v6 }
0x19e1   : > { %v6912_v33 = vpop.eup %6911 }
0x19e2   : > { %v3642_v10 = vmul.f32 %v6912_v33, %v6904_v11 }
0x19e4   : > { %v3643_v51 = vpack.c.bf16 %v3642_v10, %v3641_v43 }
0x19e6   : > { %6403 = vmatmul.mubr.msk.bf16.vlgmr.msra.gmra.mrb[64].mxu0 %vm2042_vm13, %v3643_v51 }
0x19e7   : > { %6413 = vmatpush3.bf16.msra.mxu0 %v8180_v63  ;;  %6414 = vmatprep.mubr.msk.bf16.mxu0 %vm7326_vm12, %v7324_v8 }
0x19e8   : > { %6424 = vmatprep.subr.bf16.mxu0 %v7324_v8 }
0x1aaf   : > { %v3558_v28 = vpop.f32.mrb[60].mxu0 }
0x1ab0   : > { %v6392_v32 = vpop.f32.mrb[61].mxu0 }
0x1ab1   : > { %v3561_v36 = vpop.f32.mrb[62].mxu0 }
0x1ab2   : > { %v3565_v56 = vpack.c.bf16 %v3561_v36, %v3558_v28  ;;  %v6393_v7 = vpop.f32.mrb[63].mxu0 }
0x1ab4   : > { %6415 = vmatmul.mubr.msk.bf16.vlgmr.msra.gmra.mrb[68].mxu0 %vm2042_vm13, %v3565_v56 }
0x1ab5   : > { %6426 = vmatprep.mubr.msk.bf16.mxu0 %vm7326_vm12, %v7324_v8 }
0x1ab9   : > { %v3685_v61 = vpop.f32.mrb[64].mxu0 }
0x1aba   : > { %v6404_v49 = vpop.f32.mrb[65].mxu0 }
0x1abb   : > { %v3688_v42 = vpop.f32.mrb[66].mxu0 }
0x1abc   : > { %v3692_v63 = vpack.c.bf16 %v3688_v42, %v3685_v61  ;;  %v6405_v38 = vpop.f32.mrb[67].mxu0 }
0x1abe   : > { %6409 = vmatmul.mubr.msk.bf16.vlgmr.msra.gmra.mrb[64].mxu1 %vm2042_vm13, %v3692_v63 }
0x1abf   : > { %6419 = vmatpush3.bf16.xpose.msra.mxu1 %v3789_v9  ;;  %6420 = vmatprep.mubr.msk.bf16.mxu1 %vm7326_vm12, %v7324_v8 }
0x1ac0   : > { %6430 = vmatprep.subr.bf16.mxu1 %v7324_v8 }
0x1ac6   : > { %6421 = vmatmul.mubr.msk.bf16.vlgmr.msra.gmra.mrb[68].mxu1 %vm2042_vm13, %v3782_v3 }
0x1ac7   : > { %6431 = vmatpush3.bf16.msra.mxu1 %v8221_v22  ;;  %6432 = vmatprep.mubr.msk.bf16.mxu1 %vm7326_vm12, %v7324_v8 }
0x1ac8   : > { %6442 = vmatprep.subr.bf16.mxu1 %v7324_v8 }
0x1b87   : > { %v3774_v52 = vpop.f32.mrb[68].mxu0 }
0x1b88   : > { %v6416_v39 = vpop.f32.mrb[69].mxu0 }
0x1b89   : > { %v3777_v13 = vpop.f32.mrb[70].mxu0 }
0x1b8a   : > { %v6417_v16 = vpop.f32.mrb[71].mxu0 }
0x1b91   : > { %v3730_v60 = vpop.f32.mrb[64].mxu1 }
0x1b92   : > { %v8429_v27 = vadd.f32 %v3774_v52, %v3730_v60  ;;  %v6410_v5 = vpop.f32.mrb[65].mxu1 }
0x1b93   : > { %v3733_v6 = vpop.f32.mrb[66].mxu1 }
0x1b94   : > { %v8431_v44 = vadd.f32 %v3777_v13, %v3733_v6  ;;  %v6411_v11 = vpop.f32.mrb[67].mxu1 }
0x1b99   : > { %v3825_v41 = vpop.f32.mrb[68].mxu1 }
0x1b9a   : > { %v3832_v12 = vmul.f32 0.25, %v3825_v41  ;;  %v6422_v22 = vpop.f32.mrb[69].mxu1 }
0x1b9b   : > { %v3828_v31 = vpop.f32.mrb[70].mxu1 }
0x1b9c   : > { %v3833_v57 = vmul.f32 0.25, %v3828_v31  ;;  %v6423_v2 = vpop.f32.mrb[71].mxu1  ;;  %v3834_v4 = vsel %vm2042_vm13, %v3832_v12, -inf }
0x1b9d   : > { %3835 = vmax.xlane.f32.xlu1 %v3834_v4 }
0x1b9e   : > { %v3837_v55 = vsel %vm2042_vm13, %v3833_v57, -inf }
0x1b9f   : > { %3838 = vmax.xlane.f32.xlu0 %v3837_v55 }
0x1c2a   : > { %v3836_v58 = vpop.xlane.xlu1 %3835 }
0x1c2b   : > { %v3840_v18 = vsub.f32 %v3832_v12, %v3836_v58 }
0x1c2c   : > { %v3839_v59 = vpop.xlane.xlu0 %3838 }
0x1c2d   : > { %v3842_v35 = vmul.f32 1.442695, %v3840_v18  ;;  %v3841_v23 = vsub.f32 %v3833_v57, %v3839_v59 }
0x1c2f   : > { %6913 = vpow2.f32 %v3842_v35  ;;  %v3844_v34 = vmul.f32 1.442695, %v3841_v23 }
0x1c31   : > { %6915 = vpow2.f32 %v3844_v34 }
0x1c39   : > { %v6914_v50 = vpop.eup %6913 }
0x1c3a   : > { %v3846_v29 = vsel %vm2042_vm13, %v6914_v50, 0.0 }
0x1c3b   : > { %v6916_v24 = vpop.eup %6915  ;;  %3847 = vadd.xlane.f32.xlu0 %v3846_v29 }
0x1c3c   : > { %v3849_v33 = vsel %vm2042_vm13, %v6916_v24, 0.0 }
0x1c3d   : > { %3850 = vadd.xlane.f32.xlu1 %v3849_v33 }
0x1c4e   : > { %3953 = vrot.lane.b32.xlu1 %v8152_v48, %s7329_s1 }
0x1c51   : > { %3857 = vrot.lane.b32.xlu0 %v8150_v15, %s7328_s13  ;;  %s8808_s13 = sld [smem:[#allocation41_spill]] }
0x1c52   : > { %3951 = vrot.lane.b32.xlu1 %v8148_v1, %s7329_s1 }
0x1cc8   : > { %v3848_v43 = vpop.xlane.xlu0 %3847 }
0x1cc9   : > { %6917 = vrcp.f32 %v3848_v43 }
0x1cca   : > { %v3851_v10 = vpop.xlane.xlu1 %3850 }
0x1ccb   : > { %6919 = vrcp.f32 %v3851_v10 }
0x1ccc   : > { %v3858_v51 = vpop.permute.xlu0 %3857 }
0x1ccd   : > { %6425 = vmatpush3.bf16.msra.mxu0 %v3858_v51 }
0x1cce   : > { %6436 = vmatprep.subr.bf16.mxu0 %v7324_v8  ;;  %v3954_v7 = vpop.permute.xlu1 %3953 }
0x1ccf   : > { %v3959_v49 = vsel %vm2042_vm13, %v3954_v7, 0 }
0x1cd2   : > { %v3952_v19 = vpop.permute.xlu1 %3951 }
0x1cd3   : > { %v6918_v28 = vpop.eup %6917 }
0x1cd4   : > { %v3854_v36 = vmul.f32 %v6918_v28, %v6914_v50 }
0x1cd5   : > { %v6920_v32 = vpop.eup %6919 }
0x1cd6   : > { %v3855_v56 = vmul.f32 %v6920_v32, %v6916_v24 }
0x1cd8   : > { %v3856_v61 = vpack.c.bf16 %v3855_v56, %v3854_v36 }
0x1cda   : > { %6427 = vmatmul.mubr.msk.bf16.vlgmr.msra.gmra.mrb[72].mxu0 %vm2042_vm13, %v3856_v61 }
0x1cdb   : > { %6437 = vmatpush3.bf16.xpose.msra.mxu0 %v3959_v49  ;;  %6438 = vmatprep.mubr.msk.bf16.mxu0 %vm7326_vm12, %v7324_v8 }
0x1cdc   : > { %6448 = vmatprep.subr.bf16.mxu0 %v7324_v8 }
0x1ce2   : > { %6439 = vmatmul.mubr.msk.bf16.vlgmr.msra.gmra.mrb[76].mxu0 %vm2042_vm13, %v3952_v19 }
0x1ce3   : > { %6449 = vmatpush3.bf16.msra.mxu0 %v8253_v54  ;;  %6450 = vmatprep.mubr.msk.bf16.mxu0 %vm7326_vm12, %v7324_v8 }
0x1ce4   : > { %6460 = vmatprep.subr.bf16.mxu0 %v7324_v8 }
0x1dad   : > { %v3897_v42 = vpop.f32.mrb[72].mxu0 }
0x1dae   : > { %v6428_v63 = vpop.f32.mrb[73].mxu0 }
0x1daf   : > { %v3900_v38 = vpop.f32.mrb[74].mxu0 }
0x1db0   : > { %v3904_v9 = vpack.c.bf16 %v3900_v38, %v3897_v42  ;;  %v6429_v3 = vpop.f32.mrb[75].mxu0 }
0x1db2   : > { %6433 = vmatmul.mubr.msk.bf16.vlgmr.msra.gmra.mrb[72].mxu1 %vm2042_vm13, %v3904_v9 }
0x1db3   : > { %6444 = vmatprep.mubr.msk.bf16.mxu1 %vm7326_vm12, %v7324_v8 }
0x1db5   : > { %v3995_v52 = vpop.f32.mrb[76].mxu0 }
0x1db6   : > { %v4002_v39 = vmul.f32 0.25, %v3995_v52  ;;  %v6440_v13 = vpop.f32.mrb[77].mxu0 }
0x1db7   : > { %v3998_v16 = vpop.f32.mrb[78].mxu0 }
0x1db8   : > { %v4003_v54 = vmul.f32 0.25, %v3998_v16  ;;  %v6441_v60 = vpop.f32.mrb[79].mxu0  ;;  %v4004_v5 = vsel %vm2042_vm13, %v4002_v39, -inf }
0x1db9   : > { %4005 = vmax.xlane.f32.xlu1 %v4004_v5 }
0x1dba   : > { %v4007_v6 = vsel %vm2042_vm13, %v4003_v54, -inf }
0x1dbb   : > { %4008 = vmax.xlane.f32.xlu0 %v4007_v6 }
0x1dca   : > { %4027 = vrot.lane.b32.xlu1 %v8150_v15, %s7329_s1  ;;  %s8805_s1 = sld [smem:[#allocation42_spill]] }
0x1dce   : > { %4121 = vrot.lane.b32.xlu1 %v8148_v1, %s7330_s8 }
0x1e46   : > { %v4006_v11 = vpop.xlane.xlu1 %4005 }
0x1e47   : > { %v4010_v41 = vsub.f32 %v4002_v39, %v4006_v11 }
0x1e48   : > { %v4009_v12 = vpop.xlane.xlu0 %4008 }
0x1e49   : > { %v4012_v22 = vmul.f32 1.442695, %v4010_v41  ;;  %v4011_v31 = vsub.f32 %v4003_v54, %v4009_v12 }
0x1e4a   : > { %v4028_v57 = vpop.permute.xlu1 %4027 }
0x1e4b   : > { %6921 = vpow2.f32 %v4012_v22  ;;  %v4014_v2 = vmul.f32 1.442695, %v4011_v31  ;;  %6443 = vmatpush3.bf16.msra.mxu1 %v4028_v57 }
0x1e4c   : > { %6454 = vmatprep.subr.bf16.mxu1 %v7324_v8 }
0x1e4d   : > { %6923 = vpow2.f32 %v4014_v2 }
0x1e55   : > { %v6922_v4 = vpop.eup %6921 }
0x1e56   : > { %v4016_v55 = vsel %vm2042_vm13, %v6922_v4, 0.0 }
0x1e57   : > { %v6924_v58 = vpop.eup %6923  ;;  %4017 = vadd.xlane.f32.xlu0 %v4016_v55 }
0x1e58   : > { %v4019_v18 = vsel %vm2042_vm13, %v6924_v58, 0.0 }
0x1e5b   : > { %4020 = vadd.xlane.f32.xlu0 %v4019_v18 }
0x1e71   : > { %4123 = vrot.lane.b32.xlu0 %v8152_v48, %s7330_s8 }
0x1e85   : > { %v3942_v59 = vpop.f32.mrb[72].mxu1 }
0x1e86   : > { %v3949_v35 = vadd.f32 %v3942_v59, %v8429_v27  ;;  %v6434_v23 = vpop.f32.mrb[73].mxu1  ;;  %v4122_v27 = vpop.permute.xlu1 %4121 }
0x1e87   : > { %v3945_v34 = vpop.f32.mrb[74].mxu1 }
0x1e88   : > { %v3950_v50 = vadd.f32 %v3945_v34, %v8431_v44  ;;  %v6435_v29 = vpop.f32.mrb[75].mxu1 }
0x1ee4   : > { %v4018_v24 = vpop.xlane.xlu0 %4017 }
0x1ee5   : > { %6925 = vrcp.f32 %v4018_v24 }
0x1ee8   : > { %v4021_v33 = vpop.xlane.xlu0 %4020 }
0x1ee9   : > { %6927 = vrcp.f32 %v4021_v33 }
0x1eec   : > { %v4124_v32 = vpop.permute.xlu0 %4123 }
0x1eed   : > { %v4129_v56 = vsel %vm2042_vm13, %v4124_v32, 0 }
0x1eef   : > { %v6926_v43 = vpop.eup %6925 }
0x1ef0   : > { %v4024_v51 = vmul.f32 %v6926_v43, %v6922_v4 }
0x1ef3   : > { %v6928_v10 = vpop.eup %6927 }
0x1ef4   : > { %v4025_v28 = vmul.f32 %v6928_v10, %v6924_v58 }
0x1ef6   : > { %v4026_v36 = vpack.c.bf16 %v4025_v28, %v4024_v51 }
0x1ef8   : > { %6445 = vmatmul.mubr.msk.bf16.vlgmr.msra.gmra.mrb[76].mxu1 %vm2042_vm13, %v4026_v36 }
0x1ef9   : > { %6455 = vmatpush3.bf16.xpose.msra.mxu1 %v4129_v56  ;;  %6456 = vmatprep.mubr.msk.bf16.mxu1 %vm7326_vm12, %v7324_v8 }
0x1efa   : > { %6466 = vmatprep.subr.bf16.mxu1 %v7324_v8 }
0x1f00   : > { %6457 = vmatmul.mubr.msk.bf16.vlgmr.msra.gmra.mrb[80].mxu1 %vm2042_vm13, %v4122_v27 }
0x1f01   : > { %6467 = vmatpush3.bf16.msra.mxu1 %v8281_v45  ;;  %6468 = vmatprep.mubr.msk.bf16.mxu1 %vm7326_vm12, %v7324_v8 }
0x1f02   : > { %6478 = vmatprep.subr.bf16.mxu1 %v7324_v8 }
0x1fcb   : > { %v4067_v44 = vpop.f32.mrb[76].mxu1 }
0x1fcc   : > { %v6446_v7 = vpop.f32.mrb[77].mxu1 }
0x1fcd   : > { %v4070_v61 = vpop.f32.mrb[78].mxu1 }
0x1fce   : > { %v4074_v49 = vpack.c.bf16 %v4070_v61, %v4067_v44  ;;  %v6447_v19 = vpop.f32.mrb[79].mxu1 }
0x1fd0   : > { %6451 = vmatmul.mubr.msk.bf16.vlgmr.msra.gmra.mrb[80].mxu0 %vm2042_vm13, %v4074_v49 }
0x1fd1   : > { %6462 = vmatprep.mubr.msk.bf16.mxu0 %vm7326_vm12, %v7324_v8 }
0x1fd3   : > { %v4165_v42 = vpop.f32.mrb[80].mxu1 }
0x1fd4   : > { %v4172_v63 = vmul.f32 0.25, %v4165_v42  ;;  %v6458_v38 = vpop.f32.mrb[81].mxu1 }
0x1fd5   : > { %v4168_v9 = vpop.f32.mrb[82].mxu1 }
0x1fd6   : > { %v4173_v45 = vmul.f32 0.25, %v4168_v9  ;;  %v6459_v3 = vpop.f32.mrb[83].mxu1  ;;  %v4174_v52 = vsel %vm2042_vm13, %v4172_v63, -inf }
0x1fd7   : > { %4175 = vmax.xlane.f32.xlu1 %v4174_v52 }
0x1fd8   : > { %v4177_v39 = vsel %vm2042_vm13, %v4173_v45, -inf }
0x1fd9   : > { %4178 = vmax.xlane.f32.xlu0 %v4177_v39 }
0x2064   : > { %v4176_v13 = vpop.xlane.xlu1 %4175 }
0x2065   : > { %v4180_v16 = vsub.f32 %v4172_v63, %v4176_v13 }
0x2066   : > { %v4179_v54 = vpop.xlane.xlu0 %4178 }
0x2067   : > { %v4182_v60 = vmul.f32 1.442695, %v4180_v16  ;;  %v4181_v5 = vsub.f32 %v4173_v45, %v4179_v54 }
0x2069   : > { %6929 = vpow2.f32 %v4182_v60  ;;  %v4184_v6 = vmul.f32 1.442695, %v4181_v5 }
0x206b   : > { %6931 = vpow2.f32 %v4184_v6 }
0x2073   : > { %v6930_v11 = vpop.eup %6929 }
0x2074   : > { %v4186_v41 = vsel %vm2042_vm13, %v6930_v11, 0.0 }
0x2075   : > { %v6932_v12 = vpop.eup %6931  ;;  %4187 = vadd.xlane.f32.xlu0 %v4186_v41 }
0x2076   : > { %v4189_v22 = vsel %vm2042_vm13, %v6932_v12, 0.0 }
0x2077   : > { %4190 = vadd.xlane.f32.xlu1 %v4189_v22 }
0x2088   : > { %4293 = vrot.lane.b32.xlu1 %v8152_v48, %s7331_s16 }
0x208b   : > { %4197 = vrot.lane.b32.xlu0 %v8150_v15, %s7330_s8  ;;  %s5995_s8 = sshll.u32 %s7483_s29, 9  ;;  %s7334_s29 = smov [#allocation18]  }
0x208c   : > { %4291 = vrot.lane.b32.xlu1 %v8148_v1, %s7331_s16  ;;  %s7227_s3 = sshll.u32 %s7334_s29, 4  ;;  %s7228_s3 = int_to_ptr.vmem [resolvable:$false] %s7227_s3 }
0x20a3   : > { %v4112_v31 = vpop.f32.mrb[80].mxu0 }
0x20a4   : > { %v8493_v57 = vadd.f32 %v4112_v31, %v3949_v35  ;;  %v6452_v2 = vpop.f32.mrb[81].mxu0 }
0x20a5   : > { %v4115_v4 = vpop.f32.mrb[82].mxu0 }
0x20a6   : > { %v8495_v55 = vadd.f32 %v4115_v4, %v3950_v50  ;;  %v6453_v58 = vpop.f32.mrb[83].mxu0 }
0x2102   : > { %v4188_v18 = vpop.xlane.xlu0 %4187 }
0x2103   : > { %6933 = vrcp.f32 %v4188_v18 }
0x2104   : > { %v4191_v59 = vpop.xlane.xlu1 %4190 }
0x2105   : > { %6935 = vrcp.f32 %v4191_v59 }
0x2106   : > { %v4198_v23 = vpop.permute.xlu0 %4197 }
0x2107   : > { %6461 = vmatpush3.bf16.msra.mxu0 %v4198_v23 }
0x2108   : > { %6472 = vmatprep.subr.bf16.mxu0 %v7324_v8  ;;  %v4294_v43 = vpop.permute.xlu1 %4293 }
0x2109   : > { %v4299_v10 = vsel %vm2042_vm13, %v4294_v43, 0 }
0x210c   : > { %v4292_v50 = vpop.permute.xlu1 %4291 }
0x210d   : > { %v6934_v34 = vpop.eup %6933 }
0x210e   : > { %v4194_v24 = vmul.f32 %v6934_v34, %v6930_v11 }
0x210f   : > { %v6936_v29 = vpop.eup %6935 }
0x2110   : > { %v4195_v33 = vmul.f32 %v6936_v29, %v6932_v12 }
0x2112   : > { %v4196_v35 = vpack.c.bf16 %v4195_v33, %v4194_v24 }
0x2114   : > { %6463 = vmatmul.mubr.msk.bf16.vlgmr.msra.gmra.mrb[84].mxu0 %vm2042_vm13, %v4196_v35 }
0x2115   : > { %6473 = vmatpush3.bf16.xpose.msra.mxu0 %v4299_v10  ;;  %6474 = vmatprep.mubr.msk.bf16.mxu0 %vm7326_vm12, %v7324_v8 }
0x2116   : > { %6484 = vmatprep.subr.bf16.mxu0 %v7324_v8 }
0x211c   : > { %6475 = vmatmul.mubr.msk.bf16.vlgmr.msra.gmra.mrb[88].mxu0 %vm2042_vm13, %v4292_v50 }
0x211d   : > { %6485 = vmatpush3.bf16.msra.mxu0 %v8311_v21  ;;  %6486 = vmatprep.mubr.msk.bf16.mxu0 %vm7326_vm12, %v7324_v8 }
0x211e   : > { %6496 = vmatprep.subr.bf16.mxu0 %v7324_v8 }
0x21e7   : > { %v4237_v51 = vpop.f32.mrb[84].mxu0 }
0x21e8   : > { %v6464_v28 = vpop.f32.mrb[85].mxu0 }
0x21e9   : > { %v4240_v32 = vpop.f32.mrb[86].mxu0 }
0x21ea   : > { %v4244_v36 = vpack.c.bf16 %v4240_v32, %v4237_v51  ;;  %v6465_v56 = vpop.f32.mrb[87].mxu0 }
0x21ec   : > { %6469 = vmatmul.mubr.msk.bf16.vlgmr.msra.gmra.mrb[84].mxu1 %vm2042_vm13, %v4244_v36 }
0x21ed   : > { %6480 = vmatprep.mubr.msk.bf16.mxu1 %vm7326_vm12, %v7324_v8 }
0x21ef   : > { %v4335_v27 = vpop.f32.mrb[88].mxu0 }
0x21f0   : > { %v4342_v44 = vmul.f32 0.25, %v4335_v27  ;;  %v6476_v7 = vpop.f32.mrb[89].mxu0 }
0x21f1   : > { %v4338_v61 = vpop.f32.mrb[90].mxu0 }
0x21f2   : > { %v4343_v21 = vmul.f32 0.25, %v4338_v61  ;;  %v6477_v49 = vpop.f32.mrb[91].mxu0  ;;  %v4344_v19 = vsel %vm2042_vm13, %v4342_v44, -inf }
0x21f3   : > { %4345 = vmax.xlane.f32.xlu1 %v4344_v19 }
0x21f4   : > { %v4347_v42 = vsel %vm2042_vm13, %v4343_v21, -inf }
0x21f5   : > { %4348 = vmax.xlane.f32.xlu0 %v4347_v42 }
0x2204   : > { %4367 = vrot.lane.b32.xlu1 %v8150_v15, %s7331_s16 }
0x2208   : > { %4461 = vrot.lane.b32.xlu1 %v8148_v1, %s7332_s6 }
0x2280   : > { %v4346_v63 = vpop.xlane.xlu1 %4345 }
0x2281   : > { %v4350_v38 = vsub.f32 %v4342_v44, %v4346_v63 }
0x2282   : > { %v4349_v9 = vpop.xlane.xlu0 %4348 }
0x2283   : > { %v4352_v45 = vmul.f32 1.442695, %v4350_v38  ;;  %v4351_v3 = vsub.f32 %v4343_v21, %v4349_v9 }
0x2284   : > { %v4368_v52 = vpop.permute.xlu1 %4367 }
0x2285   : > { %6937 = vpow2.f32 %v4352_v45  ;;  %v4354_v39 = vmul.f32 1.442695, %v4351_v3  ;;  %6479 = vmatpush3.bf16.msra.mxu1 %v4368_v52 }
0x2286   : > { %6490 = vmatprep.subr.bf16.mxu1 %v7324_v8 }
0x2287   : > { %6939 = vpow2.f32 %v4354_v39 }
0x228f   : > { %v6938_v13 = vpop.eup %6937 }
0x2290   : > { %v4356_v16 = vsel %vm2042_vm13, %v6938_v13, 0.0 }
0x2291   : > { %v6940_v54 = vpop.eup %6939  ;;  %4357 = vadd.xlane.f32.xlu0 %v4356_v16 }
0x2292   : > { %v4359_v60 = vsel %vm2042_vm13, %v6940_v54, 0.0 }
0x2295   : > { %4360 = vadd.xlane.f32.xlu0 %v4359_v60 }
0x22ab   : > { %4463 = vrot.lane.b32.xlu0 %v8152_v48, %s7332_s6 }
0x22bf   : > { %v4282_v5 = vpop.f32.mrb[84].mxu1 }
0x22c0   : > { %v4289_v6 = vadd.f32 %v4282_v5, %v8493_v57  ;;  %v6470_v11 = vpop.f32.mrb[85].mxu1  ;;  %v4462_v57 = vpop.permute.xlu1 %4461 }
0x22c1   : > { %v4285_v41 = vpop.f32.mrb[86].mxu1 }
0x22c2   : > { %v4290_v12 = vadd.f32 %v4285_v41, %v8495_v55  ;;  %v6471_v22 = vpop.f32.mrb[87].mxu1 }
0x231e   : > { %v4358_v31 = vpop.xlane.xlu0 %4357 }
0x231f   : > { %6941 = vrcp.f32 %v4358_v31 }
0x2322   : > { %v4361_v2 = vpop.xlane.xlu0 %4360 }
0x2323   : > { %6943 = vrcp.f32 %v4361_v2 }
0x2326   : > { %v4464_v23 = vpop.permute.xlu0 %4463 }
0x2327   : > { %v4469_v29 = vsel %vm2042_vm13, %v4464_v23, 0 }
0x2329   : > { %v6942_v4 = vpop.eup %6941 }
0x232a   : > { %v4364_v18 = vmul.f32 %v6942_v4, %v6938_v13 }
0x232d   : > { %v6944_v58 = vpop.eup %6943 }
0x232e   : > { %v4365_v59 = vmul.f32 %v6944_v58, %v6940_v54 }
0x2330   : > { %v4366_v34 = vpack.c.bf16 %v4365_v59, %v4364_v18 }
0x2332   : > { %6481 = vmatmul.mubr.msk.bf16.vlgmr.msra.gmra.mrb[88].mxu1 %vm2042_vm13, %v4366_v34 }
0x2333   : > { %6491 = vmatpush3.bf16.xpose.msra.mxu1 %v4469_v29  ;;  %6492 = vmatprep.mubr.msk.bf16.mxu1 %vm7326_vm12, %v7324_v8 }
0x2334   : > { %6502 = vmatprep.subr.bf16.mxu1 %v7324_v8 }
0x233a   : > { %6493 = vmatmul.mubr.msk.bf16.vlgmr.msra.gmra.mrb[92].mxu1 %vm2042_vm13, %v4462_v57 }
0x233b   : > { %6503 = vmatpush3.bf16.msra.mxu1 %v8339_v0  ;;  %6504 = vmatprep.mubr.msk.bf16.mxu1 %vm7326_vm12, %v7324_v8 }
0x233c   : > { %6514 = vmatprep.subr.bf16.mxu1 %v7324_v8 }
0x2405   : > { %v4407_v55 = vpop.f32.mrb[88].mxu1 }
0x2406   : > { %v6482_v24 = vpop.f32.mrb[89].mxu1 }
0x2407   : > { %v4410_v33 = vpop.f32.mrb[90].mxu1 }
0x2408   : > { %v4414_v43 = vpack.c.bf16 %v4410_v33, %v4407_v55  ;;  %v6483_v35 = vpop.f32.mrb[91].mxu1 }
0x240a   : > { %6487 = vmatmul.mubr.msk.bf16.vlgmr.msra.gmra.mrb[92].mxu0 %vm2042_vm13, %v4414_v43 }
0x240b   : > { %6498 = vmatprep.mubr.msk.bf16.mxu0 %vm7326_vm12, %v7324_v8 }
0x240d   : > { %v4505_v10 = vpop.f32.mrb[92].mxu1 }
0x240e   : > { %v4512_v50 = vmul.f32 0.25, %v4505_v10  ;;  %v6494_v51 = vpop.f32.mrb[93].mxu1 }
0x240f   : > { %v4508_v28 = vpop.f32.mrb[94].mxu1 }
0x2410   : > { %v4513_v0 = vmul.f32 0.25, %v4508_v28  ;;  %v6495_v32 = vpop.f32.mrb[95].mxu1  ;;  %v4514_v36 = vsel %vm2042_vm13, %v4512_v50, -inf }
0x2411   : > { %4515 = vmax.xlane.f32.xlu1 %v4514_v36 }
0x2412   : > { %v4517_v56 = vsel %vm2042_vm13, %v4513_v0, -inf }
0x2413   : > { %4518 = vmax.xlane.f32.xlu0 %v4517_v56 }
0x249e   : > { %v4516_v27 = vpop.xlane.xlu1 %4515 }
0x249f   : > { %v4520_v44 = vsub.f32 %v4512_v50, %v4516_v27 }
0x24a0   : > { %v4519_v7 = vpop.xlane.xlu0 %4518 }
0x24a1   : > { %v4522_v61 = vmul.f32 1.442695, %v4520_v44  ;;  %v4521_v21 = vsub.f32 %v4513_v0, %v4519_v7  ;;  %v5921_v0 = vld [vmem:[%s8804_s15] ss:$0 sm:$0xff] }
0x24a2   : > { %v4815_v27 = vadd.f32 %v5921_v0, %v8405_v20 }
0x24a3   : > { %6945 = vpow2.f32 %v4522_v61  ;;  %v4524_v49 = vmul.f32 1.442695, %v4521_v21 }
0x24a4   : > { %v8580_v7 = vadd.f32 %v4815_v27, %v8076_v14  ;;  %v6759_v27 = vld [vmem:[#allocation15 + $0xa0] ss:$16 sps:$4 sm:$0xff]  }
0x24a5   : > { %6947 = vpow2.f32 %v4524_v49 }
0x24ad   : > { %v6946_v19 = vpop.eup %6945 }
0x24ae   : > { %v4526_v42 = vsel %vm2042_vm13, %v6946_v19, 0.0 }
0x24af   : > { %v6948_v63 = vpop.eup %6947  ;;  %4527 = vadd.xlane.f32.xlu0 %v4526_v42 }
0x24b0   : > { %v4529_v38 = vsel %vm2042_vm13, %v6948_v63, 0.0 }
0x24b1   : > { %4530 = vadd.xlane.f32.xlu1 %v4529_v38 }
0x24c2   : > { %4633 = vrot.lane.b32.xlu1 %v8152_v48, %s7333_s21 }
0x24c5   : > { %4537 = vrot.lane.b32.xlu0 %v8150_v15, %s7332_s6  ;;  %s8806_s6 = sld [smem:[#allocation43_spill]] }
0x24c6   : > { %4631 = vrot.lane.b32.xlu1 %v8148_v1, %s7333_s21 }
0x24dd   : > { %v4452_v9 = vpop.f32.mrb[92].mxu0 }
0x24de   : > { %v8547_v45 = vadd.f32 %v4452_v9, %v4289_v6  ;;  %v6488_v3 = vpop.f32.mrb[93].mxu0 }
0x24df   : > { %v4455_v52 = vpop.f32.mrb[94].mxu0 }
0x24e0   : > { %v8549_v39 = vadd.f32 %v4455_v52, %v4290_v12  ;;  %v6489_v13 = vpop.f32.mrb[95].mxu0 }
0x253c   : > { %v4528_v16 = vpop.xlane.xlu0 %4527 }
0x253d   : > { %6949 = vrcp.f32 %v4528_v16 }
0x253e   : > { %v4531_v54 = vpop.xlane.xlu1 %4530 }
0x253f   : > { %6951 = vrcp.f32 %v4531_v54 }
0x2540   : > { %v4538_v60 = vpop.permute.xlu0 %4537 }
0x2541   : > { %6497 = vmatpush3.bf16.msra.mxu0 %v4538_v60 }
0x2542   : > { %6508 = vmatprep.subr.bf16.mxu0 %v7324_v8  ;;  %v4634_v41 = vpop.permute.xlu1 %4633 }
0x2543   : > { %v4639_v22 = vsel %vm2042_vm13, %v4634_v41, 0  ;;  %v6732_v41 = vld [vmem:[#allocation15 + $0x8] ss:$16 sps:$4 sm:$0xff]  }
0x2546   : > { %v4632_v12 = vpop.permute.xlu1 %4631 }
0x2547   : > { %v6950_v48 = vpop.eup %6949 }
0x2548   : > { %v4534_v11 = vmul.f32 %v6950_v48, %v6946_v19 }
0x2549   : > { %v6952_v5 = vpop.eup %6951 }
0x254a   : > { %v4535_v1 = vmul.f32 %v6952_v5, %v6948_v63 }
0x254c   : > { %v4536_v6 = vpack.c.bf16 %v4535_v1, %v4534_v11  ;;  %v6729_v11 = vld [vmem:[#allocation15] ss:$16 sps:$4 sm:$0xff]   ;;  %v6731_v1 = vld [vmem:[#allocation15 + $0x4] ss:$16 sps:$4 sm:$0xff]  }
0x254e   : > { %6499 = vmatmul.mubr.msk.bf16.vlgmr.msra.gmra.mrb[96].mxu0 %vm2042_vm13, %v4536_v6  ;;  %v6734_v6 = vld [vmem:[#allocation15 + $0xc] ss:$16 sps:$4 sm:$0xff]  }
0x254f   : > { %6509 = vmatpush3.bf16.xpose.msra.mxu0 %v4639_v22  ;;  %6510 = vmatprep.mubr.msk.bf16.mxu0 %vm7326_vm12, %v7324_v8 }
0x2550   : > { %6520 = vmatprep.subr.bf16.mxu0 %v7324_v8 }
0x2556   : > { %6511 = vmatmul.mubr.msk.bf16.vlgmr.msra.gmra.mrb[100].mxu0 %vm2042_vm13, %v4632_v12 }
0x2557   : > { %6521 = vmatpush3.bf16.msra.mxu0 %v8378_v17  ;;  %6522 = vmatprep.mubr.msk.bf16.mxu0 %vm7326_vm12, %v7324_v8 }
0x2558   : > { %5157 = vmatprep.subr.bf16.mxu0 %v6734_v6 }
0x2621   : > { %v4577_v31 = vpop.f32.mrb[96].mxu0 }
0x2622   : > { %v6500_v2 = vpop.f32.mrb[97].mxu0 }
0x2623   : > { %v4580_v4 = vpop.f32.mrb[98].mxu0 }
0x2624   : > { %v4584_v58 = vpack.c.bf16 %v4580_v4, %v4577_v31  ;;  %v6501_v18 = vpop.f32.mrb[99].mxu0 }
0x2626   : > { %6505 = vmatmul.mubr.msk.bf16.vlgmr.msra.gmra.mrb[96].mxu1 %vm2042_vm13, %v4584_v58 }
0x2627   : > { %6516 = vmatprep.mubr.msk.bf16.mxu1 %vm7326_vm12, %v7324_v8 }
0x2629   : > { %v4675_v59 = vpop.f32.mrb[100].mxu0 }
0x262a   : > { %v4682_v23 = vmul.f32 0.25, %v4675_v59  ;;  %v6512_v34 = vpop.f32.mrb[101].mxu0 }
0x262b   : > { %v4678_v29 = vpop.f32.mrb[102].mxu0 }
0x262c   : > { %v4683_v57 = vmul.f32 0.25, %v4678_v29  ;;  %v6513_v55 = vpop.f32.mrb[103].mxu0  ;;  %v4684_v17 = vsel %vm2042_vm13, %v4682_v23, -inf }
0x262d   : > { %4685 = vmax.xlane.f32.xlu1 %v4684_v17 }
0x262e   : > { %v4687_v24 = vsel %vm2042_vm13, %v4683_v57, -inf }
0x262f   : > { %4688 = vmax.xlane.f32.xlu0 %v4687_v24  ;;  %v6735_v24 = vld [vmem:[#allocation15 + $0x20] ss:$16 sps:$4 sm:$0xff]  }
0x263e   : > { %4707 = vrot.lane.b32.xlu1 %v8150_v15, %s7333_s21  ;;  %v4814_v15 = vadd.f32 %v5921_v0, %v8402_v62  ;;  %s8809_s21 = sld [smem:[#allocation44_spill]] }
0x2640   : > { %v8576_v44 = vadd.f32 %v4814_v15, %v8073_v25  ;;  %v6753_v15 = vld [vmem:[#allocation15 + $0x80] ss:$16 sps:$4 sm:$0xff]  }
0x2644   : > { %s8665_s4 = scalar_lea.hbm %s8809_s21, %s5995_s8 }
0x26ba   : > { %v4686_v33 = vpop.xlane.xlu1 %4685 }
0x26bb   : > { %v4690_v43 = vsub.f32 %v4682_v23, %v4686_v33  ;;  %v6737_v33 = vld [vmem:[#allocation15 + $0x24] ss:$16 sps:$4 sm:$0xff]  }
0x26bc   : > { %v4689_v35 = vpop.xlane.xlu0 %4688 }
0x26bd   : > { %v4692_v10 = vmul.f32 1.442695, %v4690_v43  ;;  %v4691_v8 = vsub.f32 %v4683_v57, %v4689_v35  ;;  %v6738_v43 = vld [vmem:[#allocation15 + $0x28] ss:$16 sps:$4 sm:$0xff]   ;;  %v6740_v35 = vld [vmem:[#allocation15 + $0x2c] ss:$16 sps:$4 sm:$0xff]  }
0x26be   : > { %v4708_v50 = vpop.permute.xlu1 %4707 }
0x26bf   : > { %6953 = vpow2.f32 %v4692_v10  ;;  %v4694_v51 = vmul.f32 1.442695, %v4691_v8  ;;  %6515 = vmatpush3.bf16.msra.mxu1 %v4708_v50  ;;  %v6743_v10 = vld [vmem:[#allocation15 + $0x44] ss:$16 sps:$4 sm:$0xff]   ;;  %v6744_v8 = vld [vmem:[#allocation15 + $0x48] ss:$16 sps:$4 sm:$0xff]  }
0x26c0   : > { %5104 = vmatprep.subr.bf16.mxu1 %v6731_v1  ;;  %v6746_v50 = vld [vmem:[#allocation15 + $0x4c] ss:$16 sps:$4 sm:$0xff]  }
0x26c1   : > { %6955 = vpow2.f32 %v4694_v51  ;;  %v6752_v51 = vld [vmem:[#allocation15 + $0x6c] ss:$16 sps:$4 sm:$0xff]  }
0x26c9   : > { %v6954_v28 = vpop.eup %6953 }
0x26ca   : > { %v4696_v32 = vsel %vm2042_vm13, %v6954_v28, 0.0 }
0x26cb   : > { %v6956_v36 = vpop.eup %6955  ;;  %4697 = vadd.xlane.f32.xlu0 %v4696_v32  ;;  %v6755_v32 = vld [vmem:[#allocation15 + $0x84] ss:$16 sps:$4 sm:$0xff]  }
0x26cc   : > { %v4699_v56 = vsel %vm2042_vm13, %v6956_v36, 0.0 }
0x26cf   : > { %4700 = vadd.xlane.f32.xlu0 %v4699_v56  ;;  %v6756_v56 = vld [vmem:[#allocation15 + $0x88] ss:$16 sps:$4 sm:$0xff]  }
0x26d3   : > { %4824 = vadd.xlane.f32.xlu0 %v8576_v44 }
0x26d7   : > { %4826 = vadd.xlane.f32.xlu0 %v8580_v7 }
0x26f9   : > { %v4622_v61 = vpop.f32.mrb[96].mxu1 }
0x26fa   : > { %v4629_v21 = vadd.f32 %v4622_v61, %v8547_v45  ;;  %v6506_v49 = vpop.f32.mrb[97].mxu1  ;;  %v6761_v61 = vld [vmem:[#allocation15 + $0xa4] ss:$16 sps:$4 sm:$0xff]  }
0x26fb   : > { %v4625_v62 = vpop.f32.mrb[98].mxu1  ;;  %v6764_v49 = vld [vmem:[#allocation15 + $0xac] ss:$16 sps:$4 sm:$0xff]  }
0x26fc   : > { %v4630_v19 = vadd.f32 %v4625_v62, %v8549_v39  ;;  %v6507_v42 = vpop.f32.mrb[99].mxu1  ;;  %v6767_v62 = vld [vmem:[#allocation15 + $0xc4] ss:$16 sps:$4 sm:$0xff]  }
0x26fd   : > { %v6765_v42 = vld [vmem:[#allocation15 + $0xc0] ss:$16 sps:$4 sm:$0xff]  }
0x2758   : > { %v4698_v63 = vpop.xlane.xlu0 %4697 }
0x2759   : > { %6957 = vrcp.f32 %v4698_v63  ;;  %v6768_v63 = vld [vmem:[#allocation15 + $0xc8] ss:$16 sps:$4 sm:$0xff]  }
0x275c   : > { %v4701_v20 = vpop.xlane.xlu0 %4700 }
0x275d   : > { %6959 = vrcp.f32 %v4701_v20  ;;  %v6773_v20 = vld [vmem:[#allocation15 + $0xe4] ss:$16 sps:$4 sm:$0xff]  }
0x2760   : > { %v4825_v25 = vpop.xlane.xlu0 %4824 }
0x2761   : > { %v4832_v38 = vmul.f32 0.0078125, %v4825_v25  ;;  %v6776_v25 = vld [vmem:[#allocation15 + $0xec] ss:$16 sps:$4 sm:$0xff]  }
0x2763   : > { %v8586_v9 = vsub.f32 %v8576_v44, %v4832_v38  ;;  %v6958_v14 = vpop.eup %6957  ;;  %v6771_v38 = vld [vmem:[#allocation15 + $0xe0] ss:$16 sps:$4 sm:$0xff]  }
0x2764   : > { %v4704_v45 = vmul.f32 %v6958_v14, %v6954_v28  ;;  %v4827_v2 = vpop.xlane.xlu0 %4826  ;;  %v6747_v28 = vld [vmem:[#allocation15 + $0x60] ss:$16 sps:$4 sm:$0xff]   ;;  %v6774_v14 = vld [vmem:[#allocation15 + $0xe8] ss:$16 sps:$4 sm:$0xff]  }
0x2765   : > { %v4840_v3 = vmul.f32 %v8586_v9, %v8586_v9  ;;  %v4833_v23 = vmul.f32 0.0078125, %v4827_v2 }
0x2767   : > { %v6960_v52 = vpop.eup %6959  ;;  %4844 = vadd.xlane.f32.xlu1 %v4840_v3  ;;  %v8599_v57 = vsub.f32 %v8580_v7, %v4833_v23 }
0x2768   : > { %v4705_v13 = vmul.f32 %v6960_v52, %v6956_v36  ;;  %v6758_v36 = vld [vmem:[#allocation15 + $0x8c] ss:$16 sps:$4 sm:$0xff]  }
0x2769   : > { %v4841_v17 = vmul.f32 %v8599_v57, %v8599_v57 }
0x276a   : > { %v4706_v16 = vpack.c.bf16 %v4705_v13, %v4704_v45 }
0x276c   : > { %6517 = vmatmul.mubr.msk.bf16.vlgmr.msra.gmra.mrb[100].mxu1 %vm2042_vm13, %v4706_v16 }
0x276d   : > { %5136 = vmatprep.mubr.bf16.mxu1 %v7325_v30  ;;  %5105 = vmatpush1.bf16.msra.mxu1 %v6729_v11 }
0x276e   : > { %5106 = vmatprep.subr.bf16.mxu1 %v6737_v33  ;;  %v6780_v33 = vld [vmem:[#allocation17 + $0x80] sm:$0xff]  }
0x2771   : > { %5107 = vmatpush1.bf16.msra.mxu1 %v6735_v24  ;;  %v6779_v24 = vld [vmem:[#allocation17] sm:$0xff]  }
0x2772   : > { %5108 = vmatprep.subr.bf16.mxu1 %v6743_v10  ;;  %v6784_v10 = vld [vmem:[#allocation17 + $0x88] sm:$0xff]  }
0x27f4   : > { %v4845_v3 = vpop.xlane.xlu1 %4844 }
0x27f5   : > { %v4852_v52 = vmul.f32 0.0078125, %v4845_v3  ;;  %v6808_v3 = vld [vmem:[#allocation17 + $0xb8] sm:$0xff]  }
0x27f7   : > { %v4856_v16 = vadd.f32 1e-06, %v4852_v52 }
0x27f9   : > { %6961 = vrsqrt.f32 %v4856_v16 }
0x283f   : > { %v4747_v39 = vpop.f32.mrb[100].mxu1 }
0x2840   : > { %v6518_v54 = vpop.f32.mrb[101].mxu1 }
0x2841   : > { %v4750_v60 = vpop.f32.mrb[102].mxu1 }
0x2842   : > { %v4754_v48 = vpack.c.bf16 %v4750_v60, %v4747_v39  ;;  %v6519_v5 = vpop.f32.mrb[103].mxu1 }
0x2844   : > { %6523 = vmatmul.mubr.msk.bf16.vlgmr.msra.gmra.mrb[104].mxu0 %vm2042_vm13, %v4754_v48 }
0x2845   : > { %5189 = vmatprep.mubr.bf16.mxu0 %v7325_v30  ;;  %5158 = vmatpush1.bf16.msra.mxu0 %v6732_v41 }
0x2846   : > { %5159 = vmatprep.subr.bf16.mxu0 %v6740_v35  ;;  %v6782_v35 = vld [vmem:[#allocation17 + $0xc8] sm:$0xff]  }
0x2849   : > { %5160 = vmatpush1.bf16.msra.mxu0 %v6738_v43  ;;  %v6781_v43 = vld [vmem:[#allocation17 + $0x48] sm:$0xff]  }
0x284a   : > { %5161 = vmatprep.subr.bf16.mxu0 %v6746_v50  ;;  %v6786_v50 = vld [vmem:[#allocation17 + $0xd0] sm:$0xff]  }
0x284d   : > { %5162 = vmatpush1.bf16.msra.mxu0 %v6744_v8  ;;  %v6785_v8 = vld [vmem:[#allocation17 + $0x50] sm:$0xff]  }
0x284e   : > { %5163 = vmatprep.subr.bf16.mxu0 %v6752_v51  ;;  %v6789_v51 = vld [vmem:[#allocation17 + $0x58] sm:$0xff]  }
0x2917   : > { %v4792_v22 = vpop.f32.mrb[104].mxu0 }
0x2918   : > { %v4799_v12 = vadd.f32 %v4792_v22, %v4629_v21  ;;  %v6524_v31 = vpop.f32.mrb[105].mxu0  ;;  %v6762_v21 = vld [vmem:[#allocation15 + $0xa8] ss:$16 sps:$4 sm:$0xff]   ;;  %v6962_v22 = vpop.eup %6961 }
0x2919   : > { %v4795_v4 = vpop.f32.mrb[106].mxu0  ;;  %v8621_v31 = vld [vmem:[%s8805_s1] ss:$0 sm:$0xff]  ;;  %s869_s1 = scalar_lea.vmem [#allocation18], %s5781_s24 }
0x291a   : > { %v4816_v58 = vadd.f32 %v5921_v0, %v4799_v12  ;;  %v4800_v18 = vadd.f32 %v4795_v4, %v4630_v19  ;;  %v6525_v59 = vpop.f32.mrb[107].mxu0  ;;  %v6770_v19 = vld [vmem:[#allocation15 + $0xcc] ss:$16 sps:$4 sm:$0xff]   ;;  %v4864_v12 = vmul.f32 %v6962_v22, %v8586_v9  ;;  %s5617_s24 = sshll.u32 %s869_s1, 4  ;;  %s8659_s24 = int_to_ptr.vmem [resolvable:$true] %s5617_s24 }
0x291b   : > { %s7223_s15 = scalar_lea.vmem %s8659_s24, 512  ;;  %p7230_p2 = scmp.lt.s32.totalorder %s8659_s24, %s7228_s3 }
0x291c   : > { %v4817_v34 = vadd.f32 %v5921_v0, %v4800_v18  ;;  %v8595_v29 = vadd.f32 %v4816_v58, %v8091_v46  ;;  %v6741_v46 = vld [vmem:[#allocation15 + $0x40] ss:$16 sps:$4 sm:$0xff]   ;;  %v6750_v0 = vld [vmem:[#allocation15 + $0x68] ss:$16 sps:$4 sm:$0xff]   ;;  %v4874_v58 = vmul.f32 %v8621_v31, %v4864_v12  ;;  %v8628_v18 = vld [vmem:[%s8806_s6] ss:$0 sm:$0xff]  ;;  %p7224_p12 = scmp.ne.s32.totalorder %s8659_s24, %s7223_s15 }
0x291d   : > { %5109 = vmatpush1.bf16.msra.mxu1 %v6741_v46  ;;  %5164 = vmatpush1.bf16.msra.mxu0 %v6750_v0  ;;  %v6783_v46 = vld [vmem:[#allocation17 + $0x8] sm:$0xff]   ;;  %v6791_v0 = vld [vmem:[#allocation17 + $0x18] sm:$0xff]  }
0x291e   : > { %4828 = vadd.xlane.f32.xlu0 %v8595_v29  ;;  %v8602_v55 = vadd.f32 %v4817_v34, %v8094_v47  ;;  %v6749_v47 = vld [vmem:[#allocation15 + $0x64] ss:$16 sps:$4 sm:$0xff]   ;;  %5165 = vmatprep.subr.bf16.mxu0 %v6758_v36  ;;  %v4884_v23 = vadd.f32 %v8628_v18, %v4874_v58  ;;  %v4922_v58 = vld [vmem:[%s8807_s18] sm:$0xf]  ;;  %s5604_s18 = scalar_lea.sflag [#allocation5], %s7772_s23  ;;  %p7225_p13 = pnand %p7224_p12, %p8810_p1 }
0x291f   : > { %5110 = vmatprep.subr.bf16.mxu1 %v6749_v47  ;;  %v6787_v47 = vld [vmem:[#allocation17 + $0x10] sm:$0xff]   ;;  %v6793_v36 = vld [vmem:[#allocation17 + $0x60] sm:$0xff]  }
0x2920   : > { %p7226_p0 = pneg %p7225_p13 }
0x2921   : > { %5111 = vmatpush1.bf16.msra.mxu1 %v6747_v28  ;;  %5166 = vmatpush1.bf16.msra.mxu0 %v6756_v56  ;;  %v6790_v28 = vld [vmem:[#allocation17 + $0xd8] sm:$0xff]   ;;  %v6795_v56 = vld [vmem:[#allocation17 + $0x20] sm:$0xff]  }
0x2922   : > { %4830 = vadd.xlane.f32.xlu0 %v8602_v55  ;;  %5112 = vmatprep.subr.bf16.mxu1 %v6755_v32  ;;  %v6792_v32 = vld [vmem:[#allocation17 + $0x98] sm:$0xff]  }
0x2923   : > { %5167 = vmatprep.subr.bf16.mxu0 %v6764_v49  ;;  %v6799_v49 = vld [vmem:[#allocation17 + $0x28] sm:$0xff]  }
0x2925   : > { %5113 = vmatpush1.bf16.msra.mxu1 %v6753_v15  ;;  %5168 = vmatpush1.bf16.msra.mxu0 %v6762_v21  ;;  %v6794_v15 = vld [vmem:[#allocation17 + $0xe0] sm:$0xff]   ;;  %v6798_v21 = vld [vmem:[#allocation17 + $0xe8] sm:$0xff]  }
0x2926   : > { %4846 = vadd.xlane.f32.xlu0 %v4841_v17  ;;  %5114 = vmatprep.subr.bf16.mxu1 %v6761_v61  ;;  %v6778_v17 = vld [vmem:[#allocation17 + $0xc0] sm:$0xff]   ;;  %v6797_v61 = vld [vmem:[#allocation17 + $0x68] sm:$0xff]  }
0x2927   : > { %5169 = vmatprep.subr.bf16.mxu0 %v6770_v19  ;;  %v6801_v19 = vld [vmem:[#allocation17 + $0x70] sm:$0xff]  }
0x2929   : > { %5115 = vmatpush1.bf16.msra.mxu1 %v6759_v27  ;;  %5170 = vmatpush1.bf16.msra.mxu0 %v6768_v63  ;;  %v6796_v27 = vld [vmem:[#allocation17 + $0xa0] sm:$0xff]   ;;  %v6803_v63 = vld [vmem:[#allocation17 + $0x30] sm:$0xff]  }
0x292a   : > { %5116 = vmatprep.subr.bf16.mxu1 %v6767_v62  ;;  %5171 = vmatprep.subr.bf16.mxu0 %v6776_v25  ;;  %v6800_v62 = vld [vmem:[#allocation17 + $0xa8] sm:$0xff]   ;;  %v6805_v25 = vld [vmem:[#allocation17 + $0x78] sm:$0xff]  }
0x292d   : > { %5117 = vmatpush1.bf16.msra.mxu1 %v6765_v42  ;;  %5172 = vmatpush1.bf16.msra.mxu0 %v6774_v14  ;;  %v6802_v42 = vld [vmem:[#allocation17 + $0xf0] sm:$0xff]   ;;  %v6807_v14 = vld [vmem:[#allocation17 + $0x38] sm:$0xff]  }
0x292e   : > { %5118 = vmatprep.subr.bf16.mxu1 %v6773_v20  ;;  %6150 = vmatprep.subr.bf16.mxu0 %v6778_v17  ;;  %v6804_v20 = vld [vmem:[#allocation17 + $0xb0] sm:$0xff]  }
0x2931   : > { %5119 = vmatpush1.bf16.msra.mxu1 %v6771_v38  ;;  %v6806_v38 = vld [vmem:[#allocation17 + $0xf8] sm:$0xff]  }
0x29ab   : > { %v4829_v45 = vpop.xlane.xlu0 %4828 }
0x29ac   : > { %v4834_v13 = vmul.f32 0.0078125, %v4829_v45 }
0x29ae   : > { %v8608_v39 = vsub.f32 %v8595_v29, %v4834_v13 }
0x29af   : > { %v4831_v54 = vpop.xlane.xlu0 %4830 }
0x29b0   : > { %v4835_v60 = vmul.f32 0.0078125, %v4831_v54  ;;  %v4842_v48 = vmul.f32 %v8608_v39, %v8608_v39 }
0x29b2   : > { %v8613_v5 = vsub.f32 %v8602_v55, %v4835_v60  ;;  %4848 = vadd.xlane.f32.xlu0 %v4842_v48 }
0x29b3   : > { %v4847_v11 = vpop.xlane.xlu0 %4846 }
0x29b4   : > { %v4853_v1 = vmul.f32 0.0078125, %v4847_v11  ;;  %v4843_v41 = vmul.f32 %v8613_v5, %v8613_v5 }
0x29b6   : > { %v4857_v6 = vadd.f32 1e-06, %v4853_v1  ;;  %4850 = vadd.xlane.f32.xlu0 %v4843_v41 }
0x29b8   : > { %6963 = vrsqrt.f32 %v4857_v6 }
0x29c2   : > { %v6964_v2 = vpop.eup %6963 }
0x29c3   : > { %v4865_v4 = vmul.f32 %v6964_v2, %v8599_v57  ;;  %v6777_v57 = vld [vmem:[#allocation17 + $0x40] sm:$0xff]  }
0x29c4   : > { %6122 = vmatprep.subr.bf16.mxu1 %v6777_v57 }
0x29c5   : > { %v4875_v59 = vmul.f32 %v8621_v31, %v4865_v4 }
0x29c7   : > { %v4885_v9 = vadd.f32 %v8628_v18, %v4875_v59  ;;  %v4935_v59 = vrot.slane %v4922_v58, %v1789_v26 }
0x29c9   : > { %v4920_v34 = vpack.c.bf16 %v4885_v9, %v4884_v23 }
0x29cb   : > { %5137 = vmatmul.mubr.bf16.vlgmr.msra.gmra.mrb[104].mxu1 %v4920_v34  ;;  %5190 = vmatmul.mubr.bf16.vlgmr.msra.gmra.mrb[108].mxu0 %v4920_v34 }
0x29cc   : > { %5146 = vmatprep.mubr.bf16.mxu1 %v7325_v30  ;;  %5199 = vmatprep.mubr.bf16.mxu0 %v7325_v30  ;;  %v6788_v30 = vld [vmem:[#allocation17 + $0x90] sm:$0xff]  }
0x29cd   : > { %6123 = vmatpush3.bf16.msra.mxu1 %v6779_v24  ;;  %6151 = vmatpush3.bf16.msra.mxu0 %v6780_v33 }
0x29ce   : > { %6124 = vmatprep.subr.bf16.mxu1 %v6781_v43  ;;  %6152 = vmatprep.subr.bf16.mxu0 %v6782_v35 }
0x29d1   : > { %6125 = vmatpush3.bf16.msra.mxu1 %v6783_v46  ;;  %6153 = vmatpush3.bf16.msra.mxu0 %v6784_v10 }
0x29d2   : > { %6126 = vmatprep.subr.bf16.mxu1 %v6785_v8  ;;  %6154 = vmatprep.subr.bf16.mxu0 %v6786_v50 }
0x29d5   : > { %6127 = vmatpush3.bf16.msra.mxu1 %v6787_v47  ;;  %6155 = vmatpush3.bf16.msra.mxu0 %v6788_v30 }
0x29d6   : > { %6128 = vmatprep.subr.bf16.mxu1 %v6789_v51  ;;  %6156 = vmatprep.subr.bf16.mxu0 %v6790_v28 }
0x29d9   : > { %6129 = vmatpush3.bf16.msra.mxu1 %v6791_v0  ;;  %6157 = vmatpush3.bf16.msra.mxu0 %v6792_v32 }
0x29da   : > { %6130 = vmatprep.subr.bf16.mxu1 %v6793_v36  ;;  %6158 = vmatprep.subr.bf16.mxu0 %v6794_v15 }
0x29dd   : > { %6131 = vmatpush3.bf16.msra.mxu1 %v6795_v56  ;;  %6159 = vmatpush3.bf16.msra.mxu0 %v6796_v27 }
0x29de   : > { %6132 = vmatprep.subr.bf16.mxu1 %v6797_v61  ;;  %6160 = vmatprep.subr.bf16.mxu0 %v6798_v21 }
0x29e1   : > { %6133 = vmatpush3.bf16.msra.mxu1 %v6799_v49  ;;  %6161 = vmatpush3.bf16.msra.mxu0 %v6800_v62 }
0x29e2   : > { %6134 = vmatprep.subr.bf16.mxu1 %v6801_v19  ;;  %6162 = vmatprep.subr.bf16.mxu0 %v6802_v42 }
0x29e5   : > { %6135 = vmatpush3.bf16.msra.mxu1 %v6803_v63  ;;  %6163 = vmatpush3.bf16.msra.mxu0 %v6804_v20 }
0x29e6   : > { %6136 = vmatprep.subr.bf16.mxu1 %v6805_v25  ;;  %6164 = vmatprep.subr.bf16.mxu0 %v6806_v38 }
0x29e9   : > { %6137 = vmatpush3.bf16.msra.mxu1 %v6807_v14  ;;  %6165 = vmatpush3.bf16.msra.mxu0 %v6808_v3 }
0x2a3f   : > { %v4849_v52 = vpop.xlane.xlu0 %4848 }
0x2a40   : > { %v4854_v45 = vmul.f32 0.0078125, %v4849_v52 }
0x2a42   : > { %v4858_v13 = vadd.f32 1e-06, %v4854_v45 }
0x2a43   : > { %v4851_v16 = vpop.xlane.xlu0 %4850 }
0x2a44   : > { %6965 = vrsqrt.f32 %v4858_v13  ;;  %v4855_v54 = vmul.f32 0.0078125, %v4851_v16 }
0x2a46   : > { %v4859_v60 = vadd.f32 1e-06, %v4855_v54 }
0x2a48   : > { %6967 = vrsqrt.f32 %v4859_v60 }
0x2a4e   : > { %v6966_v48 = vpop.eup %6965 }
0x2a4f   : > { %v4866_v11 = vmul.f32 %v6966_v48, %v8608_v39  ;;  %v4938_v39 = vsub.s32 3, %v7830_v40 }
0x2a51   : > { %v4876_v6 = vmul.f32 %v8621_v31, %v4866_v11  ;;  %v4939_v23 = vrot.slane %v4922_v58, %v4938_v39 }
0x2a52   : > { %v6968_v1 = vpop.eup %6967 }
0x2a53   : > { %v4867_v41 = vmul.f32 %v6968_v1, %v8613_v5  ;;  %v4886_v12 = vadd.f32 %v8628_v18, %v4876_v6  ;;  %v4927_v5 = vrot.slane %v4922_v58, %v1781_v37 }
0x2a55   : > { %v4877_v22 = vmul.f32 %v8621_v31, %v4867_v41  ;;  %v4931_v31 = vrot.slane %v4922_v58, %v1785_v53 }
0x2a57   : > { %v4887_v2 = vadd.f32 %v8628_v18, %v4877_v22 }
0x2a59   : > { %v4921_v4 = vpack.c.bf16 %v4887_v2, %v4886_v12 }
0x2a5b   : > { %5147 = vmatmul.mubr.bf16.gmra.mrb[108].mxu1 %v4921_v4  ;;  %5200 = vmatmul.mubr.bf16.gmra.mrb[112].mxu0 %v4921_v4 }
0x2a9e   : > { %v5138_v18 = vpop.f32.mrb[104].mxu1  ;;  %v5191_v9 = vpop.f32.mrb[108].mxu0 }
0x2a9f   : > { %v5139_v34 = vadd.f32 %v5138_v18, %v4927_v5  ;;  %v5192_v57 = vadd.f32 %v5191_v9, %v4935_v59  ;;  %v5140_v17 = vpop.f32.mrb[105].mxu1  ;;  %v5193_v24 = vpop.f32.mrb[109].mxu0 }
0x2aa0   : > { %v5141_v33 = vadd.f32 %v5140_v17, %v4931_v31  ;;  %v5194_v43 = vadd.f32 %v5193_v24, %v4939_v23  ;;  %v5142_v35 = vpop.f32.mrb[106].mxu1  ;;  %v5195_v46 = vpop.f32.mrb[110].mxu0 }
0x2aa1   : > { %v5143_v10 = vadd.f32 %v5142_v35, %v4927_v5  ;;  %v5196_v8 = vadd.f32 %v5195_v46, %v4935_v59  ;;  %v5144_v37 = vpop.f32.mrb[107].mxu1  ;;  %v5197_v50 = vpop.f32.mrb[111].mxu0  ;;  %v5210_v30 = vmax.f32 %v5139_v34, 0.0  ;;  %v5212_v40 = vmax.f32 %v5192_v57, 0.0 }
0x2aa2   : > { %v5145_v47 = vadd.f32 %v5144_v37, %v4931_v31  ;;  %v5198_v26 = vadd.f32 %v5197_v50, %v4939_v23  ;;  %v5211_v28 = vmax.f32 %v5141_v33, 0.0  ;;  %v5213_v0 = vmax.f32 %v5194_v43, 0.0 }
0x2aa3   : > { %v5214_v53 = vmax.f32 %v5143_v10, 0.0  ;;  %v5216_v51 = vmax.f32 %v5196_v8, 0.0 }
0x2aa4   : > { %v5215_v32 = vmax.f32 %v5145_v47, 0.0  ;;  %v5217_v36 = vmax.f32 %v5198_v26, 0.0 }
0x2aa5   : > { %v5290_v15 = vpack.c.bf16 %v5214_v53, %v5210_v30  ;;  %v5292_v56 = vpack.c.bf16 %v5216_v51, %v5212_v40 }
0x2aa6   : > { %v5291_v27 = vpack.c.bf16 %v5215_v32, %v5211_v28  ;;  %v5293_v61 = vpack.c.bf16 %v5217_v36, %v5213_v0 }
0x2aa8   : > { %5529 = vmatprep.mubr.bf16.mxu1 %v5291_v27  ;;  %5578 = vmatprep.mubr.bf16.mxu0 %v5293_v61 }
0x2aa9   : > { %5530 = vmatmul.mubr.bf16.vlgmr.msra.gmra.mrb[112].mxu1 %v5290_v15  ;;  %5579 = vmatmul.mubr.bf16.vlgmr.msra.gmra.mrb[116].mxu0 %v5292_v56 }
0x2b2e   : > { %v5148_v21 = vpop.f32.mrb[108].mxu1  ;;  %v5201_v49 = vpop.f32.mrb[112].mxu0 }
0x2b2f   : > { %v5149_v62 = vadd.f32 %v5148_v21, %v4927_v5  ;;  %v5202_v19 = vadd.f32 %v5201_v49, %v4935_v59  ;;  %v5150_v42 = vpop.f32.mrb[109].mxu1  ;;  %v5203_v63 = vpop.f32.mrb[113].mxu0 }
0x2b30   : > { %v5151_v20 = vadd.f32 %v5150_v42, %v4931_v31  ;;  %v5204_v25 = vadd.f32 %v5203_v63, %v4939_v23  ;;  %v5152_v38 = vpop.f32.mrb[110].mxu1  ;;  %v5205_v14 = vpop.f32.mrb[114].mxu0 }
0x2b31   : > { %v5153_v3 = vadd.f32 %v5152_v38, %v4927_v5  ;;  %v5206_v52 = vadd.f32 %v5205_v14, %v4935_v59  ;;  %v5154_v45 = vpop.f32.mrb[111].mxu1  ;;  %v5207_v13 = vpop.f32.mrb[115].mxu0  ;;  %v5218_v60 = vmax.f32 %v5149_v62, 0.0  ;;  %v5220_v48 = vmax.f32 %v5202_v19, 0.0 }
0x2b32   : > { %v5155_v16 = vadd.f32 %v5154_v45, %v4931_v31  ;;  %v5208_v54 = vadd.f32 %v5207_v13, %v4939_v23  ;;  %v5219_v41 = vmax.f32 %v5151_v20, 0.0  ;;  %v5221_v6 = vmax.f32 %v5204_v25, 0.0  ;;  %v5956_v31 = vld [vmem:[%s8808_s13] ss:$0 sm:$0xff]  ;;  %s7229_s13 = scalar_lea.vmem %s7228_s3, 1024 }
0x2b33   : > { %v5222_v11 = vmax.f32 %v5153_v3, 0.0  ;;  %v5224_v1 = vmax.f32 %v5206_v52, 0.0  ;;  %p7231_p8 = scmp.lt.s32.totalorder %s7229_s13, %s7223_s15 }
0x2b34   : > { %v5223_v22 = vmax.f32 %v5155_v16, 0.0  ;;  %v5225_v12 = vmax.f32 %v5208_v54, 0.0 }
0x2b35   : > { %v5294_v2 = vpack.c.bf16 %v5222_v11, %v5218_v60  ;;  %v5296_v4 = vpack.c.bf16 %v5224_v1, %v5220_v48  ;;  %p7232_p4 = por %p7231_p8, %p7230_p2 }
0x2b36   : > { %v5295_v58 = vpack.c.bf16 %v5223_v22, %v5219_v41  ;;  %v5297_v39 = vpack.c.bf16 %v5225_v12, %v5221_v6 }
0x2b37   : > { %p7233_p10 = pnand %p7232_p4, %p7226_p0 }
0x2b38   : > { %5537 = vmatprep.mubr.bf16.mxu1 %v5295_v58  ;;  %5586 = vmatprep.mubr.bf16.mxu0 %v5297_v39 }
0x2b39   : > { %5538 = vmatmul.mubr.bf16.gmra.mrb[116].mxu1 %v5294_v2  ;;  %5587 = vmatmul.mubr.bf16.gmra.mrb[120].mxu0 %v5296_v4 }
0x2b7c   : > { %v6138_v5 = vpop.f32.mrb[112].mxu1  ;;  %v6166_v59 = vpop.f32.mrb[116].mxu0 }
0x2b7d   : > { %v6139_v23 = vpop.f32.mrb[113].mxu1  ;;  %v6167_v18 = vpop.f32.mrb[117].mxu0 }
0x2b7e   : > { %v6140_v9 = vadd.f32 %v6139_v23, %v6138_v5  ;;  %v6168_v34 = vadd.f32 %v6167_v18, %v6166_v59  ;;  %v6141_v57 = vpop.f32.mrb[114].mxu1  ;;  %v6169_v17 = vpop.f32.mrb[118].mxu0 }
0x2b7f   : > { %v6142_v24 = vpop.f32.mrb[115].mxu1  ;;  %v6170_v33 = vpop.f32.mrb[119].mxu0 }
0x2b80   : > { %v5532_v43 = vadd.f32 %v6140_v9, %v5956_v31  ;;  %v6143_v35 = vadd.f32 %v6142_v24, %v6141_v57  ;;  %v6171_v46 = vadd.f32 %v6170_v33, %v6169_v17 }
0x2b82   : > { %v5581_v10 = vadd.f32 %v6168_v34, %v5532_v43  ;;  %v5535_v8 = vadd.f32 %v6143_v35, %v5956_v31 }
0x2b84   : > { %v5595_v37 = vadd.f32 %v5581_v10, %v8576_v44  ;;  %v5584_v50 = vadd.f32 %v6171_v46, %v5535_v8 }
0x2b86   : > { %5599 = vst [vmem:[%s869_s1] sm:$0xff] %v5595_v37  ;;  %v5596_v47 = vadd.f32 %v5584_v50, %v8580_v7 }
0x2b88   : > { %5600 = vst [vmem:[%s869_s1 + $0x8] sm:$0xff] %v5596_v47 }
0x2c0c   : > { %v6144_v26 = vpop.f32.mrb[116].mxu1  ;;  %v6172_v30 = vpop.f32.mrb[120].mxu0 }
0x2c0d   : > { %v6145_v40 = vpop.f32.mrb[117].mxu1  ;;  %v6173_v53 = vpop.f32.mrb[121].mxu0 }
0x2c0e   : > { %v6146_v51 = vadd.f32 %v6145_v40, %v6144_v26  ;;  %v6174_v28 = vadd.f32 %v6173_v53, %v6172_v30  ;;  %v6147_v0 = vpop.f32.mrb[118].mxu1  ;;  %v6175_v32 = vpop.f32.mrb[122].mxu0 }
0x2c0f   : > { %v6148_v36 = vpop.f32.mrb[119].mxu1  ;;  %v6176_v15 = vpop.f32.mrb[123].mxu0 }
0x2c10   : > { %v5540_v44 = vadd.f32 %v6146_v51, %v5956_v31  ;;  %v6149_v56 = vadd.f32 %v6148_v36, %v6147_v0  ;;  %v6177_v27 = vadd.f32 %v6176_v15, %v6175_v32 }
0x2c12   : > { %v5589_v61 = vadd.f32 %v6174_v28, %v5540_v44  ;;  %v5543_v7 = vadd.f32 %v6149_v56, %v5956_v31 }
0x2c14   : > { %v5597_v21 = vadd.f32 %v5589_v61, %v8595_v29  ;;  %v5592_v49 = vadd.f32 %v6177_v27, %v5543_v7 }
0x2c16   : > { %5601 = vst [vmem:[%s869_s1 + $0x10] sm:$0xff] %v5597_v21  ;;  %v5598_v62 = vadd.f32 %v5592_v49, %v8602_v55 }
0x2c18   : > { %5602 = vst [vmem:[%s869_s1 + $0x18] sm:$0xff] %v5598_v62 }
0x2c19   : > { %7236 = shalt.err (!%p7233_p10)
}
0x2c1a   : > { %s7237_s1 = scalar_lea.hbm %s8665_s4, 512  ;;  %s7241_s6 = scalar_lea.hbm %s8809_s21, 1024 }
0x2c1b   : > { %p7238_p11 = scmp.ne.s32.totalorder %s8665_s4, %s7237_s1  ;;  %p7242_p7 = scmp.lt.u32.totalorder %s8665_s4, %s8809_s21 }
0x2c1c   : > { %p7243_p6 = scmp.lt.u32.totalorder %s7241_s6, %s7237_s1  ;;  %p7245_p12 = scmp.lt.u32.totalorder %s7237_s1, %s8665_s4 }
0x2c1d   : > { %p7239_p3 = pnand %p7238_p11, %p8810_p1 }
0x2c1e   : > { %p7244_p9 = por %p7243_p6, %p7242_p7 }
0x2c1f   : > { %p7240_p5 = pneg %p7239_p3 }
0x2c20   : > { %p7246_p13 = por %p7245_p12, %p7244_p9 }
0x2c22   : > { %p7247_p0 = pnand %p7246_p13, %p7240_p5 }
0x2c24   : > { %7250 = shalt.err (!%p7247_p0)
}
0x2c25   : > { %s7335_s15 = smov 128   ;;  %s7336_s13 = smov 8  }
0x2c26   : > { %6560 = dma.vmem_to_hbm [thread:$0]  (%p8810_p1), %s8659_s24, 512, %s8665_s4, %s5604_s18, %s7335_s15, %s7335_s15, %s7336_s13  }
0x2c27 PF: > { %s5632_s8 = sand.u32 1, %s7293_s5   ;;  %p8811_p2 = scmp.ne.s32.totalorder %s8783_s22, 0 }
0x2c28   : > { %p8812_p8 = scmp.ge.s32.totalorder %s7305_s28, 2  ;;  %s5633_s1 = scalar_lea.sflag [#allocation5], %s5632_s8 }
0x2c2a   : > { %p6592_p4 = pnand %p8812_p8, %p8811_p2 }
0x2c2c   : > { %7288 = dma.done.wait (!%p6592_p4), %s5633_s1, 512  }
0x2c2d   : > { %7290 = vsyncadd (!%p6592_p4), %s5633_s1, 4294966784  ;;  %p41_p10 = scmp.ge.s32.totalorder %s7690_s7, 4   ;;  %s8813_s5 = smov %s7297_s26 }
0x2c2e   : > { %s8814_s26 = smov %s7301_s27  ;;  %s8815_s27 = smov %s7701_s17 }
0x2c2f   : > { %s8816_s28 = smov %s7690_s7  ;;  %43 = sbr.rel (!%p41_p10) target bundleno = 30 (0x1e), region = 201 }
0x2c36   :  { %5638 = vsyncpa [#allocation4], 1 }
0x2c37   :  { %5640 = vsyncpa [#allocation4 + $0x1], 1 }
0x2c38   :  { %5641 = vsyncpa [#allocation7], 1 }
0x2c39   :  { %5642 = vsyncpa [#allocation10], 1 }
0x2c3a   :  { %5643 = vsyncpa [#allocation13], 1 }
0x2c3b   :  { %5644 = vsyncpa [#allocation16], 1 }
0x2c3c   :  { %5645 = vsyncpa [#allocation5], 1 }
0x2c3d   :  { %5647 = vsyncpa [#allocation5 + $0x1], 1 }

</bundles_post_ra>
